<compile_context>
chip_gen: v6e
topology: v6e:2x2x1
jax: 0.10.0
libtpu: 0.0.40
codegen_flags: <defaults>
</compile_context>

<pallas_src>
import jax
import jax.numpy as jnp
from jax import lax
from jax.experimental import pallas as pl
from jax.experimental.pallas import tpu as pltpu

# ---- model hyper-parameters (mirror DAGMM.__init__) ------------------------
N_FEATS = 4
N_WINDOW = 5
N_HIDDEN = 16
N_LATENT = 8
N = N_FEATS * N_WINDOW          # 20
N_GMM = N_FEATS * N_WINDOW      # 20
COS_EPS = 1e-8                  # F.cosine_similarity eps

# (fan_in, fan_out) of every Linear, in execution order.
LAYER_DIMS = (
    (N, N_HIDDEN), (N_HIDDEN, N_HIDDEN), (N_HIDDEN, N_LATENT),      # encoder
    (N_LATENT, N_HIDDEN), (N_HIDDEN, N_HIDDEN), (N_HIDDEN, N),      # decoder
    (N_LATENT + 2, N_HIDDEN), (N_HIDDEN, N_GMM),                    # estimate
)
N_LAYERS = len(LAYER_DIMS)      # 8
K_MAX = 32                      # padded fan_in  (sublane dim of a weight tile)
F_MAX = 32                      # padded fan_out (lane dim of a weight tile)

Z_DIM = N_LATENT + 2            # 10
OUT_W = 64                      # packed output: z(10) | x_hat(20) | gamma(20) | pad(14)
OUT_PAD = OUT_W - (Z_DIM + 2 * N)

TB = 128                        # batch rows per grid step (raise to 512 on v7x)


def dagmm_kernel(x_ref, w_ref, b_ref, out_ref):
    x = x_ref[...]                                   # (TB, N) f32

    def linear(h, li):
        k, n = LAYER_DIMS[li]
        w = w_ref[li, 0:k, 0:n]                      # static slice of the weight slab
        b = b_ref[li:li + 1, 0:n]                    # (1, n), broadcasts over rows
        return jnp.dot(h, w, preferred_element_type=jnp.float32) + b

    # ---------------- encoder: Linear-Tanh-Linear-Tanh-Linear ----------------
    h = jnp.tanh(linear(x, 0))
    h = jnp.tanh(linear(h, 1))
    z_c = linear(h, 2)                               # (TB, 8)

    # ------------- decoder: Linear-Tanh-Linear-Tanh-Linear-Sigmoid -----------
    d = jnp.tanh(linear(z_c, 3))
    d = jnp.tanh(linear(d, 4))
    x_hat = jax.nn.sigmoid(linear(d, 5))             # (TB, 20)

    # ---------------- reconstruction features (row-wise reductions) ----------
    diff = x - x_hat
    sum_d2 = jnp.sum(diff * diff, axis=1, keepdims=True)
    sum_x2 = jnp.sum(x * x, axis=1, keepdims=True)
    sum_h2 = jnp.sum(x_hat * x_hat, axis=1, keepdims=True)
    dot_xh = jnp.sum(x * x_hat, axis=1, keepdims=True)
    norm_x = jnp.sqrt(sum_x2)
    norm_h = jnp.sqrt(sum_h2)
    # relative euclidean distance: ||x - x_hat|| / ||x||  (rsqrt -> EUP slot)
    rec_1 = jnp.sqrt(sum_d2) * lax.rsqrt(sum_x2)
    # cosine similarity, PyTorch semantics: each norm clamped to eps separately
    denom = jnp.maximum(norm_x, COS_EPS) * jnp.maximum(norm_h, COS_EPS)
    rec_2 = dot_xh * pl.reciprocal(denom, approx=False)

    # z built in registers (no partial stores / readback)
    z = jnp.concatenate([z_c, rec_1, rec_2], axis=1)  # (TB, 10)

    # -------- estimate: Linear-Tanh-(Dropout=identity in eval)-Linear-Softmax
    # TODO(synk): training-mode Dropout(0.5) not implemented (eval semantics).
    e = jnp.tanh(linear(z, 6))
    logits = linear(e, 7)                            # (TB, 20)
    m = jnp.max(logits, axis=1, keepdims=True)
    ex = jnp.exp(logits - m)
    gamma = ex * pl.reciprocal(jnp.sum(ex, axis=1, keepdims=True), approx=False)

    # single lane-dense packed store
    pad = jnp.zeros((x.shape[0], OUT_PAD), dtype=jnp.float32)
    out_ref[...] = jnp.concatenate([z, x_hat, gamma, pad], axis=1)


def init_linear(key, fan_in, fan_out):
    """PyTorch nn.Linear default init: U(-1/sqrt(fan_in), 1/sqrt(fan_in))."""
    kw, kb = jax.random.split(key)
    bound = 1.0 / float(fan_in) ** 0.5
    w = jax.random.uniform(kw, (fan_in, fan_out), jnp.float32, -bound, bound)
    b = jax.random.uniform(kb, (fan_out,), jnp.float32, -bound, bound)
    return w, b


def make_params(key):
    keys = jax.random.split(key, N_LAYERS)
    return [init_linear(keys[i], *LAYER_DIMS[i]) for i in range(N_LAYERS)]


def pack_params(layers):
    """Pack the 16 small tensors into one weight slab + one bias slab."""
    w_slab = jnp.zeros((N_LAYERS, K_MAX, F_MAX), jnp.float32)
    b_slab = jnp.zeros((N_LAYERS, F_MAX), jnp.float32)
    for i, (w, b) in enumerate(layers):
        k, n = w.shape
        w_slab = w_slab.at[i, :k, :n].set(w)
        b_slab = b_slab.at[i, :n].set(b)
    return w_slab, b_slab


@jax.jit
def dagmm_forward_batched(x, w_slab, b_slab):
    """Batched DAGMM forward. x: (B, n_window, n_feats) or (B, n)."""
    B = x.shape[0]
    x2d = x.reshape(B, -1).astype(jnp.float32)
    assert x2d.shape[1] == N

    n_blocks = (B + TB - 1) // TB
    B_pad = n_blocks * TB
    if B_pad != B:
        x2d = jnp.pad(x2d, ((0, B_pad - B), (0, 0)))

    flops_per_row = 2 * sum(k * n for k, n in LAYER_DIMS)
    trans_per_row = 5 * N_HIDDEN + N + N_GMM + 4
    cost = pl.CostEstimate(
        flops=flops_per_row * B_pad,
        transcendentals=trans_per_row * B_pad,
        bytes_accessed=4 * (B_pad * (N + OUT_W)
                            + N_LAYERS * (K_MAX * F_MAX + F_MAX)),
    )

    out = pl.pallas_call(
        dagmm_kernel,
        out_shape=jax.ShapeDtypeStruct((B_pad, OUT_W), jnp.float32),
        grid=(n_blocks,),
        in_specs=[
            pl.BlockSpec((TB, N), lambda i: (i, 0)),                      # x tile
            pl.BlockSpec((N_LAYERS, K_MAX, F_MAX), lambda i: (0, 0, 0)),  # weight slab
            pl.BlockSpec((N_LAYERS, F_MAX), lambda i: (0, 0)),            # bias slab
        ],
        out_specs=pl.BlockSpec((TB, OUT_W), lambda i: (i, 0)),
        compiler_params=pltpu.CompilerParams(
            dimension_semantics=("parallel",)),
        cost_estimate=cost,
    )(x2d, w_slab, b_slab)

    out = out[:B]
    z = out[:, :Z_DIM]
    z_c = out[:, :N_LATENT]
    x_hat = out[:, Z_DIM:Z_DIM + N]
    gamma = out[:, Z_DIM + N:Z_DIM + 2 * N]
    return z_c, x_hat, z, gamma


def dagmm_forward(x, w_slab, b_slab):
    """Single-window forward matching DAGMM.forward's return signature."""
    z_c, x_hat, z, gamma = dagmm_forward_batched(
        jnp.reshape(x, (1, -1)), w_slab, b_slab)
    return z_c, x_hat.reshape(-1), z, gamma.reshape(-1)


def dagmm_reference(x, layers):
    """Pure-JAX reference of the PyTorch forward (batched over rows)."""
    x2d = x.reshape(x.shape[0], -1).astype(jnp.float32)

    def lin(h, i):
        w, b = layers[i]
        return jnp.dot(h, w, precision=lax.Precision.HIGHEST) + b

    h = jnp.tanh(lin(x2d, 0))
    h = jnp.tanh(lin(h, 1))
    z_c = lin(h, 2)
    d = jnp.tanh(lin(z_c, 3))
    d = jnp.tanh(lin(d, 4))
    x_hat = jax.nn.sigmoid(lin(d, 5))
    rec_1 = (jnp.linalg.norm(x2d - x_hat, axis=1, keepdims=True)
             / jnp.linalg.norm(x2d, axis=1, keepdims=True))
    nx = jnp.maximum(jnp.linalg.norm(x2d, axis=1, keepdims=True), COS_EPS)
    nh = jnp.maximum(jnp.linalg.norm(x_hat, axis=1, keepdims=True), COS_EPS)
    rec_2 = jnp.sum(x2d * x_hat, axis=1, keepdims=True) / (nx * nh)
    z = jnp.concatenate([z_c, rec_1, rec_2], axis=1)
    e = jnp.tanh(lin(z, 6))
    gamma = jax.nn.softmax(lin(e, 7), axis=1)
    return z_c, x_hat, z, gamma


if __name__ == "__main__":
    key = jax.random.PRNGKey(0)
    k_params, k_x = jax.random.split(key)
    layers = make_params(k_params)
    w_slab, b_slab = pack_params(layers)

    # batch of windows: (B, n_window, n_feats)
    B = 256
    x = jax.random.normal(k_x, (B, N_WINDOW, N_FEATS), dtype=jnp.float32)

    z_c, x_hat, z, gamma = dagmm_forward_batched(x, w_slab, b_slab)
    jax.block_until_ready((z_c, x_hat, z, gamma))

    assert z_c.shape == (B, N_LATENT)
    assert x_hat.shape == (B, N)
    assert z.shape == (B, Z_DIM)
    assert gamma.shape == (B, N_GMM)
    assert bool(jnp.all(jnp.isfinite(gamma)))
    assert bool(jnp.all(jnp.abs(jnp.sum(gamma, axis=1) - 1.0) < 1e-4))

    # correctness vs. a pure-JAX reference of the PyTorch forward
    zc_r, xh_r, z_r, g_r = dagmm_reference(x, layers)
    for got, ref in ((z_c, zc_r), (x_hat, xh_r), (z, z_r), (gamma, g_r)):
        assert bool(jnp.allclose(got, ref, rtol=1e-4, atol=1e-4)), float(
            jnp.max(jnp.abs(got - ref)))

    # single-window path (same shapes as the PyTorch module's return values)
    zc1, xh1, z1, g1 = dagmm_forward(x[0], w_slab, b_slab)
    jax.block_until_ready((zc1, xh1, z1, g1))
    assert zc1.shape == (1, N_LATENT) and xh1.shape == (N,)
    assert z1.shape == (1, Z_DIM) and g1.shape == (N_GMM,)

    print("KERNEL_OK")
</pallas_src>

<mosaic_0001>
module attributes {stable_mosaic.version = 11 : i64} {
  func.func @dagmm_kernel(%arg0: i32, %arg1: memref<128x20xf32, #tpu.memory_space<vmem>>, %arg2: memref<8x32x32xf32, #tpu.memory_space<vmem>>, %arg3: memref<8x32xf32, #tpu.memory_space<vmem>>, %arg4: memref<128x64xf32, #tpu.memory_space<vmem>>) attributes {dimension_semantics = [#tpu.dimension_semantics<parallel>], iteration_bounds = array<i64: 2>, scalar_prefetch = 0 : i64, scratch_operands = 0 : i64, tpu.core_type = #tpu.core_type<tc>, window_params = [{transform_indices = @transform_0, window_bounds = array<i64: 128, 20>}, {pipeline_mode = #tpu.pipeline_mode<synchronous>, transform_indices = @transform_1, window_bounds = array<i64: 8, 32, 32>}, {pipeline_mode = #tpu.pipeline_mode<synchronous>, transform_indices = @transform_2, window_bounds = array<i64: 8, 32>}, {transform_indices = @transform_3, window_bounds = array<i64: 128, 64>}]} {
    %c0 = arith.constant 0 : index
    %c0_0 = arith.constant 0 : index
    %0 = vector.load %arg1[%c0, %c0_0] : memref<128x20xf32, #tpu.memory_space<vmem>>, vector<128x20xf32>
    %c0_1 = arith.constant 0 : index
    %c0_2 = arith.constant 0 : index
    %c0_3 = arith.constant 0 : index
    %1 = vector.load %arg2[%c0_1, %c0_2, %c0_3] : memref<8x32x32xf32, #tpu.memory_space<vmem>>, vector<1x20x16xf32>
    %2 = vector.shape_cast %1 : vector<1x20x16xf32> to vector<20x16xf32>
    %c0_4 = arith.constant 0 : index
    %c0_5 = arith.constant 0 : index
    %3 = vector.load %arg3[%c0_4, %c0_5] : memref<8x32xf32, #tpu.memory_space<vmem>>, vector<1x16xf32>
    %cst = arith.constant dense<0.000000e+00> : vector<128x16xf32>
    %4 = tpu.matmul %0, %2, %cst {dimension_numbers = #tpu.dot_dimension_numbers<[1], [0], [0], [1], [0, 0, 1, 1], [], []>} : vector<128x20xf32>, vector<20x16xf32>, vector<128x16xf32> -> vector<128x16xf32>
    %5 = vector.broadcast %3 : vector<1x16xf32> to vector<128x16xf32>
    %6 = arith.addf %4, %5 : vector<128x16xf32>
    %7 = math.tanh %6 : vector<128x16xf32>
    %c1 = arith.constant 1 : index
    %c0_6 = arith.constant 0 : index
    %c0_7 = arith.constant 0 : index
    %8 = vector.load %arg2[%c1, %c0_6, %c0_7] : memref<8x32x32xf32, #tpu.memory_space<vmem>>, vector<1x16x16xf32>
    %9 = vector.shape_cast %8 : vector<1x16x16xf32> to vector<16x16xf32>
    %c1_8 = arith.constant 1 : index
    %c0_9 = arith.constant 0 : index
    %10 = vector.load %arg3[%c1_8, %c0_9] : memref<8x32xf32, #tpu.memory_space<vmem>>, vector<1x16xf32>
    %cst_10 = arith.constant dense<0.000000e+00> : vector<128x16xf32>
    %11 = tpu.matmul %7, %9, %cst_10 {dimension_numbers = #tpu.dot_dimension_numbers<[1], [0], [0], [1], [0, 0, 1, 1], [], []>} : vector<128x16xf32>, vector<16x16xf32>, vector<128x16xf32> -> vector<128x16xf32>
    %12 = vector.broadcast %10 : vector<1x16xf32> to vector<128x16xf32>
    %13 = arith.addf %11, %12 : vector<128x16xf32>
    %14 = math.tanh %13 : vector<128x16xf32>
    %c2 = arith.constant 2 : index
    %c0_11 = arith.constant 0 : index
    %c0_12 = arith.constant 0 : index
    %15 = vector.load %arg2[%c2, %c0_11, %c0_12] : memref<8x32x32xf32, #tpu.memory_space<vmem>>, vector<1x16x8xf32>
    %16 = vector.shape_cast %15 : vector<1x16x8xf32> to vector<16x8xf32>
    %c2_13 = arith.constant 2 : index
    %c0_14 = arith.constant 0 : index
    %17 = vector.load %arg3[%c2_13, %c0_14] : memref<8x32xf32, #tpu.memory_space<vmem>>, vector<1x8xf32>
    %cst_15 = arith.constant dense<0.000000e+00> : vector<128x8xf32>
    %18 = tpu.matmul %14, %16, %cst_15 {dimension_numbers = #tpu.dot_dimension_numbers<[1], [0], [0], [1], [0, 0, 1, 1], [], []>} : vector<128x16xf32>, vector<16x8xf32>, vector<128x8xf32> -> vector<128x8xf32>
    %19 = vector.broadcast %17 : vector<1x8xf32> to vector<128x8xf32>
    %20 = arith.addf %18, %19 : vector<128x8xf32>
    %c3 = arith.constant 3 : index
    %c0_16 = arith.constant 0 : index
    %c0_17 = arith.constant 0 : index
    %21 = vector.load %arg2[%c3, %c0_16, %c0_17] : memref<8x32x32xf32, #tpu.memory_space<vmem>>, vector<1x8x16xf32>
    %22 = vector.shape_cast %21 : vector<1x8x16xf32> to vector<8x16xf32>
    %c3_18 = arith.constant 3 : index
    %c0_19 = arith.constant 0 : index
    %23 = vector.load %arg3[%c3_18, %c0_19] : memref<8x32xf32, #tpu.memory_space<vmem>>, vector<1x16xf32>
    %cst_20 = arith.constant dense<0.000000e+00> : vector<128x16xf32>
    %24 = tpu.matmul %20, %22, %cst_20 {dimension_numbers = #tpu.dot_dimension_numbers<[1], [0], [0], [1], [0, 0, 1, 1], [], []>} : vector<128x8xf32>, vector<8x16xf32>, vector<128x16xf32> -> vector<128x16xf32>
    %25 = vector.broadcast %23 : vector<1x16xf32> to vector<128x16xf32>
    %26 = arith.addf %24, %25 : vector<128x16xf32>
    %27 = math.tanh %26 : vector<128x16xf32>
    %c4 = arith.constant 4 : index
    %c0_21 = arith.constant 0 : index
    %c0_22 = arith.constant 0 : index
    %28 = vector.load %arg2[%c4, %c0_21, %c0_22] : memref<8x32x32xf32, #tpu.memory_space<vmem>>, vector<1x16x16xf32>
    %29 = vector.shape_cast %28 : vector<1x16x16xf32> to vector<16x16xf32>
    %c4_23 = arith.constant 4 : index
    %c0_24 = arith.constant 0 : index
    %30 = vector.load %arg3[%c4_23, %c0_24] : memref<8x32xf32, #tpu.memory_space<vmem>>, vector<1x16xf32>
    %cst_25 = arith.constant dense<0.000000e+00> : vector<128x16xf32>
    %31 = tpu.matmul %27, %29, %cst_25 {dimension_numbers = #tpu.dot_dimension_numbers<[1], [0], [0], [1], [0, 0, 1, 1], [], []>} : vector<128x16xf32>, vector<16x16xf32>, vector<128x16xf32> -> vector<128x16xf32>
    %32 = vector.broadcast %30 : vector<1x16xf32> to vector<128x16xf32>
    %33 = arith.addf %31, %32 : vector<128x16xf32>
    %34 = math.tanh %33 : vector<128x16xf32>
    %c5 = arith.constant 5 : index
    %c0_26 = arith.constant 0 : index
    %c0_27 = arith.constant 0 : index
    %35 = vector.load %arg2[%c5, %c0_26, %c0_27] : memref<8x32x32xf32, #tpu.memory_space<vmem>>, vector<1x16x20xf32>
    %36 = vector.shape_cast %35 : vector<1x16x20xf32> to vector<16x20xf32>
    %c5_28 = arith.constant 5 : index
    %c0_29 = arith.constant 0 : index
    %37 = vector.load %arg3[%c5_28, %c0_29] : memref<8x32xf32, #tpu.memory_space<vmem>>, vector<1x20xf32>
    %cst_30 = arith.constant dense<0.000000e+00> : vector<128x20xf32>
    %38 = tpu.matmul %34, %36, %cst_30 {dimension_numbers = #tpu.dot_dimension_numbers<[1], [0], [0], [1], [0, 0, 1, 1], [], []>} : vector<128x16xf32>, vector<16x20xf32>, vector<128x20xf32> -> vector<128x20xf32>
    %39 = vector.broadcast %37 : vector<1x20xf32> to vector<128x20xf32>
    %40 = arith.addf %38, %39 : vector<128x20xf32>
    %41 = arith.negf %40 : vector<128x20xf32>
    %42 = math.exp %41 : vector<128x20xf32>
    %cst_31 = arith.constant 1.000000e+00 : f32
    %43 = vector.broadcast %cst_31 : f32 to vector<128x20xf32>
    %44 = arith.addf %43, %42 : vector<128x20xf32>
    %45 = arith.divf %43, %44 : vector<128x20xf32>
    %46 = arith.subf %0, %45 : vector<128x20xf32>
    %47 = arith.mulf %46, %46 : vector<128x20xf32>
    %cst_32 = arith.constant dense<0.000000e+00> : vector<128xf32>
    %48 = vector.multi_reduction <add>, %47, %cst_32 [1] : vector<128x20xf32> to vector<128xf32>
    %49 = vector.shape_cast %48 : vector<128xf32> to vector<128x1xf32>
    %50 = arith.mulf %0, %0 : vector<128x20xf32>
    %cst_33 = arith.constant dense<0.000000e+00> : vector<128xf32>
    %51 = vector.multi_reduction <add>, %50, %cst_33 [1] : vector<128x20xf32> to vector<128xf32>
    %52 = vector.shape_cast %51 : vector<128xf32> to vector<128x1xf32>
    %53 = arith.mulf %45, %45 : vector<128x20xf32>
    %cst_34 = arith.constant dense<0.000000e+00> : vector<128xf32>
    %54 = vector.multi_reduction <add>, %53, %cst_34 [1] : vector<128x20xf32> to vector<128xf32>
    %55 = vector.shape_cast %54 : vector<128xf32> to vector<128x1xf32>
    %56 = arith.mulf %0, %45 : vector<128x20xf32>
    %cst_35 = arith.constant dense<0.000000e+00> : vector<128xf32>
    %57 = vector.multi_reduction <add>, %56, %cst_35 [1] : vector<128x20xf32> to vector<128xf32>
    %58 = vector.shape_cast %57 : vector<128xf32> to vector<128x1xf32>
    %59 = math.sqrt %52 : vector<128x1xf32>
    %60 = math.sqrt %55 : vector<128x1xf32>
    %61 = math.sqrt %49 : vector<128x1xf32>
    %62 = math.rsqrt %52 : vector<128x1xf32>
    %63 = arith.mulf %61, %62 : vector<128x1xf32>
    %cst_36 = arith.constant 9.99999993E-9 : f32
    %64 = vector.broadcast %cst_36 : f32 to vector<128x1xf32>
    %65 = arith.maximumf %59, %64 : vector<128x1xf32>
    %cst_37 = arith.constant 9.99999993E-9 : f32
    %66 = vector.broadcast %cst_37 : f32 to vector<128x1xf32>
    %67 = arith.maximumf %60, %66 : vector<128x1xf32>
    %68 = arith.mulf %65, %67 : vector<128x1xf32>
    %69 = tpu.reciprocal %68 : vector<128x1xf32> -> vector<128x1xf32>
    %70 = arith.mulf %58, %69 : vector<128x1xf32>
    %71 = tpu.concatenate %20, %63, %70 in 1 : vector<128x8xf32>, vector<128x1xf32>, vector<128x1xf32> -> vector<128x10xf32>
    %c6 = arith.constant 6 : index
    %c0_38 = arith.constant 0 : index
    %c0_39 = arith.constant 0 : index
    %72 = vector.load %arg2[%c6, %c0_38, %c0_39] : memref<8x32x32xf32, #tpu.memory_space<vmem>>, vector<1x10x16xf32>
    %73 = vector.shape_cast %72 : vector<1x10x16xf32> to vector<10x16xf32>
    %c6_40 = arith.constant 6 : index
    %c0_41 = arith.constant 0 : index
    %74 = vector.load %arg3[%c6_40, %c0_41] : memref<8x32xf32, #tpu.memory_space<vmem>>, vector<1x16xf32>
    %cst_42 = arith.constant dense<0.000000e+00> : vector<128x16xf32>
    %75 = tpu.matmul %71, %73, %cst_42 {dimension_numbers = #tpu.dot_dimension_numbers<[1], [0], [0], [1], [0, 0, 1, 1], [], []>} : vector<128x10xf32>, vector<10x16xf32>, vector<128x16xf32> -> vector<128x16xf32>
    %76 = vector.broadcast %74 : vector<1x16xf32> to vector<128x16xf32>
    %77 = arith.addf %75, %76 : vector<128x16xf32>
    %78 = math.tanh %77 : vector<128x16xf32>
    %c7 = arith.constant 7 : index
    %c0_43 = arith.constant 0 : index
    %c0_44 = arith.constant 0 : index
    %79 = vector.load %arg2[%c7, %c0_43, %c0_44] : memref<8x32x32xf32, #tpu.memory_space<vmem>>, vector<1x16x20xf32>
    %80 = vector.shape_cast %79 : vector<1x16x20xf32> to vector<16x20xf32>
    %c7_45 = arith.constant 7 : index
    %c0_46 = arith.constant 0 : index
    %81 = vector.load %arg3[%c7_45, %c0_46] : memref<8x32xf32, #tpu.memory_space<vmem>>, vector<1x20xf32>
    %cst_47 = arith.constant dense<0.000000e+00> : vector<128x20xf32>
    %82 = tpu.matmul %78, %80, %cst_47 {dimension_numbers = #tpu.dot_dimension_numbers<[1], [0], [0], [1], [0, 0, 1, 1], [], []>} : vector<128x16xf32>, vector<16x20xf32>, vector<128x20xf32> -> vector<128x20xf32>
    %83 = vector.broadcast %81 : vector<1x20xf32> to vector<128x20xf32>
    %84 = arith.addf %82, %83 : vector<128x20xf32>
    %cst_48 = arith.constant dense<0xFF800000> : vector<128xf32>
    %85 = vector.multi_reduction <maximumf>, %84, %cst_48 [1] : vector<128x20xf32> to vector<128xf32>
    %86 = vector.shape_cast %85 : vector<128xf32> to vector<128x1xf32>
    %87 = vector.broadcast %86 : vector<128x1xf32> to vector<128x20xf32>
    %88 = arith.subf %84, %87 : vector<128x20xf32>
    %89 = math.exp %88 : vector<128x20xf32>
    %cst_49 = arith.constant dense<0.000000e+00> : vector<128xf32>
    %90 = vector.multi_reduction <add>, %89, %cst_49 [1] : vector<128x20xf32> to vector<128xf32>
    %91 = vector.shape_cast %90 : vector<128xf32> to vector<128x1xf32>
    %92 = tpu.reciprocal %91 : vector<128x1xf32> -> vector<128x1xf32>
    %93 = vector.broadcast %92 : vector<128x1xf32> to vector<128x20xf32>
    %94 = arith.mulf %89, %93 : vector<128x20xf32>
    %cst_50 = arith.constant 0.000000e+00 : f32
    %95 = vector.broadcast %cst_50 : f32 to vector<128x14xf32>
    %96 = tpu.concatenate %71, %45, %94, %95 in 1 : vector<128x10xf32>, vector<128x20xf32>, vector<128x20xf32>, vector<128x14xf32> -> vector<128x64xf32>
    %c0_51 = arith.constant 0 : index
    %c0_52 = arith.constant 0 : index
    %97 = vector.load %arg4[%c0_51, %c0_52] : memref<128x64xf32, #tpu.memory_space<vmem>>, vector<128x64xf32>
    tpu.vector_store %arg4[%c0_51, %c0_52], %96 {strides = array<i32>} : memref<128x64xf32, #tpu.memory_space<vmem>>, vector<128x64xf32>,
    return
  }
  func.func @transform_0(%arg0: i32) -> (i32, i32) {
    %c0_i32 = arith.constant 0 : i32
    %c0_i32_0 = arith.constant 0 : i32
    return %arg0, %c0_i32 : i32, i32
  }
  func.func @transform_1(%arg0: i32) -> (i32, i32, i32) {
    %c0_i32 = arith.constant 0 : i32
    %c0_i32_0 = arith.constant 0 : i32
    %c0_i32_1 = arith.constant 0 : i32
    %c0_i32_2 = arith.constant 0 : i32
    return %c0_i32, %c0_i32_0, %c0_i32_1 : i32, i32, i32
  }
  func.func @transform_2(%arg0: i32) -> (i32, i32) {
    %c0_i32 = arith.constant 0 : i32
    %c0_i32_0 = arith.constant 0 : i32
    %c0_i32_1 = arith.constant 0 : i32
    return %c0_i32, %c0_i32_0 : i32, i32
  }
  func.func @transform_3(%arg0: i32) -> (i32, i32) {
    %c0_i32 = arith.constant 0 : i32
    %c0_i32_0 = arith.constant 0 : i32
    return %arg0, %c0_i32 : i32, i32
  }
}

</mosaic_0001>

<bundles_post_ra>
// kernel: dagmm_forward_batched.1
= control target key start
LH: loop header
LB: loop body
LE: loop exit
PB: predicated region body
PF: predicated region fallthrough
CT: control target
= control target key end

     0   :  { %s4183_s12 = smov 0   ;;  %s5928_s0 = inlined_call_operand.vmem [shape: f32[256,20], index: 0, kind: input, shape index: {}]   ;;  %s5929_s1 = inlined_call_operand.vmem [shape: f32[8,32,32], index: 1, kind: input, shape index: {}]   ;;  %s5930_s2 = inlined_call_operand.vmem [shape: f32[8,32], index: 2, kind: input, shape index: {}]   ;;  %s5931_s3 = inlined_call_operand.vmem [shape: f32[256,64], index: 3, kind: output, shape index: {}]  }
   0x1 LB: > { %s3165_s13 = sadd.s32 4294967295, %s4159_s12   ;;  %p3169_p0 = scmp.ge.s32.totalorder %s4159_s12, 1  ;;  %s4159_s12 = sphi %s4183_s12, %s13_s12  }
   0x2   : > { %p138_p1 = scmp.lt.s32.totalorder %s4159_s12, 3 }
   0x4   : > { %p139_p2 = pnand %p3169_p0, %p138_p1 }
   0x6   : > { %142 = sbr.rel (%p139_p2) target bundleno = 2386 (0x952), region = 32 }
   0xb   : > { %v192_v0 = vld [vmem:[%s5929_s1 + $0x10] sm:$0xf]  ;;  %vm247_vm0 = vcmask 1043456   ;;  %v191_v1 = vld [vmem:[%s5929_s1 + $0x8] sm:$0xff]  ;;  %s3170_s18 = sshll.u32 %s3165_s13, 4  ;;  %v190_v2 = vld [vmem:[%s5929_s1] sm:$0xff] }
   0xc   : > { %3487 = vmatprep.subr.msk.mxu0 %vm247_vm0, %v192_v0  ;;  %p163_p3 = scmp.lt.s32.totalorder %s3170_s18, 31  ;;  %vm5944_vm1 = vcmask 162816   ;;  %v3193_v19 = vld [vmem:[%s5929_s1 + $0x28] sm:$0xff]  ;;  %v3192_v20 = vld [vmem:[%s5929_s1 + $0x20] sm:$0xff]  ;;  %vm5946_vm2 = vcmask 130048   ;;  %vm5951_vm3 = vcmask 64512  }
   0xd   : > { %3488 = vmatpush3.msk.msra.mxu0 %vm247_vm0, %v192_v0  ;;  %3517 = vmatprep.subr.mxu1 %v3193_v19  ;;  %v3212_v21 = vld [vmem:[%s5929_s1 + $0x48] sm:$0xff]  ;;  %v4302_v22 = vld [vmem:[%s5930_s2] ss:$0 sm:$0xff]  ;;  %vm2372_vm4 = vcmask 1041408   ;;  %s4161_s17 = smov 10   ;;  %s4162_s19 = smov 30  }
   0xe   : > { %3489 = vmatprep.subr.mxu0 %v191_v1  ;;  %s6125_s18 = smov (!%p163_p3, %s3170_s18), 31  ;;  %3518 = vmatpush3.msra.mxu1 %v3193_v19 }
   0xf   : > { %3490 = vmatpush3.msra.mxu0 %v191_v1  ;;  %s3171_s21 = sshll.u32 %s6125_s18, 3  ;;  %3519 = vmatprep.subr.mxu1 %v3192_v20 }
  0x10   : > { %3491 = vmatprep.subr.mxu0 %v190_v2  ;;  %s4208_s24 = scalar_lea.vmem %s5928_s0, %s3171_s21  ;;  %3520 = vmatpush3.msra.mxu1 %v3192_v20  ;;  %s5824_s23 = scalar_lea.vmem %s5931_s3, %s3171_s21 }
  0x11   : > { %3492 = vmatpush3.msra.mxu0 %v190_v2  ;;  %v4211_v3 = vld [vmem:[%s4208_s24] sm:$0xff]  ;;  %v4214_v4 = vld [vmem:[%s4208_s24 + $0x8] sm:$0xff]  ;;  %v4217_v5 = vld [vmem:[%s4208_s24 + $0x10] sm:$0xff]  ;;  %3545 = vmatprep.subr.mxu1 %v3212_v21 }
  0x12   : > { %3493 = vmatprep.mubr.msk.f32.mxu0 %vm5944_vm1, %v4211_v3  ;;  %v4226_v6 = vld [vmem:[%s4208_s24 + $0x18] sm:$0xff]  ;;  %v4229_v7 = vld [vmem:[%s4208_s24 + $0x20] sm:$0xff]  ;;  %v4236_v8 = vld [vmem:[%s4208_s24 + $0x28] sm:$0xff] }
  0x13   : > { %3494 = vmatmul.mubr.msk.f32.vlgmr.msra.gmra.mxu0 %vm5944_vm1, %v4214_v4  ;;  %v4239_v9 = vld [vmem:[%s4208_s24 + $0x30] sm:$0xff]  ;;  %v4246_v10 = vld [vmem:[%s4208_s24 + $0x38] sm:$0xff]  ;;  %v4249_v11 = vld [vmem:[%s4208_s24 + $0x40] sm:$0xff] }
  0x14   : > { %3496 = vmatprep.mubr.msk.f32.mxu0 %vm5944_vm1, %v4217_v5  ;;  %v4256_v12 = vld [vmem:[%s4208_s24 + $0x48] sm:$0xff]  ;;  %v4259_v13 = vld [vmem:[%s4208_s24 + $0x50] sm:$0xff]  ;;  %v4266_v14 = vld [vmem:[%s4208_s24 + $0x58] sm:$0xff] }
  0x15   : > { %v4269_v15 = vld [vmem:[%s4208_s24 + $0x60] sm:$0xff]  ;;  %v4276_v16 = vld [vmem:[%s4208_s24 + $0x68] sm:$0xff]  ;;  %v4279_v17 = vld [vmem:[%s4208_s24 + $0x70] sm:$0xff] }
  0x16   : > { %v4286_v18 = vld [vmem:[%s4208_s24 + $0x78] sm:$0xff] }
  0x17   : > { %3497 = vmatmul.mubr.msk.f32.gmra.mxu0 %vm5944_vm1, %v4226_v6 }
  0x18   : > { %3499 = vmatprep.mubr.msk.f32.mxu0 %vm5944_vm1, %v4229_v7 }
  0x1b   : > { %3500 = vmatmul.mubr.msk.f32.gmra.mxu0 %vm5944_vm1, %v4236_v8 }
  0x1c   : > { %3502 = vmatprep.mubr.msk.f32.mxu0 %vm5944_vm1, %v4239_v9 }
  0x1f   : > { %3503 = vmatmul.mubr.msk.f32.gmra.mxu0 %vm5944_vm1, %v4246_v10 }
  0x20   : > { %3505 = vmatprep.mubr.msk.f32.mxu0 %vm5944_vm1, %v4249_v11 }
  0x23   : > { %3506 = vmatmul.mubr.msk.f32.gmra.mxu0 %vm5944_vm1, %v4256_v12 }
  0x24   : > { %3508 = vmatprep.mubr.msk.f32.mxu0 %vm5944_vm1, %v4259_v13 }
  0x27   : > { %3509 = vmatmul.mubr.msk.f32.gmra.mxu0 %vm5944_vm1, %v4266_v14 }
  0x28   : > { %3511 = vmatprep.mubr.msk.f32.mxu0 %vm5944_vm1, %v4269_v15 }
  0x2b   : > { %3512 = vmatmul.mubr.msk.f32.gmra.mxu0 %vm5944_vm1, %v4276_v16 }
  0x2c   : > { %3514 = vmatprep.mubr.msk.f32.mxu0 %vm5944_vm1, %v4279_v17 }
  0x2f   : > { %3515 = vmatmul.mubr.msk.f32.gmra.mxu0 %vm5944_vm1, %v4286_v18 }
  0xd3   : > { %v3495_v23 = vpop.f32.mrf.mxu0 }
  0xd4   : > { %v323_v24 = vadd.f32 %v3495_v23, %v4302_v22  ;;  %v3211_v23 = vld [vmem:[%s5929_s1 + $0x40] sm:$0xff] }
  0xd5   : > { %v317_v25 = vpop.f32.mrf.mxu0 }
  0xd6   : > { %v318_v26 = vadd.f32 %v4302_v22, %v317_v25  ;;  %v3194_v25 = vld [vmem:[%s5930_s2 + $0x1] ss:$0 sm:$0xff] }
  0xd7   : > { %v3498_v27 = vpop.f32.mrf.mxu0 }
  0xd8   : > { %3721 = vtanh.f32 %v318_v26  ;;  %v333_v28 = vadd.f32 %v3498_v27, %v4302_v22 }
  0xd9   : > { %3723 = vtanh.f32 %v323_v24  ;;  %v327_v29 = vpop.f32.mrf.mxu0  ;;  %v3230_v24 = vld [vmem:[%s5929_s1 + $0x60] sm:$0xff] }
  0xda   : > { %v328_v30 = vadd.f32 %v4302_v22, %v327_v29  ;;  %3725 = vtanh.f32 %v333_v28  ;;  %3573 = vmatprep.subr.mxu0 %v3230_v24 }
  0xdb   : > { %v3501_v31 = vpop.f32.mrf.mxu0  ;;  %3574 = vmatpush3.msra.mxu0 %v3230_v24 }
  0xdc   : > { %3727 = vtanh.f32 %v328_v30  ;;  %v343_v32 = vadd.f32 %v3501_v31, %v4302_v22 }
  0xdd   : > { %v337_v33 = vpop.f32.mrf.mxu0 }
  0xde   : > { %v338_v34 = vadd.f32 %v4302_v22, %v337_v33  ;;  %3729 = vtanh.f32 %v343_v32 }
  0xdf   : > { %v3504_v35 = vpop.f32.mrf.mxu0 }
  0xe0   : > { %3731 = vtanh.f32 %v338_v34  ;;  %v353_v36 = vadd.f32 %v3504_v35, %v4302_v22 }
  0xe1   : > { %v347_v37 = vpop.f32.mrf.mxu0 }
  0xe2   : > { %v348_v38 = vadd.f32 %v4302_v22, %v347_v37  ;;  %3733 = vtanh.f32 %v353_v36 }
  0xe3   : > { %v3507_v39 = vpop.f32.mrf.mxu0 }
  0xe4   : > { %3735 = vtanh.f32 %v348_v38  ;;  %v363_v40 = vadd.f32 %v3507_v39, %v4302_v22 }
  0xe5   : > { %v3722_v41 = vpop.eup %3721  ;;  %v357_v42 = vpop.f32.mrf.mxu0 }
  0xe6   : > { %v3724_v43 = vpop.eup %3723  ;;  %3521 = vmatprep.mubr.msk.f32.mxu1 %vm5946_vm2, %v3722_v41  ;;  %v358_v44 = vadd.f32 %v4302_v22, %v357_v42  ;;  %3737 = vtanh.f32 %v363_v40 }
  0xe7   : > { %3522 = vmatmul.mubr.msk.f32.vlgmr.msra.gmra.mxu1 %vm5946_vm2, %v3724_v43  ;;  %v3510_v45 = vpop.f32.mrf.mxu0  ;;  %v3726_v46 = vpop.eup %3725 }
  0xe8   : > { %3739 = vtanh.f32 %v358_v44  ;;  %v373_v47 = vadd.f32 %v3510_v45, %v4302_v22  ;;  %3546 = vmatpush3.msra.mxu1 %v3212_v21 }
  0xe9   : > { %v3728_v48 = vpop.eup %3727  ;;  %v367_v49 = vpop.f32.mrf.mxu0  ;;  %3547 = vmatprep.subr.mxu1 %v3211_v23 }
  0xea   : > { %3524 = vmatprep.mubr.msk.f32.mxu1 %vm5946_vm2, %v3728_v48  ;;  %v368_v50 = vadd.f32 %v4302_v22, %v367_v49  ;;  %3741 = vtanh.f32 %v373_v47  ;;  %3548 = vmatpush3.msra.mxu1 %v3211_v23 }
  0xeb   : > { %3525 = vmatmul.mubr.msk.f32.gmra.mxu1 %vm5946_vm2, %v3726_v46  ;;  %v3513_v51 = vpop.f32.mrf.mxu0  ;;  %v3730_v52 = vpop.eup %3729 }
  0xec   : > { %3743 = vtanh.f32 %v368_v50  ;;  %v383_v53 = vadd.f32 %v3513_v51, %v4302_v22 }
  0xed   : > { %v3732_v54 = vpop.eup %3731  ;;  %v377_v55 = vpop.f32.mrf.mxu0 }
  0xee   : > { %3527 = vmatprep.mubr.msk.f32.mxu1 %vm5946_vm2, %v3732_v54  ;;  %v378_v56 = vadd.f32 %v4302_v22, %v377_v55  ;;  %3745 = vtanh.f32 %v383_v53 }
  0xef   : > { %3528 = vmatmul.mubr.msk.f32.gmra.mxu1 %vm5946_vm2, %v3730_v52  ;;  %v3516_v57 = vpop.f32.mrf.mxu0  ;;  %v3734_v58 = vpop.eup %3733 }
  0xf0   : > { %3747 = vtanh.f32 %v378_v56  ;;  %v393_v59 = vadd.f32 %v3516_v57, %v4302_v22 }
  0xf1   : > { %v3736_v60 = vpop.eup %3735  ;;  %v387_v61 = vpop.f32.mrf.mxu0 }
  0xf2   : > { %3530 = vmatprep.mubr.msk.f32.mxu1 %vm5946_vm2, %v3736_v60  ;;  %v388_v62 = vadd.f32 %v4302_v22, %v387_v61  ;;  %3749 = vtanh.f32 %v393_v59 }
  0xf3   : > { %3531 = vmatmul.mubr.msk.f32.gmra.mxu1 %vm5946_vm2, %v3734_v58  ;;  %v3738_v63 = vpop.eup %3737 }
  0xf4   : > { %3751 = vtanh.f32 %v388_v62 }
  0xf5   : > { %v3740_v0 = vpop.eup %3739 }
  0xf6   : > { %3533 = vmatprep.mubr.msk.f32.mxu1 %vm5946_vm2, %v3740_v0 }
  0xf7   : > { %3534 = vmatmul.mubr.msk.f32.gmra.mxu1 %vm5946_vm2, %v3738_v63  ;;  %v3742_v1 = vpop.eup %3741 }
  0xf9   : > { %v3744_v2 = vpop.eup %3743 }
  0xfa   : > { %3536 = vmatprep.mubr.msk.f32.mxu1 %vm5946_vm2, %v3744_v2 }
  0xfb   : > { %3537 = vmatmul.mubr.msk.f32.gmra.mxu1 %vm5946_vm2, %v3742_v1  ;;  %v3746_v19 = vpop.eup %3745 }
  0xfd   : > { %v3748_v20 = vpop.eup %3747 }
  0xfe   : > { %3539 = vmatprep.mubr.msk.f32.mxu1 %vm5946_vm2, %v3748_v20 }
  0xff   : > { %3540 = vmatmul.mubr.msk.f32.gmra.mxu1 %vm5946_vm2, %v3746_v19  ;;  %v3750_v21 = vpop.eup %3749 }
 0x101   : > { %v3752_v22 = vpop.eup %3751 }
 0x102   : > { %3542 = vmatprep.mubr.msk.f32.mxu1 %vm5946_vm2, %v3752_v22 }
 0x103   : > { %3543 = vmatmul.mubr.msk.f32.gmra.mxu1 %vm5946_vm2, %v3750_v21 }
 0x1a7   : > { %v3523_v26 = vpop.f32.mrf.mxu1 }
 0x1a8   : > { %v541_v27 = vadd.f32 %v3523_v26, %v3194_v25  ;;  %v3249_v26 = vld [vmem:[%s5929_s1 + $0x88] sm:$0xff] }
 0x1a9   : > { %v535_v28 = vpop.f32.mrf.mxu1  ;;  %3599 = vmatprep.subr.mxu1 %v3249_v26 }
 0x1aa   : > { %v536_v29 = vadd.f32 %v3194_v25, %v535_v28  ;;  %v3213_v28 = vld [vmem:[%s5930_s2 + $0x2] ss:$0 sm:$0xff] }
 0x1ab   : > { %v3526_v30 = vpop.f32.mrf.mxu1 }
 0x1ac   : > { %3753 = vtanh.f32 %v536_v29  ;;  %v551_v31 = vadd.f32 %v3526_v30, %v3194_v25 }
 0x1ad   : > { %3755 = vtanh.f32 %v541_v27  ;;  %v545_v32 = vpop.f32.mrf.mxu1 }
 0x1ae   : > { %v546_v33 = vadd.f32 %v3194_v25, %v545_v32 }
 0x1af   : > { %v3529_v34 = vpop.f32.mrf.mxu1 }
 0x1b0   : > { %3757 = vtanh.f32 %v546_v33  ;;  %v561_v35 = vadd.f32 %v3529_v34, %v3194_v25 }
 0x1b1   : > { %3759 = vtanh.f32 %v551_v31  ;;  %v555_v36 = vpop.f32.mrf.mxu1 }
 0x1b2   : > { %v556_v37 = vadd.f32 %v3194_v25, %v555_v36  ;;  %3761 = vtanh.f32 %v561_v35 }
 0x1b3   : > { %v3532_v38 = vpop.f32.mrf.mxu1 }
 0x1b4   : > { %3763 = vtanh.f32 %v556_v37  ;;  %v571_v39 = vadd.f32 %v3532_v38, %v3194_v25 }
 0x1b5   : > { %v565_v40 = vpop.f32.mrf.mxu1 }
 0x1b6   : > { %v566_v41 = vadd.f32 %v3194_v25, %v565_v40  ;;  %3765 = vtanh.f32 %v571_v39 }
 0x1b7   : > { %v3535_v42 = vpop.f32.mrf.mxu1 }
 0x1b8   : > { %3767 = vtanh.f32 %v566_v41  ;;  %v581_v43 = vadd.f32 %v3535_v42, %v3194_v25 }
 0x1b9   : > { %v3754_v44 = vpop.eup %3753  ;;  %v575_v45 = vpop.f32.mrf.mxu1 }
 0x1ba   : > { %v3756_v46 = vpop.eup %3755  ;;  %3549 = vmatprep.mubr.msk.f32.mxu1 %vm5946_vm2, %v3754_v44  ;;  %v576_v47 = vadd.f32 %v3194_v25, %v575_v45  ;;  %3769 = vtanh.f32 %v581_v43 }
 0x1bb   : > { %3550 = vmatmul.mubr.msk.f32.vlgmr.msra.gmra.mxu1 %vm5946_vm2, %v3756_v46  ;;  %v3538_v48 = vpop.f32.mrf.mxu1 }
 0x1bc   : > { %3771 = vtanh.f32 %v576_v47  ;;  %v591_v49 = vadd.f32 %v3538_v48, %v3194_v25  ;;  %3600 = vmatpush3.msra.mxu1 %v3249_v26 }
 0x1bd   : > { %v3758_v50 = vpop.eup %3757  ;;  %v585_v51 = vpop.f32.mrf.mxu1 }
 0x1be   : > { %v3760_v52 = vpop.eup %3759  ;;  %3552 = vmatprep.mubr.msk.f32.mxu1 %vm5946_vm2, %v3758_v50  ;;  %v586_v53 = vadd.f32 %v3194_v25, %v585_v51  ;;  %3773 = vtanh.f32 %v591_v49 }
 0x1bf   : > { %3553 = vmatmul.mubr.msk.f32.gmra.mxu1 %vm5946_vm2, %v3760_v52  ;;  %v3541_v54 = vpop.f32.mrf.mxu1  ;;  %v3762_v55 = vpop.eup %3761 }
 0x1c0   : > { %3775 = vtanh.f32 %v586_v53  ;;  %v601_v56 = vadd.f32 %v3541_v54, %v3194_v25 }
 0x1c1   : > { %v3764_v57 = vpop.eup %3763  ;;  %v595_v58 = vpop.f32.mrf.mxu1 }
 0x1c2   : > { %3555 = vmatprep.mubr.msk.f32.mxu1 %vm5946_vm2, %v3764_v57  ;;  %v596_v59 = vadd.f32 %v3194_v25, %v595_v58  ;;  %3777 = vtanh.f32 %v601_v56 }
 0x1c3   : > { %3556 = vmatmul.mubr.msk.f32.gmra.mxu1 %vm5946_vm2, %v3762_v55  ;;  %v3544_v60 = vpop.f32.mrf.mxu1  ;;  %v3766_v61 = vpop.eup %3765 }
 0x1c4   : > { %3779 = vtanh.f32 %v596_v59  ;;  %v611_v62 = vadd.f32 %v3544_v60, %v3194_v25  ;;  %v3248_v60 = vld [vmem:[%s5929_s1 + $0x80] sm:$0xff] }
 0x1c5   : > { %v3768_v63 = vpop.eup %3767  ;;  %v605_v0 = vpop.f32.mrf.mxu1  ;;  %3601 = vmatprep.subr.mxu1 %v3248_v60 }
 0x1c6   : > { %3558 = vmatprep.mubr.msk.f32.mxu1 %vm5946_vm2, %v3768_v63  ;;  %v606_v1 = vadd.f32 %v3194_v25, %v605_v0  ;;  %3781 = vtanh.f32 %v611_v62  ;;  %3602 = vmatpush3.msra.mxu1 %v3248_v60  ;;  %v3231_v62 = vld [vmem:[%s5930_s2 + $0x3] ss:$0 sm:$0xff] }
 0x1c7   : > { %3559 = vmatmul.mubr.msk.f32.gmra.mxu1 %vm5946_vm2, %v3766_v61  ;;  %v3770_v2 = vpop.eup %3769  ;;  %v3268_v61 = vld [vmem:[%s5929_s1 + $0xa8] sm:$0xff] }
 0x1c8   : > { %3783 = vtanh.f32 %v606_v1  ;;  %3627 = vmatprep.subr.mxu0 %v3268_v61 }
 0x1c9   : > { %v3772_v19 = vpop.eup %3771 }
 0x1ca   : > { %3561 = vmatprep.mubr.msk.f32.mxu1 %vm5946_vm2, %v3772_v19 }
 0x1cb   : > { %3562 = vmatmul.mubr.msk.f32.gmra.mxu1 %vm5946_vm2, %v3770_v2  ;;  %v3774_v20 = vpop.eup %3773 }
 0x1cd   : > { %v3776_v21 = vpop.eup %3775 }
 0x1ce   : > { %3564 = vmatprep.mubr.msk.f32.mxu1 %vm5946_vm2, %v3776_v21 }
 0x1cf   : > { %3565 = vmatmul.mubr.msk.f32.gmra.mxu1 %vm5946_vm2, %v3774_v20  ;;  %v3778_v22 = vpop.eup %3777 }
 0x1d1   : > { %v3780_v23 = vpop.eup %3779 }
 0x1d2   : > { %3567 = vmatprep.mubr.msk.f32.mxu1 %vm5946_vm2, %v3780_v23 }
 0x1d3   : > { %3568 = vmatmul.mubr.msk.f32.gmra.mxu1 %vm5946_vm2, %v3778_v22  ;;  %v3782_v24 = vpop.eup %3781 }
 0x1d5   : > { %v3784_v25 = vpop.eup %3783 }
 0x1d6   : > { %3570 = vmatprep.mubr.msk.f32.mxu1 %vm5946_vm2, %v3784_v25 }
 0x1d7   : > { %3571 = vmatmul.mubr.msk.f32.gmra.mxu1 %vm5946_vm2, %v3782_v24 }
 0x27b   : > { %v3551_v27 = vpop.f32.mrf.mxu1 }
 0x27c   : > { %v4369_v31 = vadd.f32 %v3551_v27, %v3213_v28 }
 0x27d   : > { %v752_v29 = vpop.f32.mrf.mxu1 }
 0x27e   : > { %v4367_v30 = vadd.f32 %v3213_v28, %v752_v29 }
 0x27f   : > { %v3554_v32 = vpop.f32.mrf.mxu1 }
 0x280   : > { %3575 = vmatprep.mubr.msk.f32.mxu0 %vm5951_vm3, %v4367_v30  ;;  %v4377_v35 = vadd.f32 %v3554_v32, %v3213_v28 }
 0x281   : > { %v762_v33 = vpop.f32.mrf.mxu1  ;;  %3576 = vmatmul.mubr.msk.f32.vlgmr.msra.gmra.mxu0 %vm5951_vm3, %v4369_v31 }
 0x282   : > { %v4375_v34 = vadd.f32 %v3213_v28, %v762_v33  ;;  %3628 = vmatpush3.msra.mxu0 %v3268_v61 }
 0x283   : > { %v3557_v36 = vpop.f32.mrf.mxu1 }
 0x284   : > { %3578 = vmatprep.mubr.msk.f32.mxu0 %vm5951_vm3, %v4375_v34  ;;  %v4381_v37 = vadd.f32 %v3557_v36, %v3213_v28 }
 0x285   : > { %v772_v38 = vpop.f32.mrf.mxu1  ;;  %3579 = vmatmul.mubr.msk.f32.gmra.mxu0 %vm5951_vm3, %v4377_v35 }
 0x286   : > { %v4385_v39 = vadd.f32 %v3213_v28, %v772_v38 }
 0x287   : > { %v3560_v40 = vpop.f32.mrf.mxu1 }
 0x288   : > { %3581 = vmatprep.mubr.msk.f32.mxu0 %vm5951_vm3, %v4385_v39  ;;  %v4391_v41 = vadd.f32 %v3560_v40, %v3213_v28 }
 0x289   : > { %3582 = vmatmul.mubr.msk.f32.gmra.mxu0 %vm5951_vm3, %v4381_v37  ;;  %v782_v42 = vpop.f32.mrf.mxu1 }
 0x28a   : > { %v4393_v43 = vadd.f32 %v3213_v28, %v782_v42 }
 0x28b   : > { %v3563_v44 = vpop.f32.mrf.mxu1 }
 0x28c   : > { %3584 = vmatprep.mubr.msk.f32.mxu0 %vm5951_vm3, %v4393_v43  ;;  %v4399_v45 = vadd.f32 %v3563_v44, %v3213_v28 }
 0x28d   : > { %3585 = vmatmul.mubr.msk.f32.gmra.mxu0 %vm5951_vm3, %v4391_v41  ;;  %v792_v46 = vpop.f32.mrf.mxu1 }
 0x28e   : > { %5965 = vst [vmem:[#allocation2_spill] sm:$0xff] %v4399_v45  ;;  %v4401_v47 = vadd.f32 %v3213_v28, %v792_v46 }
 0x28f   : > { %v3566_v48 = vpop.f32.mrf.mxu1 }
 0x290   : > { %3587 = vmatprep.mubr.msk.f32.mxu0 %vm5951_vm3, %v4401_v47  ;;  %v4407_v49 = vadd.f32 %v3566_v48, %v3213_v28 }
 0x291   : > { %3588 = vmatmul.mubr.msk.f32.gmra.mxu0 %vm5951_vm3, %v4399_v45  ;;  %v802_v50 = vpop.f32.mrf.mxu1 }
 0x292   : > { %5966 = vst [vmem:[#allocation3_spill] sm:$0xff] %v4407_v49  ;;  %v4409_v51 = vadd.f32 %v3213_v28, %v802_v50 }
 0x293   : > { %v3569_v52 = vpop.f32.mrf.mxu1 }
 0x294   : > { %5967 = vst [vmem:[#allocation4_spill] sm:$0xff] %v4409_v51  ;;  %3590 = vmatprep.mubr.msk.f32.mxu0 %vm5951_vm3, %v4409_v51  ;;  %v4415_v53 = vadd.f32 %v3569_v52, %v3213_v28 }
 0x295   : > { %3591 = vmatmul.mubr.msk.f32.gmra.mxu0 %vm5951_vm3, %v4407_v49  ;;  %v812_v54 = vpop.f32.mrf.mxu1 }
 0x296   : > { %5968 = vst [vmem:[#allocation5_spill] sm:$0xff] %v4415_v53  ;;  %v4417_v55 = vadd.f32 %v3213_v28, %v812_v54 }
 0x297   : > { %v3572_v56 = vpop.f32.mrf.mxu1 }
 0x298   : > { %5969 = vst [vmem:[#allocation6_spill] sm:$0xff] %v4417_v55  ;;  %3593 = vmatprep.mubr.msk.f32.mxu0 %vm5951_vm3, %v4417_v55  ;;  %v4421_v57 = vadd.f32 %v3572_v56, %v3213_v28 }
 0x299   : > { %v822_v58 = vpop.f32.mrf.mxu1  ;;  %3594 = vmatmul.mubr.msk.f32.gmra.mxu0 %vm5951_vm3, %v4415_v53 }
 0x29a   : > { %5970 = vst [vmem:[#allocation7_spill] sm:$0xff] %v4421_v57  ;;  %v4425_v59 = vadd.f32 %v3213_v28, %v822_v58 }
 0x29c   : > { %5971 = vst [vmem:[#allocation8_spill] sm:$0xff] %v4425_v59  ;;  %3596 = vmatprep.mubr.msk.f32.mxu0 %vm5951_vm3, %v4425_v59 }
 0x29d   : > { %3597 = vmatmul.mubr.msk.f32.gmra.mxu0 %vm5951_vm3, %v4421_v57 }
 0x341   : > { %v3577_v63 = vpop.f32.mrf.mxu0 }
 0x342   : > { %v959_v0 = vadd.f32 %v3577_v63, %v3231_v62 }
 0x343   : > { %v953_v1 = vpop.f32.mrf.mxu0 }
 0x344   : > { %v954_v2 = vadd.f32 %v3231_v62, %v953_v1 }
 0x345   : > { %v3580_v19 = vpop.f32.mrf.mxu0 }
 0x346   : > { %3785 = vtanh.f32 %v954_v2  ;;  %v969_v20 = vadd.f32 %v3580_v19, %v3231_v62 }
 0x347   : > { %3787 = vtanh.f32 %v959_v0  ;;  %v963_v21 = vpop.f32.mrf.mxu0 }
 0x348   : > { %v964_v22 = vadd.f32 %v3231_v62, %v963_v21 }
 0x349   : > { %v3583_v23 = vpop.f32.mrf.mxu0 }
 0x34a   : > { %3789 = vtanh.f32 %v964_v22  ;;  %v979_v24 = vadd.f32 %v3583_v23, %v3231_v62 }
 0x34b   : > { %3791 = vtanh.f32 %v969_v20  ;;  %v973_v25 = vpop.f32.mrf.mxu0 }
 0x34c   : > { %v974_v26 = vadd.f32 %v3231_v62, %v973_v25  ;;  %3793 = vtanh.f32 %v979_v24 }
 0x34d   : > { %v3586_v27 = vpop.f32.mrf.mxu0 }
 0x34e   : > { %3795 = vtanh.f32 %v974_v26  ;;  %v989_v28 = vadd.f32 %v3586_v27, %v3231_v62 }
 0x34f   : > { %v983_v29 = vpop.f32.mrf.mxu0 }
 0x350   : > { %v984_v32 = vadd.f32 %v3231_v62, %v983_v29  ;;  %3797 = vtanh.f32 %v989_v28 }
 0x351   : > { %v3589_v33 = vpop.f32.mrf.mxu0 }
 0x352   : > { %3799 = vtanh.f32 %v984_v32  ;;  %v999_v36 = vadd.f32 %v3589_v33, %v3231_v62  ;;  %v3267_v33 = vld [vmem:[%s5929_s1 + $0xa0] sm:$0xff] }
 0x353   : > { %v3786_v38 = vpop.eup %3785  ;;  %v993_v40 = vpop.f32.mrf.mxu0  ;;  %3629 = vmatprep.subr.mxu0 %v3267_v33 }
 0x354   : > { %v3788_v42 = vpop.eup %3787  ;;  %3603 = vmatprep.mubr.msk.f32.mxu1 %vm5946_vm2, %v3786_v38  ;;  %v994_v44 = vadd.f32 %v3231_v62, %v993_v40  ;;  %3801 = vtanh.f32 %v999_v36  ;;  %3630 = vmatpush3.msra.mxu0 %v3267_v33  ;;  %v1642_v36 = vmul.f32 %v4211_v3, %v4211_v3  ;;  %v1644_v38 = vmul.f32 %v4217_v5, %v4217_v5 }
 0x355   : > { %3604 = vmatmul.mubr.msk.f32.vlgmr.msra.gmra.mxu1 %vm5946_vm2, %v3788_v42  ;;  %v3592_v46 = vpop.f32.mrf.mxu0 }
 0x356   : > { %3803 = vtanh.f32 %v994_v44  ;;  %v1009_v48 = vadd.f32 %v3592_v46, %v3231_v62  ;;  %v1658_v40 = vsel %vm5944_vm1, %v1642_v36, 0.0  ;;  %v1664_v42 = vsel %vm5944_vm1, %v1644_v38, 0.0  ;;  %v3250_v44 = vld [vmem:[%s5930_s2 + $0x4] ss:$0 sm:$0xff] }
 0x357   : > { %v3790_v50 = vpop.eup %3789  ;;  %v1003_v52 = vpop.f32.mrf.mxu0  ;;  %1659 = vadd.xlane.f32.xlu0 %v1658_v40 }
 0x358   : > { %v3792_v54 = vpop.eup %3791  ;;  %3606 = vmatprep.mubr.msk.f32.mxu1 %vm5946_vm2, %v3790_v50  ;;  %v1004_v56 = vadd.f32 %v3231_v62, %v1003_v52  ;;  %3805 = vtanh.f32 %v1009_v48 }
 0x359   : > { %3607 = vmatmul.mubr.msk.f32.gmra.mxu1 %vm5946_vm2, %v3792_v54  ;;  %v3595_v58 = vpop.f32.mrf.mxu0  ;;  %v3794_v60 = vpop.eup %3793 }
 0x35a   : > { %3807 = vtanh.f32 %v1004_v56  ;;  %v1019_v61 = vadd.f32 %v3595_v58, %v3231_v62 }
 0x35b   : > { %v3796_v63 = vpop.eup %3795  ;;  %v1013_v0 = vpop.f32.mrf.mxu0  ;;  %1665 = vadd.xlane.f32.xlu0 %v1664_v42 }
 0x35c   : > { %3609 = vmatprep.mubr.msk.f32.mxu1 %vm5946_vm2, %v3796_v63  ;;  %v1014_v1 = vadd.f32 %v3231_v62, %v1013_v0  ;;  %3809 = vtanh.f32 %v1019_v61 }
 0x35d   : > { %3610 = vmatmul.mubr.msk.f32.gmra.mxu1 %vm5946_vm2, %v3794_v60  ;;  %v3598_v2 = vpop.f32.mrf.mxu0  ;;  %v3798_v19 = vpop.eup %3797 }
 0x35e   : > { %3811 = vtanh.f32 %v1014_v1  ;;  %v1029_v20 = vadd.f32 %v3598_v2, %v3231_v62 }
 0x35f   : > { %v3800_v21 = vpop.eup %3799  ;;  %v1023_v22 = vpop.f32.mrf.mxu0 }
 0x360   : > { %3612 = vmatprep.mubr.msk.f32.mxu1 %vm5946_vm2, %v3800_v21  ;;  %v1024_v23 = vadd.f32 %v3231_v62, %v1023_v22  ;;  %3813 = vtanh.f32 %v1029_v20 }
 0x361   : > { %3613 = vmatmul.mubr.msk.f32.gmra.mxu1 %vm5946_vm2, %v3798_v19  ;;  %v3802_v24 = vpop.eup %3801 }
 0x362   : > { %3815 = vtanh.f32 %v1024_v23 }
 0x363   : > { %v3804_v25 = vpop.eup %3803 }
 0x364   : > { %3615 = vmatprep.mubr.msk.f32.mxu1 %vm5946_vm2, %v3804_v25 }
 0x365   : > { %3616 = vmatmul.mubr.msk.f32.gmra.mxu1 %vm5946_vm2, %v3802_v24  ;;  %v3806_v26 = vpop.eup %3805 }
 0x367   : > { %v3808_v27 = vpop.eup %3807 }
 0x368   : > { %3618 = vmatprep.mubr.msk.f32.mxu1 %vm5946_vm2, %v3808_v27 }
 0x369   : > { %3619 = vmatmul.mubr.msk.f32.gmra.mxu1 %vm5946_vm2, %v3806_v26  ;;  %v3810_v28 = vpop.eup %3809 }
 0x36b   : > { %v3812_v29 = vpop.eup %3811 }
 0x36c   : > { %3621 = vmatprep.mubr.msk.f32.mxu1 %vm5946_vm2, %v3812_v29 }
 0x36d   : > { %3622 = vmatmul.mubr.msk.f32.gmra.mxu1 %vm5946_vm2, %v3810_v28  ;;  %v3814_v62 = vpop.eup %3813 }
 0x36f   : > { %v3816_v32 = vpop.eup %3815 }
 0x370   : > { %3624 = vmatprep.mubr.msk.f32.mxu1 %vm5946_vm2, %v3816_v32 }
 0x371   : > { %3625 = vmatmul.mubr.msk.f32.gmra.mxu1 %vm5946_vm2, %v3814_v62 }
 0x415   : > { %v3605_v46 = vpop.f32.mrf.mxu1 }
 0x416   : > { %v1176_v48 = vadd.f32 %v3605_v46, %v3250_v44 }
 0x417   : > { %v1170_v50 = vpop.f32.mrf.mxu1 }
 0x418   : > { %v1171_v52 = vadd.f32 %v3250_v44, %v1170_v50 }
 0x419   : > { %v3608_v54 = vpop.f32.mrf.mxu1 }
 0x41a   : > { %3817 = vtanh.f32 %v1171_v52  ;;  %v1186_v3 = vadd.f32 %v3608_v54, %v3250_v44 }
 0x41b   : > { %3819 = vtanh.f32 %v1176_v48  ;;  %v1180_v56 = vpop.f32.mrf.mxu1 }
 0x41c   : > { %v1181_v5 = vadd.f32 %v3250_v44, %v1180_v56 }
 0x41d   : > { %v3611_v58 = vpop.f32.mrf.mxu1 }
 0x41e   : > { %3821 = vtanh.f32 %v1181_v5  ;;  %v1196_v60 = vadd.f32 %v3611_v58, %v3250_v44 }
 0x41f   : > { %3823 = vtanh.f32 %v1186_v3  ;;  %v1190_v61 = vpop.f32.mrf.mxu1 }
 0x420   : > { %v1191_v63 = vadd.f32 %v3250_v44, %v1190_v61 }
 0x421   : > { %v3614_v0 = vpop.f32.mrf.mxu1 }
 0x422   : > { %3825 = vtanh.f32 %v1191_v63  ;;  %v1206_v1 = vadd.f32 %v3614_v0, %v3250_v44 }
 0x423   : > { %3827 = vtanh.f32 %v1196_v60  ;;  %v1200_v2 = vpop.f32.mrf.mxu1 }
 0x424   : > { %v1201_v19 = vadd.f32 %v3250_v44, %v1200_v2  ;;  %3829 = vtanh.f32 %v1206_v1  ;;  %v1643_v2 = vmul.f32 %v4214_v4, %v4214_v4  ;;  %v1653_v4 = vmul.f32 %v4266_v14, %v4266_v14 }
 0x425   : > { %v3617_v20 = vpop.f32.mrf.mxu1  ;;  %v1649_v14 = vmul.f32 %v4246_v10, %v4246_v10  ;;  %v1654_v10 = vmul.f32 %v4269_v15, %v4269_v15 }
 0x426   : > { %3831 = vtanh.f32 %v1201_v19  ;;  %v1216_v21 = vadd.f32 %v3617_v20, %v3250_v44  ;;  %v1645_v19 = vmul.f32 %v4226_v6, %v4226_v6  ;;  %v1661_v20 = vsel %vm5944_vm1, %v1643_v2, 0.0 }
 0x427   : > { %v3818_v22 = vpop.eup %3817  ;;  %v1210_v23 = vpop.f32.mrf.mxu1  ;;  %1662 = vadd.xlane.f32.xlu1 %v1661_v20  ;;  %v1647_v6 = vmul.f32 %v4236_v8, %v4236_v8  ;;  %v1657_v8 = vmul.f32 %v4286_v18, %v4286_v18 }
 0x428   : > { %v3820_v24 = vpop.eup %3819  ;;  %3631 = vmatprep.mubr.msk.f32.mxu0 %vm5946_vm2, %v3818_v22  ;;  %v1211_v25 = vadd.f32 %v3250_v44, %v1210_v23  ;;  %3833 = vtanh.f32 %v1216_v21  ;;  %v1667_v21 = vsel %vm5944_vm1, %v1645_v19, 0.0  ;;  %v1651_v22 = vmul.f32 %v4256_v12, %v4256_v12 }
 0x429   : > { %3632 = vmatmul.mubr.msk.f32.vlgmr.msra.gmra.mxu0 %vm5946_vm2, %v3820_v24  ;;  %v3620_v26 = vpop.f32.mrf.mxu1  ;;  %1668 = vadd.xlane.f32.xlu0 %v1667_v21  ;;  %v1646_v23 = vmul.f32 %v4229_v7, %v4229_v7  ;;  %v1655_v7 = vmul.f32 %v4276_v16, %v4276_v16  ;;  %v1648_v12 = vmul.f32 %v4239_v9, %v4239_v9 }
 0x42a   : > { %3835 = vtanh.f32 %v1211_v25  ;;  %v1226_v27 = vadd.f32 %v3620_v26, %v3250_v44  ;;  %v1685_v24 = vsel %vm5944_vm1, %v1651_v22, 0.0  ;;  %v1691_v26 = vsel %vm5944_vm1, %v1653_v4, 0.0 }
 0x42b   : > { %v3822_v28 = vpop.eup %3821  ;;  %v1220_v29 = vpop.f32.mrf.mxu1  ;;  %v1670_v25 = vsel %vm5944_vm1, %v1646_v23, 0.0  ;;  %1686 = vadd.xlane.f32.xlu1 %v1685_v24  ;;  %v1650_v9 = vmul.f32 %v4249_v11, %v4249_v11 }
 0x42c   : > { %v3824_v62 = vpop.eup %3823  ;;  %3634 = vmatprep.mubr.msk.f32.mxu0 %vm5946_vm2, %v3822_v28  ;;  %v1221_v32 = vadd.f32 %v3250_v44, %v1220_v29  ;;  %3837 = vtanh.f32 %v1226_v27  ;;  %v1673_v27 = vsel %vm5944_vm1, %v1647_v6, 0.0  ;;  %v1697_v28 = vsel %vm5944_vm1, %v1655_v7, 0.0 }
 0x42d   : > { %3635 = vmatmul.mubr.msk.f32.gmra.mxu0 %vm5946_vm2, %v3824_v62  ;;  %v3623_v33 = vpop.f32.mrf.mxu1  ;;  %1671 = vadd.xlane.f32.xlu0 %v1670_v25  ;;  %v1676_v29 = vsel %vm5944_vm1, %v1648_v12, 0.0  ;;  %v1703_v62 = vsel %vm5944_vm1, %v1657_v8, 0.0  ;;  %v1682_v16 = vsel %vm5944_vm1, %v1650_v9, 0.0 }
 0x42e   : > { %3839 = vtanh.f32 %v1221_v32  ;;  %v1236_v36 = vadd.f32 %v3623_v33, %v3250_v44  ;;  %v1679_v32 = vsel %vm5944_vm1, %v1649_v14, 0.0  ;;  %v1652_v33 = vmul.f32 %v4259_v13, %v4259_v13 }
 0x42f   : > { %v3826_v38 = vpop.eup %3825  ;;  %v1230_v40 = vpop.f32.mrf.mxu1  ;;  %1692 = vadd.xlane.f32.xlu1 %v1691_v26 }
 0x430   : > { %v3828_v42 = vpop.eup %3827  ;;  %3637 = vmatprep.mubr.msk.f32.mxu0 %vm5946_vm2, %v3826_v38  ;;  %v1231_v46 = vadd.f32 %v3250_v44, %v1230_v40  ;;  %3841 = vtanh.f32 %v1236_v36  ;;  %v1688_v18 = vsel %vm5944_vm1, %v1652_v33, 0.0  ;;  %v1694_v36 = vsel %vm5944_vm1, %v1654_v10, 0.0  ;;  %v4529_v40 = vld [vmem:[%s5930_s2 + $0x5] ss:$0 sm:$0xff] }
 0x431   : > { %3638 = vmatmul.mubr.msk.f32.gmra.mxu0 %vm5946_vm2, %v3828_v42  ;;  %v3626_v48 = vpop.f32.mrf.mxu1  ;;  %v3830_v50 = vpop.eup %3829  ;;  %1674 = vadd.xlane.f32.xlu0 %v1673_v27  ;;  %v1656_v38 = vmul.f32 %v4279_v17, %v4279_v17 }
 0x432   : > { %3843 = vtanh.f32 %v1231_v46  ;;  %v1246_v52 = vadd.f32 %v3626_v48, %v3250_v44 }
 0x433   : > { %v3832_v54 = vpop.eup %3831  ;;  %v1240_v3 = vpop.f32.mrf.mxu1  ;;  %1698 = vadd.xlane.f32.xlu1 %v1697_v28  ;;  %v1700_v11 = vsel %vm5944_vm1, %v1656_v38, 0.0 }
 0x434   : > { %3640 = vmatprep.mubr.msk.f32.mxu0 %vm5946_vm2, %v3832_v54  ;;  %v1241_v56 = vadd.f32 %v3250_v44, %v1240_v3  ;;  %3845 = vtanh.f32 %v1246_v52 }
 0x435   : > { %3641 = vmatmul.mubr.msk.f32.gmra.mxu0 %vm5946_vm2, %v3830_v50  ;;  %v3834_v5 = vpop.eup %3833  ;;  %1677 = vadd.xlane.f32.xlu0 %v1676_v29 }
 0x436   : > { %3847 = vtanh.f32 %v1241_v56 }
 0x437   : > { %v3836_v58 = vpop.eup %3835  ;;  %1704 = vadd.xlane.f32.xlu1 %v1703_v62 }
 0x438   : > { %3643 = vmatprep.mubr.msk.f32.mxu0 %vm5946_vm2, %v3836_v58 }
 0x439   : > { %3644 = vmatmul.mubr.msk.f32.gmra.mxu0 %vm5946_vm2, %v3834_v5  ;;  %v3838_v60 = vpop.eup %3837  ;;  %1680 = vadd.xlane.f32.xlu0 %v1679_v32 }
 0x43b   : > { %v3840_v61 = vpop.eup %3839 }
 0x43c   : > { %3646 = vmatprep.mubr.msk.f32.mxu0 %vm5946_vm2, %v3840_v61 }
 0x43d   : > { %3647 = vmatmul.mubr.msk.f32.gmra.mxu0 %vm5946_vm2, %v3838_v60  ;;  %v3842_v63 = vpop.eup %3841  ;;  %1683 = vadd.xlane.f32.xlu0 %v1682_v16 }
 0x43f   : > { %v3844_v0 = vpop.eup %3843 }
 0x440   : > { %3649 = vmatprep.mubr.msk.f32.mxu0 %vm5946_vm2, %v3844_v0 }
 0x441   : > { %3650 = vmatmul.mubr.msk.f32.gmra.mxu0 %vm5946_vm2, %v3842_v63  ;;  %v3846_v44 = vpop.eup %3845  ;;  %1689 = vadd.xlane.f32.xlu0 %v1688_v18 }
 0x443   : > { %v3848_v1 = vpop.eup %3847 }
 0x444   : > { %3652 = vmatprep.mubr.msk.f32.mxu0 %vm5946_vm2, %v3848_v1 }
 0x445   : > { %3653 = vmatmul.mubr.msk.f32.gmra.mxu0 %vm5946_vm2, %v3846_v44  ;;  %1695 = vadd.xlane.f32.xlu0 %v1694_v36 }
 0x449   : > { %1701 = vadd.xlane.f32.xlu0 %v1700_v11 }
 0x4e9   : > { %v3633_v13 = vpop.f32.mrf.mxu0 }
 0x4ea   : > { %v1393_v42 = vadd.f32 %v3633_v13, %v4529_v40 }
 0x4eb   : > { %v1387_v46 = vpop.f32.mrf.mxu0 }
 0x4ec   : > { %v3287_v48 = vmul.f32 -1.442695, %v1393_v42  ;;  %v1388_v15 = vadd.f32 %v4529_v40, %v1387_v46 }
 0x4ed   : > { %v3636_v50 = vpop.f32.mrf.mxu0 }
 0x4ee   : > { %3849 = vpow2.f32 %v3287_v48  ;;  %v3286_v52 = vmul.f32 -1.442695, %v1388_v15  ;;  %v1403_v17 = vadd.f32 %v3636_v50, %v4529_v40 }
 0x4ef   : > { %v1397_v54 = vpop.f32.mrf.mxu0 }
 0x4f0   : > { %3851 = vpow2.f32 %v3286_v52  ;;  %v3289_v3 = vmul.f32 -1.442695, %v1403_v17  ;;  %v1398_v56 = vadd.f32 %v4529_v40, %v1397_v54 }
 0x4f1   : > { %v3639_v5 = vpop.f32.mrf.mxu0 }
 0x4f2   : > { %3853 = vpow2.f32 %v3289_v3  ;;  %v3288_v58 = vmul.f32 -1.442695, %v1398_v56  ;;  %v1413_v60 = vadd.f32 %v3639_v5, %v4529_v40  ;;  %v4137_v3 = vld [vmem:[%s4208_s24 + $0x8] sm:$0xff] }
 0x4f3   : > { %v1407_v61 = vpop.f32.mrf.mxu0 }
 0x4f4   : > { %3855 = vpow2.f32 %v3288_v58  ;;  %v1408_v63 = vadd.f32 %v4529_v40, %v1407_v61  ;;  %v3291_v0 = vmul.f32 -1.442695, %v1413_v60 }
 0x4f5   : > { %v3642_v44 = vpop.f32.mrf.mxu0 }
 0x4f6   : > { %v3290_v1 = vmul.f32 -1.442695, %v1408_v63  ;;  %v1423_v24 = vadd.f32 %v3642_v44, %v4529_v40 }
 0x4f7   : > { %v1417_v2 = vpop.f32.mrf.mxu0 }
 0x4f8   : > { %3857 = vpow2.f32 %v3290_v1  ;;  %v1418_v19 = vadd.f32 %v4529_v40, %v1417_v2  ;;  %v3293_v8 = vmul.f32 -1.442695, %v1423_v24  ;;  %v4138_v24 = vld [vmem:[%s4208_s24] sm:$0xff] }
 0x4f9   : > { %3859 = vpow2.f32 %v3291_v0  ;;  %v3645_v20 = vpop.f32.mrf.mxu0 }
 0x4fa   : > { %v3292_v21 = vmul.f32 -1.442695, %v1418_v19  ;;  %v1433_v22 = vadd.f32 %v3645_v20, %v4529_v40 }
 0x4fb   : > { %v3850_v23 = vpop.eup %3849  ;;  %v1427_v25 = vpop.f32.mrf.mxu0 }
 0x4fc   : > { %v1515_v4 = vadd.f32 1.0, %v3850_v23  ;;  %v3295_v6 = vmul.f32 -1.442695, %v1433_v22  ;;  %3861 = vpow2.f32 %v3292_v21  ;;  %v1428_v27 = vadd.f32 %v4529_v40, %v1427_v25 }
 0x4fd   : > { %v3852_v26 = vpop.eup %3851  ;;  %v3648_v7 = vpop.f32.mrf.mxu0 }
 0x4fe   : > { %3863 = vrcp.f32 %v1515_v4  ;;  %v1514_v12 = vadd.f32 1.0, %v3852_v26  ;;  %v1443_v28 = vadd.f32 %v3648_v7, %v4529_v40  ;;  %v3294_v16 = vmul.f32 -1.442695, %v1428_v27 }
 0x4ff   : > { %v3854_v29 = vpop.eup %3853  ;;  %3865 = vpow2.f32 %v3295_v6  ;;  %v1437_v14 = vpop.f32.mrf.mxu0 }
 0x500   : > { %3867 = vrcp.f32 %v1514_v12  ;;  %v1517_v62 = vadd.f32 1.0, %v3854_v29  ;;  %v3297_v32 = vmul.f32 -1.442695, %v1443_v28  ;;  %v1438_v0 = vadd.f32 %v4529_v40, %v1437_v14 }
 0x501   : > { %v3856_v9 = vpop.eup %3855  ;;  %v3651_v33 = vpop.f32.mrf.mxu0 }
 0x502   : > { %3869 = vrcp.f32 %v1517_v62  ;;  %v1516_v18 = vadd.f32 1.0, %v3856_v9  ;;  %v1453_v36 = vadd.f32 %v3651_v33, %v4529_v40  ;;  %v3296_v23 = vmul.f32 -1.442695, %v1438_v0  ;;  %v4573_v62 = vld [vmem:[%s4208_s24 + $0x18] sm:$0xff] }
 0x503   : > { %3871 = vpow2.f32 %v3293_v8  ;;  %v4542_v10 = vpop.f32.mrf.mxu0 }
 0x504   : > { %3873 = vpow2.f32 %v3297_v32  ;;  %v3299_v48 = vmul.f32 -1.442695, %v1453_v36 }
 0x505   : > { %v3858_v38 = vpop.eup %3857  ;;  %3875 = vpow2.f32 %v3294_v16  ;;  %v3654_v11 = vpop.f32.mrf.mxu0 }
 0x506   : > { %v3860_v13 = vpop.eup %3859  ;;  %3877 = vrcp.f32 %v1516_v18  ;;  %v1518_v42 = vadd.f32 1.0, %v3858_v38  ;;  %v1463_v46 = vadd.f32 %v3654_v11, %v4529_v40  ;;  %v4581_v18 = vld [vmem:[%s4208_s24 + $0x10] sm:$0xff] }
 0x507   : > { %v1519_v15 = vadd.f32 1.0, %v3860_v13  ;;  %v1448_v13 = vadd.f32 %v4529_v40, %v4542_v10 }
 0x508   : > { %3879 = vrcp.f32 %v1518_v42  ;;  %v3301_v17 = vmul.f32 -1.442695, %v1463_v46 }
 0x509   : > { %v3862_v50 = vpop.eup %3861  ;;  %3881 = vpow2.f32 %v3299_v48  ;;  %v1457_v48 = vpop.f32.mrf.mxu0 }
 0x50a   : > { %3883 = vrcp.f32 %v1519_v15  ;;  %v1520_v61 = vadd.f32 1.0, %v3862_v50 }
 0x50b   : > { %v4546_v52 = vpop.eup %3863  ;;  %3885 = vpow2.f32 %v3301_v17 }
 0x50c   : > { %5972 = vst [vmem:[#allocation9_spill] sm:$0xff] %v4546_v52  ;;  %v3866_v54 = vpop.eup %3865  ;;  %v1771_v56 = vmul.f32 %v4137_v3, %v4546_v52  ;;  %v1707_v5 = vmul.f32 %v4546_v52, %v4546_v52  ;;  %v1563_v58 = vsub.f32 %v4137_v3, %v4546_v52 }
 0x50d   : > { %v4553_v60 = vpop.eup %3867  ;;  %v1523_v63 = vadd.f32 1.0, %v3866_v54  ;;  %v4594_v54 = vld [vmem:[%s4208_s24 + $0x20] sm:$0xff] }
 0x50e   : > { %5973 = vst [vmem:[#allocation10_spill] sm:$0xff] %v4553_v60  ;;  %v1789_v44 = vsel %vm5944_vm1, %v1771_v56, 0.0  ;;  %v1725_v1 = vsel %vm5944_vm1, %v1707_v5, 0.0  ;;  %v1579_v2 = vmul.f32 %v1563_v58, %v1563_v58  ;;  %v1706_v19 = vmul.f32 %v4553_v60, %v4553_v60 }
 0x50f   : > { %v4560_v20 = vpop.eup %3869  ;;  %1790 = vadd.xlane.f32.xlu0 %v1789_v44  ;;  %1726 = vadd.xlane.f32.xlu1 %v1725_v1  ;;  %3887 = vrcp.f32 %v1523_v63  ;;  %v1770_v25 = vmul.f32 %v4138_v24, %v4553_v60  ;;  %v1562_v7 = vsub.f32 %v4138_v24, %v4553_v60  ;;  %v3298_v58 = vmul.f32 -1.442695, %v1448_v13 }
 0x510   : > { %5974 = vst [vmem:[#allocation11_spill] sm:$0xff] %v4560_v20  ;;  %v3872_v21 = vpop.eup %3871  ;;  %3889 = vrcp.f32 %v1520_v61  ;;  %v1597_v6 = vsel %vm5944_vm1, %v1579_v2, 0.0  ;;  %v1722_v26 = vsel %vm5944_vm1, %v1706_v19, 0.0  ;;  %v1709_v27 = vmul.f32 %v4560_v20, %v4560_v20 }
 0x511   : > { %v3874_v22 = vpop.eup %3873  ;;  %v1521_v28 = vadd.f32 1.0, %v3872_v21  ;;  %3891 = vpow2.f32 %v3296_v23  ;;  %v1786_v14 = vsel %vm5944_vm1, %v1770_v25, 0.0  ;;  %v1565_v32 = vsub.f32 %v4573_v62, %v4560_v20 }
 0x512   : > { %v3876_v4 = vpop.eup %3875  ;;  %v1525_v29 = vadd.f32 1.0, %v3874_v22  ;;  %v1731_v9 = vsel %vm5944_vm1, %v1709_v27, 0.0  ;;  %v1578_v33 = vmul.f32 %v1562_v7, %v1562_v7  ;;  %v1458_v61 = vadd.f32 %v4529_v40, %v1457_v48  ;;  %v4610_v22 = vld [vmem:[%s4208_s24 + $0x28] sm:$0xff] }
 0x513   : > { %v4569_v12 = vpop.eup %3877  ;;  %1598 = vadd.xlane.f32.xlu1 %v1597_v6  ;;  %1723 = vadd.xlane.f32.xlu0 %v1722_v26  ;;  %v1522_v8 = vadd.f32 1.0, %v3876_v4  ;;  %3893 = vrcp.f32 %v1521_v28  ;;  %v1581_v42 = vmul.f32 %v1565_v32, %v1565_v32  ;;  %v4619_v26 = vld [vmem:[%s4208_s24 + $0x30] sm:$0xff] }
 0x514   : > { %5975 = vst [vmem:[#allocation12_spill] sm:$0xff] %v4569_v12  ;;  %v1708_v16 = vmul.f32 %v4569_v12, %v4569_v12  ;;  %v1564_v36 = vsub.f32 %v4581_v18, %v4569_v12  ;;  %3895 = vrcp.f32 %v1525_v29  ;;  %v1594_v50 = vsel %vm5944_vm1, %v1578_v33, 0.0 }
 0x515   : > { %v4585_v38 = vpop.eup %3879  ;;  %3897 = vrcp.f32 %v1522_v8  ;;  %v1603_v0 = vsel %vm5944_vm1, %v1581_v42, 0.0  ;;  %v3300_v40 = vmul.f32 -1.442695, %v1458_v61  ;;  %v4638_v42 = vld [vmem:[%s4208_s24 + $0x40] sm:$0xff] }
 0x516   : > { %5976 = vst [vmem:[#allocation13_spill] sm:$0xff] %v4585_v38  ;;  %v3882_v11 = vpop.eup %3881  ;;  %v1728_v15 = vsel %vm5944_vm1, %v1708_v16, 0.0  ;;  %v1580_v17 = vmul.f32 %v1564_v36, %v1564_v36  ;;  %v1566_v3 = vsub.f32 %v4594_v54, %v4585_v38  ;;  %v1710_v6 = vmul.f32 %v4585_v38, %v4585_v38 }
 0x517   : > { %1732 = vadd.xlane.f32.xlu1 %v1731_v9  ;;  %1787 = vadd.xlane.f32.xlu0 %v1786_v14  ;;  %v4589_v46 = vpop.eup %3883  ;;  %v1527_v5 = vadd.f32 1.0, %v3882_v11 }
 0x518   : > { %5977 = vst [vmem:[#allocation14_spill] sm:$0xff] %v4589_v46  ;;  %v3886_v56 = vpop.eup %3885  ;;  %v1600_v44 = vsel %vm5944_vm1, %v1580_v17, 0.0  ;;  %v1711_v1 = vmul.f32 %v4589_v46, %v4589_v46  ;;  %v1582_v2 = vmul.f32 %v1566_v3, %v1566_v3  ;;  %v1567_v23 = vsub.f32 %v4610_v22, %v4589_v46 }
 0x519   : > { %3899 = vrcp.f32 %v1527_v5  ;;  %v1529_v19 = vadd.f32 1.0, %v3886_v56  ;;  %v1734_v14 = vsel %vm5944_vm1, %v1710_v6, 0.0 }
 0x51a   : > { %3901 = vpow2.f32 %v3298_v58  ;;  %v1737_v25 = vsel %vm5944_vm1, %v1711_v1, 0.0  ;;  %v1606_v4 = vsel %vm5944_vm1, %v1582_v2, 0.0  ;;  %v1583_v32 = vmul.f32 %v1567_v23, %v1567_v23  ;;  %v4649_v58 = vld [vmem:[%s4208_s24 + $0x38] sm:$0xff] }
 0x51b   : > { %1729 = vadd.xlane.f32.xlu1 %v1728_v15  ;;  %1595 = vadd.xlane.f32.xlu0 %v1594_v50  ;;  %3903 = vrcp.f32 %v1529_v19 }
 0x51c   : > { %v4598_v10 = vpop.eup %3887  ;;  %3905 = vpow2.f32 %v3300_v40  ;;  %v1609_v36 = vsel %vm5944_vm1, %v1583_v32, 0.0  ;;  %v1772_v32 = vmul.f32 %v4581_v18, %v4569_v12 }
 0x51d   : > { %5978 = vst [vmem:[#allocation15_spill] sm:$0xff] %v4598_v10  ;;  %v4601_v63 = vpop.eup %3889  ;;  %v1715_v21 = vmul.f32 %v4598_v10, %v4598_v10 }
 0x51e   : > { %5979 = vst [vmem:[#allocation16_spill] sm:$0xff] %v4601_v63  ;;  %v3892_v24 = vpop.eup %3891  ;;  %v1568_v27 = vsub.f32 %v4619_v26, %v4601_v63  ;;  %v1712_v56 = vmul.f32 %v4601_v63, %v4601_v63 }
 0x51f   : > { %1604 = vadd.xlane.f32.xlu1 %v1603_v0  ;;  %1601 = vadd.xlane.f32.xlu0 %v1600_v44  ;;  %v1749_v28 = vsel %vm5944_vm1, %v1715_v21, 0.0  ;;  %v1524_v33 = vadd.f32 1.0, %v3892_v24 }
 0x520   : > { %v4623_v7 = vpop.eup %3893  ;;  %v1584_v9 = vmul.f32 %v1568_v27, %v1568_v27  ;;  %v1740_v2 = vsel %vm5944_vm1, %v1712_v56, 0.0  ;;  %v4666_v27 = vld [vmem:[%s4208_s24 + $0x48] sm:$0xff] }
 0x521   : > { %5980 = vst [vmem:[#allocation17_spill] sm:$0xff] %v4623_v7  ;;  %v4626_v29 = vpop.eup %3895  ;;  %v1713_v13 = vmul.f32 %v4623_v7, %v4623_v7  ;;  %3907 = vrcp.f32 %v1524_v33  ;;  %v1569_v61 = vsub.f32 %v4649_v58, %v4623_v7 }
 0x522   : > { %5981 = vst [vmem:[#allocation18_spill] sm:$0xff] %v4626_v29  ;;  %v4628_v8 = vpop.eup %3897  ;;  %v1717_v16 = vmul.f32 %v4626_v29, %v4626_v29  ;;  %v1612_v11 = vsel %vm5944_vm1, %v1584_v9, 0.0 }
 0x523   : > { %1738 = vadd.xlane.f32.xlu1 %v1737_v25  ;;  %1607 = vadd.xlane.f32.xlu0 %v1606_v4  ;;  %5982 = vst [vmem:[#allocation19_spill] sm:$0xff] %v4628_v8  ;;  %v1570_v48 = vsub.f32 %v4638_v42, %v4628_v8  ;;  %v1743_v3 = vsel %vm5944_vm1, %v1713_v13, 0.0  ;;  %v1585_v21 = vmul.f32 %v1569_v61, %v1569_v61 }
 0x524   : > { %v1755_v15 = vsel %vm5944_vm1, %v1717_v16, 0.0  ;;  %v1714_v6 = vmul.f32 %v4628_v8, %v4628_v8  ;;  %v1774_v61 = vmul.f32 %v4594_v54, %v4585_v38  ;;  %v3303_v54 = vld [vmem:[%s5929_s1 + $0xc8] sm:$0x3] }
 0x525   : > { %v1586_v5 = vmul.f32 %v1570_v48, %v1570_v48  ;;  %v1615_v4 = vsel %vm5944_vm1, %v1585_v21, 0.0  ;;  %v1773_v48 = vmul.f32 %v4573_v62, %v4560_v20  ;;  %v1776_v21 = vmul.f32 %v4619_v26, %v4601_v63  ;;  %3655 = vmatprep.subr.msk.mxu1 %vm2372_vm4, %v3303_v54 }
 0x526   : > { %v4643_v50 = vpop.eup %3899  ;;  %v1746_v16 = vsel %vm5944_vm1, %v1714_v6, 0.0  ;;  %3656 = vmatpush3.msk.msra.mxu1 %vm2372_vm4, %v3303_v54  ;;  %v4152_v54 = vld [vmem:[%s4208_s24 + $0x70] sm:$0xff] }
 0x527   : > { %1735 = vadd.xlane.f32.xlu1 %v1734_v14  ;;  %1750 = vadd.xlane.f32.xlu0 %v1749_v28  ;;  %5983 = vst [vmem:[#allocation20_spill] sm:$0xff] %v4643_v50  ;;  %v3902_v17 = vpop.eup %3901  ;;  %v1719_v0 = vmul.f32 %v4643_v50, %v4643_v50  ;;  %v1618_v19 = vsel %vm5944_vm1, %v1586_v5, 0.0  ;;  %v1571_v28 = vsub.f32 %v4666_v27, %v4598_v10  ;;  %v1795_v56 = vsel %vm5944_vm1, %v1773_v48, 0.0 }
 0x528   : > { %v4655_v44 = vpop.eup %3903  ;;  %v1526_v1 = vadd.f32 1.0, %v3902_v17  ;;  %v1804_v26 = vsel %vm5944_vm1, %v1776_v21, 0.0 }
 0x529   : > { %5984 = vst [vmem:[#allocation21_spill] sm:$0xff] %v4655_v44  ;;  %v3906_v40 = vpop.eup %3905  ;;  %v1761_v23 = vsel %vm5944_vm1, %v1719_v0, 0.0  ;;  %v1721_v24 = vmul.f32 %v4655_v44, %v4655_v44  ;;  %v1587_v33 = vmul.f32 %v1571_v28, %v1571_v28  ;;  %v1798_v0 = vsel %vm5944_vm1, %v1774_v61, 0.0  ;;  %v4151_v61 = vld [vmem:[%s4208_s24 + $0x78] sm:$0xff] }
 0x52a   : > { %3909 = vrcp.f32 %v1526_v1  ;;  %v1528_v25 = vadd.f32 1.0, %v3906_v40 }
 0x52b   : > { %1610 = vadd.xlane.f32.xlu1 %v1609_v36  ;;  %1613 = vadd.xlane.f32.xlu0 %v1612_v11  ;;  %v1767_v14 = vsel %vm5944_vm1, %v1721_v24, 0.0  ;;  %v1792_v36 = vsel %vm5944_vm1, %v1772_v32, 0.0  ;;  %v1621_v11 = vsel %vm5944_vm1, %v1587_v33, 0.0  ;;  %v4148_v24 = vld [vmem:[%s4208_s24 + $0x58] sm:$0xff]  ;;  %v4149_v32 = vld [vmem:[%s4208_s24 + $0x60] sm:$0xff]  ;;  %v4150_v33 = vld [vmem:[%s4208_s24 + $0x68] sm:$0xff] }
 0x52c   : > { %3911 = vrcp.f32 %v1528_v25  ;;  %v1573_v25 = vsub.f32 %v4148_v24, %v4626_v29 }
 0x52e   : > { %v4673_v9 = vpop.eup %3907  ;;  %v1589_v28 = vmul.f32 %v1573_v25, %v1573_v25 }
 0x52f   : > { %1744 = vadd.xlane.f32.xlu1 %v1743_v3  ;;  %1756 = vadd.xlane.f32.xlu0 %v1755_v15  ;;  %5985 = vst [vmem:[#allocation22_spill] sm:$0xff] %v4673_v9  ;;  %v1716_v13 = vmul.f32 %v4673_v9, %v4673_v9  ;;  %v4147_v15 = vld [vmem:[%s4208_s24 + $0x50] sm:$0xff] }
 0x530   : > { %v1572_v18 = vsub.f32 %v4147_v15, %v4673_v9 }
 0x531   : > { %v1752_v3 = vsel %vm5944_vm1, %v1716_v13, 0.0 }
 0x532   : > { %v1588_v5 = vmul.f32 %v1572_v18, %v1572_v18  ;;  %v1780_v18 = vmul.f32 %v4147_v15, %v4673_v9 }
 0x533   : > { %1741 = vadd.xlane.f32.xlu1 %v1740_v2  ;;  %1619 = vadd.xlane.f32.xlu0 %v1618_v19  ;;  %v1775_v2 = vmul.f32 %v4610_v22, %v4589_v46 }
 0x534   : > { %v1624_v62 = vsel %vm5944_vm1, %v1588_v5, 0.0 }
 0x537   : > { %1616 = vadd.xlane.f32.xlu1 %v1615_v4  ;;  %1762 = vadd.xlane.f32.xlu0 %v1761_v23  ;;  %v4684_v17 = vpop.eup %3909  ;;  %v1801_v23 = vsel %vm5944_vm1, %v1775_v2, 0.0  ;;  %v3302_v4 = vld [vmem:[%s5929_s1 + $0xc0] sm:$0xff] }
 0x538   : > { %5986 = vst [vmem:[#allocation23_spill] sm:$0xff] %v4684_v17  ;;  %v1718_v1 = vmul.f32 %v4684_v17, %v4684_v17  ;;  %3657 = vmatprep.subr.mxu1 %v3302_v4  ;;  %v1782_v5 = vmul.f32 %v4149_v32, %v4684_v17 }
 0x539   : > { %v4696_v19 = vpop.eup %3911  ;;  %3658 = vmatpush3.msra.mxu1 %v3302_v4 }
 0x53a   : > { %5987 = vst [vmem:[#allocation24_spill] sm:$0xff] %v4696_v19  ;;  %v1758_v40 = vsel %vm5944_vm1, %v1718_v1, 0.0  ;;  %v1720_v22 = vmul.f32 %v4696_v19, %v4696_v19  ;;  %v1822_v15 = vsel %vm5944_vm1, %v1782_v5, 0.0  ;;  %v1784_v21 = vmul.f32 %v4152_v54, %v4696_v19 }
 0x53b   : > { %1747 = vadd.xlane.f32.xlu1 %v1746_v16  ;;  %1768 = vadd.xlane.f32.xlu0 %v1767_v14  ;;  %v1778_v14 = vmul.f32 %v4638_v42, %v4628_v8  ;;  %v1574_v16 = vsub.f32 %v4149_v32, %v4684_v17  ;;  %v1779_v32 = vmul.f32 %v4666_v27, %v4598_v10 }
 0x53c   : > { %v1764_v6 = vsel %vm5944_vm1, %v1720_v22, 0.0  ;;  %v1828_v25 = vsel %vm5944_vm1, %v1784_v21, 0.0 }
 0x53d   : > { %v1810_v13 = vsel %vm5944_vm1, %v1778_v14, 0.0  ;;  %v1590_v48 = vmul.f32 %v1574_v16, %v1574_v16 }
 0x53f   : > { %1622 = vadd.xlane.f32.xlu1 %v1621_v11  ;;  %1793 = vadd.xlane.f32.xlu0 %v1792_v36  ;;  %v1575_v36 = vsub.f32 %v4150_v33, %v4643_v50  ;;  %v1627_v11 = vsel %vm5944_vm1, %v1589_v28, 0.0 }
 0x541   : > { %v1591_v42 = vmul.f32 %v1575_v36, %v1575_v36  ;;  %v1813_v36 = vsel %vm5944_vm1, %v1779_v32, 0.0 }
 0x543   : > { %1753 = vadd.xlane.f32.xlu1 %v1752_v3  ;;  %1796 = vadd.xlane.f32.xlu0 %v1795_v56  ;;  %v1630_v3 = vsel %vm5944_vm1, %v1590_v48, 0.0  ;;  %v1816_v56 = vsel %vm5944_vm1, %v1780_v18, 0.0  ;;  %v1633_v1 = vsel %vm5944_vm1, %v1591_v42, 0.0  ;;  %v1785_v42 = vmul.f32 %v4151_v61, %v4655_v44 }
 0x547   : > { %1625 = vadd.xlane.f32.xlu1 %v1624_v62  ;;  %1799 = vadd.xlane.f32.xlu0 %v1798_v0  ;;  %v1577_v62 = vsub.f32 %v4151_v61, %v4655_v44  ;;  %v4728_v0 = vpop.xlane.xlu0 %1659 }
 0x548   : > { %3913 = vrsqrt.f32 %v4728_v0  ;;  %vm1836_vm5 = vcmp.eq.f32.partialorder %v4728_v0, inf  ;;  %vm1838_vm6 = vcmp.eq.f32.partialorder %v4728_v0, 0.0 }
 0x549   : > { %v1593_v2 = vmul.f32 %v1577_v62, %v1577_v62 }
 0x54b   : > { %1759 = vadd.xlane.f32.xlu1 %v1758_v40  ;;  %1802 = vadd.xlane.f32.xlu0 %v1801_v23  ;;  %v1576_v40 = vsub.f32 %v4152_v54, %v4696_v19  ;;  %v4735_v23 = vpop.xlane.xlu0 %1665  ;;  %v1639_v22 = vsel %vm5944_vm1, %v1593_v2, 0.0 }
 0x54c   : > { %vm1850_vm7 = vcmp.eq.f32.partialorder %v4735_v23, inf  ;;  %vm1852_vm11 = vcmp.eq.f32.partialorder %v4735_v23, 0.0  ;;  %v5992_v38 = vand.u32 2147483648, %v4735_v23 }
 0x54d   : > { %v1592_v4 = vmul.f32 %v1576_v40, %v1576_v40 }
 0x54f   : > { %1765 = vadd.xlane.f32.xlu1 %v1764_v6  ;;  %1805 = vadd.xlane.f32.xlu0 %v1804_v26  ;;  %v1636_v26 = vsel %vm5944_vm1, %v1592_v4, 0.0  ;;  %v1777_v6 = vmul.f32 %v4649_v58, %v4623_v7  ;;  %v4742_v28 = vpop.xlane.xlu0 %1668  ;;  %v1783_v58 = vmul.f32 %v4150_v33, %v4643_v50 }
 0x550   : > { %vm1857_vm10 = vcmp.eq.f32.partialorder %v4742_v28, inf  ;;  %vm1859_vm14 = vcmp.eq.f32.partialorder %v4742_v28, 0.0 }
 0x551   : > { %v1807_v14 = vsel %vm5944_vm1, %v1777_v6, 0.0  ;;  %v1825_v18 = vsel %vm5944_vm1, %v1783_v58, 0.0 }
 0x553   : > { %1628 = vadd.xlane.f32.xlu1 %v1627_v11  ;;  %1811 = vadd.xlane.f32.xlu0 %v1810_v13  ;;  %v4747_v16 = vpop.xlane.xlu0 %1671  ;;  %v1781_v11 = vmul.f32 %v4148_v24, %v4626_v29  ;;  %v4762_v24 = vpop.xlane.xlu1 %1662 }
 0x554   : > { %3915 = vrsqrt.f32 %v4762_v24  ;;  %vm1843_vm8 = vcmp.eq.f32.partialorder %v4762_v24, inf  ;;  %vm1845_vm9 = vcmp.eq.f32.partialorder %v4762_v24, 0.0  ;;  %v1846_v58 = vand.u32 2147483648, %v4762_v24 }
 0x555   : > { %v1819_v13 = vsel %vm5944_vm1, %v1781_v11, 0.0  ;;  %3917 = vrsqrt.f32 %v4735_v23  ;;  %v4784_v2 = vpop.eup %3913  ;;  %vm1864_vm13 = vcmp.eq.f32.partialorder %v4747_v16, inf  ;;  %vm1866_vm15 = vcmp.eq.f32.partialorder %v4747_v16, 0.0 }
 0x556   : > { %3919 = vrsqrt.f32 %v4742_v28  ;;  %v1835_v40 = vmul.f32 %v4784_v2, %v4728_v0  ;;  %v5994_v60 = vand.u32 2147483648, %v4747_v16 }
 0x557   : > { %1631 = vadd.xlane.f32.xlu1 %v1630_v3  ;;  %1817 = vadd.xlane.f32.xlu0 %v1816_v56  ;;  %v4753_v48 = vpop.xlane.xlu0 %1674  ;;  %v1831_v3 = vsel %vm5944_vm1, %v1785_v42, 0.0  ;;  %v4766_v33 = vpop.xlane.xlu1 %1686 }
 0x558   : > { %3921 = vrsqrt.f32 %v4766_v33  ;;  %vm1899_vm12 = vcmp.eq.f32.partialorder %v4766_v33, inf  ;;  %vm1901_vm4 = vcmp.eq.f32.partialorder %v4766_v33, 0.0 }
 0x559   : > { %3923 = vrsqrt.f32 %v4747_v16 }
 0x55b   : > { %1634 = vadd.xlane.f32.xlu1 %v1633_v1  ;;  %1823 = vadd.xlane.f32.xlu0 %v1822_v15  ;;  %v4757_v27 = vpop.xlane.xlu0 %1677  ;;  %v4772_v61 = vpop.xlane.xlu1 %1692 }
 0x55c   : > { %3925 = vrsqrt.f32 %v4772_v61  ;;  %vm1913_vm0 = vcmp.eq.f32.partialorder %v4772_v61, inf }
 0x55d   : > { %3927 = vrsqrt.f32 %v4753_v48 }
 0x55f   : > { %1640 = vadd.xlane.f32.xlu1 %v1639_v22  ;;  %1829 = vadd.xlane.f32.xlu0 %v1828_v25  ;;  %v4760_v56 = vpop.xlane.xlu0 %1680  ;;  %v4781_v15 = vpop.xlane.xlu1 %1698 }
 0x560   : > { %3929 = vrsqrt.f32 %v4781_v15 }
 0x561   : > { %v4789_v21 = vpop.eup %3915  ;;  %3931 = vrsqrt.f32 %v4757_v27 }
 0x562   : > { %v1842_v25 = vmul.f32 %v4789_v21, %v4762_v24  ;;  %v4799_v4 = vpop.eup %3917 }
 0x563   : > { %1637 = vadd.xlane.f32.xlu1 %v1636_v26  ;;  %v4764_v5 = vpop.xlane.xlu0 %1683  ;;  %v4793_v22 = vpop.xlane.xlu1 %1704  ;;  %v1839_v26 = vand.u32 2147483648, %v4728_v0 }
 0x564   : > { %v4805_v6 = vpop.eup %3919  ;;  %3933 = vrsqrt.f32 %v4793_v22  ;;  %vm1892_vm1 = vcmp.eq.f32.partialorder %v4764_v5, inf  ;;  %vm1943_vm2 = vcmp.eq.f32.partialorder %v4793_v22, 0.0 }
 0x565   : > { %v1856_v19 = vmul.f32 %v4805_v6, %v4742_v28 }
 0x567   : > { %1808 = vadd.xlane.f32.xlu1 %v1807_v14  ;;  %v4770_v62 = vpop.xlane.xlu0 %1689  ;;  %v1837_v14 = vsel %vm1836_vm5, %v4728_v0, %v1835_v40  ;;  %v1844_v40 = vsel %vm1843_vm8, %v4762_v24, %v1842_v25  ;;  %vm1871_vm5 = vcmp.eq.f32.partialorder %v4753_v48, inf  ;;  %vm1927_vm8 = vcmp.eq.f32.partialorder %v4781_v15, inf }
 0x568   : > { %v4855_v50 = vsel %vm1845_vm9, %v1846_v58, %v1844_v40  ;;  %v1874_v40 = vand.u32 2147483648, %v4753_v48  ;;  %vm1878_vm9 = vcmp.eq.f32.partialorder %v4757_v27, inf  ;;  %vm1906_vm3 = vcmp.eq.f32.partialorder %v4770_v62, inf }
 0x56b   : > { %1814 = vadd.xlane.f32.xlu1 %v1813_v36  ;;  %v4777_v1 = vpop.xlane.xlu0 %1695 }
 0x56f   : > { %1820 = vadd.xlane.f32.xlu1 %v1819_v13  ;;  %v4787_v54 = vpop.xlane.xlu0 %1701  ;;  %v4815_v13 = vpop.eup %3921 }
 0x570   : > { %5988 = vst [vmem:[#allocation25_spill] sm:$0xff] %v4815_v13  ;;  %v4821_v42 = vpop.eup %3923  ;;  %v1898_v17 = vmul.f32 %v4815_v13, %v4766_v33 }
 0x571   : > { %v4831_v32 = vpop.eup %3925  ;;  %v1863_v25 = vmul.f32 %v4821_v42, %v4747_v16 }
 0x572   : > { %5989 = vst [vmem:[#allocation26_spill] sm:$0xff] %v4831_v32  ;;  %v4851_v44 = vpop.eup %3927  ;;  %v1912_v24 = vmul.f32 %v4831_v32, %v4772_v61  ;;  %v1900_v7 = vsel %vm1899_vm12, %v4766_v33, %v1898_v17  ;;  %vm1941_vm12 = vcmp.eq.f32.partialorder %v4793_v22, inf  ;;  %v6001_v32 = vand.u32 2147483648, %v4757_v27 }
 0x573   : > { %1826 = vadd.xlane.f32.xlu1 %v1825_v18  ;;  %v4835_v18 = vsel %vm1838_vm6, %v1839_v26, %v1837_v14  ;;  %v4870_v58 = vpop.eup %3929  ;;  %vm1873_vm6 = vcmp.eq.f32.partialorder %v4753_v48, 0.0  ;;  %v1870_v9 = vmul.f32 %v4851_v44, %v4753_v48  ;;  %v1865_v0 = vsel %vm1864_vm13, %v4747_v16, %v1863_v25 }
 0x574   : > { %5990 = vst [vmem:[#allocation27_spill] sm:$0xff] %v4870_v58  ;;  %v1914_v63 = vsel %vm1913_vm0, %v4772_v61, %v1912_v24  ;;  %v1926_v46 = vmul.f32 %v4870_v58, %v4781_v15  ;;  %vm1885_vm13 = vcmp.eq.f32.partialorder %v4760_v56, inf  ;;  %vm1929_vm0 = vcmp.eq.f32.partialorder %v4781_v15, 0.0 }
 0x575   : > { %v1872_v24 = vsel %vm1871_vm5, %v4753_v48, %v1870_v9  ;;  %vm1887_vm5 = vcmp.eq.f32.partialorder %v4760_v56, 0.0  ;;  %v4957_v9 = vsel %vm1866_vm15, %v5994_v60, %v1865_v0  ;;  %vm1920_vm15 = vcmp.eq.f32.partialorder %v4777_v1, inf }
 0x576   : > { %v1928_v57 = vsel %vm1927_vm8, %v4781_v15, %v1926_v46  ;;  %v5993_v46 = vand.u32 2147483648, %v4742_v28  ;;  %v4976_v16 = vsel %vm1873_vm6, %v1874_v40, %v1872_v24  ;;  %v5995_v0 = vand.u32 2147483648, %v4766_v33 }
 0x577   : > { %1832 = vadd.xlane.f32.xlu1 %v1831_v3  ;;  %v1849_v3 = vmul.f32 %v4799_v4, %v4735_v23  ;;  %v5997_v40 = vand.u32 2147483648, %v4772_v61  ;;  %vm1922_vm6 = vcmp.eq.f32.partialorder %v4777_v1, 0.0 }
 0x579   : > { %v1851_v29 = vsel %vm1850_vm7, %v4735_v23, %v1849_v3  ;;  %v1858_v3 = vsel %vm1857_vm10, %v4742_v28, %v1856_v19  ;;  %vm1915_vm7 = vcmp.eq.f32.partialorder %v4772_v61, 0.0  ;;  %vm1880_vm10 = vcmp.eq.f32.partialorder %v4757_v27, 0.0  ;;  %v4908_v19 = vpop.eup %3931 }
 0x57a   : > { %v4921_v25 = vpop.eup %3933  ;;  %v4931_v12 = vsel %vm1852_vm11, %v5992_v38, %v1851_v29  ;;  %v1877_v38 = vmul.f32 %v4908_v19, %v4757_v27  ;;  %v4951_v23 = vsel %vm1859_vm14, %v5993_v46, %v1858_v3  ;;  %vm1908_vm14 = vcmp.eq.f32.partialorder %v4770_v62, 0.0 }
 0x57b   : > { %5991 = vst [vmem:[#allocation28_spill] sm:$0xff] %v4921_v25  ;;  %v1940_v58 = vmul.f32 %v4921_v25, %v4793_v22  ;;  %v4982_v46 = vsel %vm1901_vm4, %v5995_v0, %v1900_v7  ;;  %vm1934_vm4 = vcmp.eq.f32.partialorder %v4787_v54, inf  ;;  %v5000_v24 = vsel %vm1915_vm7, %v5997_v40, %v1914_v63 }
 0x57c   : > { %v1879_v48 = vsel %vm1878_vm9, %v4757_v27, %v1877_v38  ;;  %v5999_v61 = vmax.f32 %v4855_v50, 1e-08 }
 0x57d   : > { %v5032_v50 = vsel %vm1880_vm10, %v6001_v32, %v1879_v48 }
 0x598   : > { %v4811_v36 = vpop.xlane.xlu0 %1790  ;;  %v4813_v11 = vpop.xlane.xlu1 %1726 }
 0x599   : > { %3935 = vrsqrt.f32 %v4813_v11  ;;  %vm1955_vm8 = vcmp.eq.f32.partialorder %v4813_v11, inf  ;;  %vm1957_vm11 = vcmp.eq.f32.partialorder %v4813_v11, 0.0 }
 0x59a   : > { %3937 = vrsqrt.f32 %v4760_v56 }
 0x59b   : > { %3939 = vrsqrt.f32 %v4764_v5 }
 0x59c   : > { %v4847_v26 = vpop.xlane.xlu1 %1598  ;;  %v4849_v14 = vpop.xlane.xlu0 %1723  ;;  %3941 = vrsqrt.f32 %v4770_v62 }
 0x59d   : > { %3943 = vrsqrt.f32 %v4849_v14  ;;  %vm1948_vm7 = vcmp.eq.f32.partialorder %v4849_v14, inf  ;;  %vm1950_vm9 = vcmp.eq.f32.partialorder %v4849_v14, 0.0 }
 0x59e   : > { %3945 = vrsqrt.f32 %v4777_v1 }
 0x59f   : > { %3947 = vrsqrt.f32 %v4787_v54 }
 0x5a0   : > { %v4884_v10 = vpop.xlane.xlu1 %1732  ;;  %v4886_v8 = vpop.xlane.xlu0 %1787 }
 0x5a1   : > { %3949 = vrsqrt.f32 %v4884_v10 }
 0x5a2   : > { %3951 = vrsqrt.f32 %v4847_v26 }
 0x5a4   : > { %v4917_v17 = vpop.xlane.xlu1 %1729  ;;  %v4919_v20 = vpop.xlane.xlu0 %1595 }
 0x5a5   : > { %3953 = vrsqrt.f32 %v4917_v17  ;;  %vm1962_vm10 = vcmp.eq.f32.partialorder %v4917_v17, inf }
 0x5a6   : > { %v3936_v52 = vpop.eup %3935  ;;  %3955 = vrsqrt.f32 %v4919_v20 }
 0x5a7   : > { %v4941_v59 = vpop.eup %3937  ;;  %v1954_v29 = vmul.f32 %v3936_v52, %v4813_v11  ;;  %v1958_v52 = vand.u32 2147483648, %v4813_v11 }
 0x5a8   : > { %v4959_v53 = vpop.eup %3939  ;;  %v4965_v55 = vpop.xlane.xlu1 %1604  ;;  %v1884_v3 = vmul.f32 %v4941_v59, %v4760_v56 }
 0x5a9   : > { %v4967_v28 = vpop.xlane.xlu0 %1601  ;;  %v1956_v60 = vsel %vm1955_vm8, %v4813_v11, %v1954_v29  ;;  %v4984_v25 = vpop.eup %3941  ;;  %v1891_v33 = vmul.f32 %v4959_v53, %v4764_v5  ;;  %vm1964_vm8 = vcmp.eq.f32.partialorder %v4917_v17, 0.0 }
 0x5aa   : > { %5996 = vst [vmem:[#allocation29_spill] sm:$0xff] %v4984_v25  ;;  %v1959_v49 = vsel %vm1957_vm11, %v1958_v52, %v1956_v60  ;;  %v3944_v51 = vpop.eup %3943  ;;  %v1942_v52 = vsel %vm1941_vm12, %v4793_v22, %v1940_v58  ;;  %v1905_v63 = vmul.f32 %v4984_v25, %v4770_v62  ;;  %vm1936_vm12 = vcmp.eq.f32.partialorder %v4787_v54, 0.0 }
 0x5ab   : > { %v2219_v7 = vmax.f32 %v1959_v49, 1e-08  ;;  %v1947_v38 = vmul.f32 %v3944_v51, %v4849_v14  ;;  %v5013_v29 = vpop.eup %3945  ;;  %v1951_v51 = vand.u32 2147483648, %v4849_v14  ;;  %v1886_v49 = vsel %vm1885_vm13, %v4760_v56, %v1884_v3 }
 0x5ac   : > { %v5007_v60 = vpop.xlane.xlu1 %1738  ;;  %5998 = vst [vmem:[#allocation30_spill] sm:$0xff] %v5013_v29  ;;  %v5021_v40 = vpop.eup %3947  ;;  %v6002_v3 = vand.u32 2147483648, %v4781_v15  ;;  %v1919_v27 = vmul.f32 %v5013_v29, %v4777_v1  ;;  %v6004_v15 = vand.u32 2147483648, %v4760_v56  ;;  %vm2060_vm13 = vcmp.eq.f32.partialorder %v4919_v20, inf }
 0x5ad   : > { %v5009_v0 = vpop.xlane.xlu0 %1607  ;;  %v2235_v58 = vmul.f32 %v2219_v7, %v5999_v61  ;;  %6000 = vst [vmem:[#allocation31_spill] sm:$0xff] %v5021_v40  ;;  %v1949_v11 = vsel %vm1948_vm7, %v4849_v14, %v1947_v38  ;;  %v1893_v61 = vsel %vm1892_vm1, %v4764_v5, %v1891_v33  ;;  %3957 = vrsqrt.f32 %v5007_v60 }
 0x5ae   : > { %v3950_v7 = vpop.eup %3949  ;;  %v1952_v45 = vsel %vm1950_vm9, %v1951_v51, %v1949_v11  ;;  %v5043_v14 = vsel %vm1929_vm0, %v6002_v3, %v1928_v57  ;;  %v6003_v33 = vand.u32 2147483648, %v4793_v22  ;;  %v1907_v57 = vsel %vm1906_vm3, %v4770_v62, %v1905_v63 }
 0x5af   : > { %3959 = vrcp.f32 %v2235_v58  ;;  %v2218_v32 = vmax.f32 %v1952_v45, 1e-08  ;;  %v3952_v51 = vpop.eup %3951  ;;  %v5065_v45 = vsel %vm1887_vm5, %v6004_v15, %v1886_v49  ;;  %v1933_v22 = vmul.f32 %v5021_v40, %v4787_v54 }
 0x5b0   : > { %v5047_v48 = vpop.xlane.xlu1 %1735  ;;  %v5055_v11 = vsel %vm1943_vm2, %v6003_v33, %v1942_v52  ;;  %v1968_v52 = vmul.f32 %v3950_v7, %v4884_v10  ;;  %v6005_v33 = vmax.f32 %v4835_v18, 1e-08  ;;  %v6006_v63 = vand.u32 2147483648, %v4764_v5 }
 0x5b1   : > { %v5049_v38 = vpop.xlane.xlu0 %1750  ;;  %3961 = vrsqrt.f32 %v5047_v48  ;;  %vm6007_vm1 = vcmp.eq.f32.partialorder %v4764_v5, 0.0  ;;  %v1921_v18 = vsel %vm1920_vm15, %v4777_v1, %v1919_v27  ;;  %v6008_v5 = vand.u32 2147483648, %v4770_v62 }
 0x5b2   : > { %v3954_v3 = vpop.eup %3953  ;;  %v2234_v29 = vmul.f32 %v2218_v32, %v6005_v33  ;;  %v5077_v25 = vsel %vm6007_vm1, %v6006_v63, %v1893_v61  ;;  %3963 = vrsqrt.f32 %v4967_v28  ;;  %vm1969_vm2 = vcmp.eq.f32.partialorder %v4884_v10, inf }
 0x5b3   : > { %v3956_v56 = vpop.eup %3955  ;;  %v5094_v61 = vsel %vm1908_vm14, %v6008_v5, %v1907_v57  ;;  %v1961_v63 = vmul.f32 %v3954_v3, %v4917_v17  ;;  %v1935_v27 = vsel %vm1934_vm4, %v4787_v54, %v1933_v22  ;;  %v2066_v15 = vmul.f32 %v3952_v51, %v4847_v26 }
 0x5b4   : > { %3965 = vrcp.f32 %v2234_v29  ;;  %v5086_v7 = vpop.xlane.xlu1 %1610  ;;  %v2059_v58 = vmul.f32 %v3956_v56, %v4919_v20  ;;  %v1970_v62 = vsel %vm1969_vm2, %v4884_v10, %v1968_v52  ;;  %v1972_v57 = vand.u32 2147483648, %v4884_v10 }
 0x5b5   : > { %v5088_v32 = vpop.xlane.xlu0 %1613  ;;  %3967 = vrsqrt.f32 %v4965_v55  ;;  %v6009_v56 = vand.u32 2147483648, %v4777_v1  ;;  %vm1971_vm3 = vcmp.eq.f32.partialorder %v4884_v10, 0.0  ;;  %vm2067_vm0 = vcmp.eq.f32.partialorder %v4847_v26, inf }
 0x5b6   : > { %3969 = vrsqrt.f32 %v5049_v38  ;;  %v1963_v52 = vsel %vm1962_vm10, %v4917_v17, %v1961_v63  ;;  %v2061_v1 = vsel %vm2060_vm13, %v4919_v20, %v2059_v58  ;;  %v1965_v10 = vand.u32 2147483648, %v4917_v17 }
 0x5b7   : > { %v5114_v5 = vsel %vm1922_vm6, %v6009_v56, %v1921_v18  ;;  %3971 = vrsqrt.f32 %v5009_v0  ;;  %v1973_v18 = vsel %vm1971_vm3, %v1972_v57, %v1970_v62  ;;  %v2068_v56 = vsel %vm2067_vm0, %v4847_v26, %v2066_v15 }
 0x5b8   : > { %v5120_v51 = vpop.xlane.xlu1 %1744  ;;  %v2063_v3 = vand.u32 2147483648, %v4919_v20  ;;  %vm2298_vm5 = vcmask 72704   ;;  %v6010_v33 = vand.u32 2147483648, %v4787_v54  ;;  %vm2069_vm11 = vcmp.eq.f32.partialorder %v4847_v26, 0.0 }
 0x5b9   : > { %v5122_v22 = vpop.xlane.xlu0 %1756  ;;  %v2070_v63 = vand.u32 2147483648, %v4847_v26  ;;  %vm2062_vm14 = vcmp.eq.f32.partialorder %v4919_v20, 0.0  ;;  %3973 = vrsqrt.f32 %v5086_v7  ;;  %v1966_v49 = vsel %vm1964_vm8, %v1965_v10, %v1963_v52 }
 0x5ba   : > { %v5134_v29 = vsel %vm1936_vm12, %v6010_v33, %v1935_v27  ;;  %v3958_v58 = vpop.eup %3957  ;;  %v2064_v57 = vsel %vm2062_vm14, %v2063_v3, %v2061_v1  ;;  %v2221_v54 = vmax.f32 %v1973_v18, 1e-08  ;;  %vm2323_vm15 = vcmask 80896  }
 0x5bb   : > { %v2071_v27 = vsel %vm2069_vm11, %v2070_v63, %v2068_v56  ;;  %vm2074_vm4 = vcmp.eq.f32.partialorder %v4967_v28, inf  ;;  %v2186_v52 = vmul.f32 %v4784_v2, %v2064_v57  ;;  %v2220_v1 = vmax.f32 %v1966_v49, 1e-08 }
 0x5bc   : > { %v5141_v15 = vpop.xlane.xlu1 %1741  ;;  %v3960_v33 = vpop.eup %3959  ;;  %vm1983_vm6 = vcmp.eq.f32.partialorder %v5007_v60, inf  ;;  %v2187_v63 = vmul.f32 %v4789_v21, %v2071_v27  ;;  %v6011_v40 = vmax.f32 %v4951_v23, 1e-08  ;;  %vm2081_vm7 = vcmp.eq.f32.partialorder %v4965_v55, inf }
 0x5bd   : > { %v5143_v62 = vpop.xlane.xlu0 %1619  ;;  %3975 = vrsqrt.f32 %v5141_v15  ;;  %vm2076_vm9 = vcmp.eq.f32.partialorder %v4967_v28, 0.0  ;;  %v1982_v2 = vmul.f32 %v3958_v58, %v5007_v60  ;;  %vm1985_vm12 = vcmp.eq.f32.partialorder %v5007_v60, 0.0 }
 0x5be   : > { %v3962_v17 = vpop.eup %3961  ;;  %3977 = vrsqrt.f32 %v5088_v32  ;;  %v2237_v26 = vmul.f32 %v2221_v54, %v6011_v40  ;;  %v2267_v57 = vmul.f32 %v3960_v33, %v4811_v36  ;;  %v1986_v21 = vand.u32 2147483648, %v5007_v60 }
 0x5bf   : > { %3979 = vrsqrt.f32 %v5120_v51  ;;  %v3964_v18 = vpop.eup %3963  ;;  %v1975_v49 = vmul.f32 %v3962_v17, %v5047_v48  ;;  %vm1976_vm1 = vcmp.eq.f32.partialorder %v5047_v48, inf  ;;  %vm2088_vm2 = vcmp.eq.f32.partialorder %v5009_v0, inf }
 0x5c0   : > { %3981 = vrsqrt.f32 %v5122_v22  ;;  %v5156_v56 = vpop.xlane.xlu1 %1616  ;;  %v2073_v54 = vmul.f32 %v3964_v18, %v4967_v28  ;;  %vm1978_vm3 = vcmp.eq.f32.partialorder %v5047_v48, 0.0  ;;  %vm6012_vm10 = vcmask 64512  }
 0x5c1   : > { %v5158_v10 = vpop.xlane.xlu0 %1762  ;;  %v3966_v20 = vpop.eup %3965  ;;  %v2282_v58 = vsel %vm6012_vm10, %v4367_v30, %v2186_v52  ;;  %v6013_v36 = vmax.f32 %v4931_v12, 1e-08  ;;  %v1979_v27 = vand.u32 2147483648, %v5047_v48  ;;  %vm6014_vm13 = vmmov %vm6012_vm10  ;;  %3983 = vrcp.f32 %v2237_v26 }
 0x5c2   : > { %v2266_v3 = vmul.f32 %v3966_v20, %v4886_v8  ;;  %v3968_v40 = vpop.eup %3967  ;;  %v2283_v18 = vsel %vm6014_vm13, %v4369_v31, %v2187_v63  ;;  %v1984_v30 = vsel %vm1983_vm6, %v5007_v60, %v1982_v2  ;;  %v1977_v12 = vsel %vm1976_vm1, %v5047_v48, %v1975_v49 }
 0x5c3   : > { %v2236_v33 = vmul.f32 %v2220_v1, %v6013_v36  ;;  %v3970_v8 = vpop.eup %3969  ;;  %vm2083_vm0 = vcmp.eq.f32.partialorder %v4965_v55, 0.0  ;;  %v2080_v31 = vmul.f32 %v3968_v40, %v4965_v55  ;;  %vm2011_vm11 = vcmp.eq.f32.partialorder %v5049_v38, inf }
 0x5c4   : > { %v5181_v17 = vpop.xlane.xlu1 %1747  ;;  %v5184_v20 = vsel %vm2298_vm5, %v2282_v58, %v2266_v3  ;;  %v3972_v13 = vpop.eup %3971  ;;  %v5200_v3 = vsel %vm2298_vm5, %v2283_v18, %v2267_v57  ;;  %vm2013_vm8 = vcmp.eq.f32.partialorder %v5049_v38, 0.0  ;;  %v2075_v26 = vsel %vm2074_vm4, %v4967_v28, %v2073_v54 }
 0x5c5   : > { %v5186_v23 = vpop.xlane.xlu0 %1768  ;;  %3985 = vrsqrt.f32 %v5181_v17  ;;  %3659 = vmatprep.mubr.msk.f32.mxu1 %vm2323_vm15, %v5184_v20  ;;  %v2010_v52 = vmul.f32 %v3970_v8, %v5049_v38  ;;  %v2014_v1 = vand.u32 2147483648, %v5049_v38  ;;  %v2087_v63 = vmul.f32 %v3972_v13, %v5009_v0 }
 0x5c6   : > { %3987 = vrsqrt.f32 %v5158_v10  ;;  %3660 = vmatmul.mubr.msk.f32.vlgmr.msra.gmra.mxu1 %vm2323_vm15, %v5200_v3  ;;  %v1980_v57 = vsel %vm1978_vm3, %v1979_v27, %v1977_v12  ;;  %v1987_v40 = vsel %vm1985_vm12, %v1986_v21, %v1984_v30  ;;  %v3974_v58 = vpop.eup %3973  ;;  %v2000_v36 = vand.u32 2147483648, %v5120_v51 }
 0x5c7   : > { %3989 = vrcp.f32 %v2236_v33  ;;  %vm2102_vm14 = vcmp.eq.f32.partialorder %v5088_v32, inf  ;;  %v6015_v48 = vand.u32 2147483648, %v4967_v28  ;;  %v2082_v21 = vsel %vm2081_vm7, %v4965_v55, %v2080_v31 }
 0x5c8   : > { %v5216_v49 = vpop.xlane.xlu1 %1622  ;;  %3991 = vrsqrt.f32 %v5143_v62  ;;  %v2222_v27 = vmax.f32 %v1980_v57, 1e-08  ;;  %v2012_v30 = vsel %vm2011_vm11, %v5049_v38, %v2010_v52  ;;  %vm1997_vm4 = vcmp.eq.f32.partialorder %v5120_v51, inf }
 0x5c9   : > { %v5226_v13 = vpop.xlane.xlu0 %1793  ;;  %3993 = vrsqrt.f32 %v5186_v23  ;;  %v2078_v60 = vsel %vm2076_vm9, %v6015_v48, %v2075_v26  ;;  %vm2025_vm6 = vcmp.eq.f32.partialorder %v5122_v22, inf  ;;  %vm1990_vm12 = vcmp.eq.f32.partialorder %v5141_v15, inf }
 0x5ca   : > { %v3976_v33 = vpop.eup %3975  ;;  %v2223_v28 = vmax.f32 %v1987_v40, 1e-08  ;;  %v2089_v31 = vsel %vm2088_vm2, %v5009_v0, %v2087_v63  ;;  %vm1992_vm7 = vcmp.eq.f32.partialorder %v5141_v15, 0.0  ;;  %3995 = vrsqrt.f32 %v5156_v56 }
 0x5cb   : > { %v3978_v18 = vpop.eup %3977  ;;  %v1989_v12 = vmul.f32 %v3976_v33, %v5141_v15  ;;  %v6016_v52 = vmax.f32 %v4957_v9, 1e-08  ;;  %vm2090_vm9 = vcmp.eq.f32.partialorder %v5009_v0, 0.0  ;;  %v1993_v40 = vand.u32 2147483648, %v5141_v15 }
 0x5cc   : > { %v3980_v26 = vpop.eup %3979  ;;  %v5249_v57 = vpop.xlane.xlu1 %1753  ;;  %v5260_v63 = vsel %vm2013_vm8, %v2014_v1, %v2012_v30  ;;  %vm2095_vm1 = vcmp.eq.f32.partialorder %v5086_v7, inf  ;;  %v2188_v9 = vmul.f32 %v4799_v4, %v2078_v60  ;;  %vm1999_vm2 = vcmp.eq.f32.partialorder %v5120_v51, 0.0 }
 0x5cd   : > { %v2238_v48 = vmul.f32 %v2222_v27, %v6016_v52  ;;  %v3982_v54 = vpop.eup %3981  ;;  %v1991_v33 = vsel %vm1990_vm12, %v5141_v15, %v1989_v12  ;;  %3997 = vrsqrt.f32 %v5249_v57  ;;  %v6017_v27 = vand.u32 2147483648, %v4965_v55  ;;  %v1797_v8 = vpop.xlane.xlu0 %1796 }
 0x5ce   : > { %v2101_v12 = vmul.f32 %v3978_v18, %v5088_v32  ;;  %v2112_v2 = vand.u32 2147483648, %v5156_v56  ;;  %v6018_v38 = vmax.f32 %v4976_v16, 1e-08  ;;  %v1994_v30 = vsel %vm1992_vm7, %v1993_v40, %v1991_v33 }
 0x5cf   : > { %v2085_v52 = vsel %vm2083_vm0, %v6017_v27, %v2082_v21  ;;  %3999 = vrcp.f32 %v2238_v48  ;;  %v2094_v4 = vmul.f32 %v3974_v58, %v5086_v7  ;;  %v1996_v60 = vmul.f32 %v3980_v26, %v5120_v51  ;;  %v3984_v48 = vpop.eup %3983 }
 0x5d0   : > { %v2239_v1 = vmul.f32 %v2223_v28, %v6018_v38  ;;  %v2024_v55 = vmul.f32 %v3982_v54, %v5122_v22  ;;  %vm2027_vm3 = vcmp.eq.f32.partialorder %v5122_v22, 0.0  ;;  %v5279_v21 = vpop.xlane.xlu1 %1625  ;;  %v2224_v18 = vmax.f32 %v1994_v30, 1e-08 }
 0x5d1   : > { %v2227_v27 = vmax.f32 %v5260_v63, 1e-08  ;;  %v2042_v16 = vand.u32 2147483648, %v5158_v10  ;;  %4001 = vrsqrt.f32 %v5216_v49  ;;  %v2189_v15 = vmul.f32 %v4805_v6, %v2085_v52 }
 0x5d2   : > { %v3986_v28 = vpop.eup %3985  ;;  %vm2039_vm10 = vcmp.eq.f32.partialorder %v5158_v10, inf  ;;  %vm2004_vm13 = vcmp.eq.f32.partialorder %v5181_v17, inf  ;;  %v2269_v58 = vmul.f32 %v3984_v48, %v1797_v8  ;;  %4003 = vrcp.f32 %v2239_v1  ;;  %v1800_v48 = vpop.xlane.xlu0 %1799 }
 0x5d3   : > { %v6019_v54 = vmax.f32 %v5032_v50, 1e-08  ;;  %v3988_v33 = vpop.eup %3987  ;;  %v2103_v40 = vsel %vm2102_vm14, %v5088_v32, %v2101_v12  ;;  %vm2104_vm0 = vcmp.eq.f32.partialorder %v5088_v32, 0.0  ;;  %v2003_v38 = vmul.f32 %v3986_v28, %v5181_v17 }
 0x5d4   : > { %vm2006_vm11 = vcmp.eq.f32.partialorder %v5181_v17, 0.0  ;;  %v2007_v6 = vand.u32 2147483648, %v5181_v17  ;;  %v3990_v52 = vpop.eup %3989  ;;  %v1998_v8 = vsel %vm1997_vm4, %v5120_v51, %v1996_v60  ;;  %v2026_v50 = vsel %vm2025_vm6, %v5122_v22, %v2024_v55  ;;  %v5304_v1 = vpop.xlane.xlu1 %1759 }
 0x5d5   : > { %v2240_v26 = vmul.f32 %v2224_v18, %v6019_v54  ;;  %vm6020_vm8 = vcmask 64512   ;;  %vm2041_vm14 = vcmp.eq.f32.partialorder %v5158_v10, 0.0  ;;  %v2005_v30 = vsel %vm2004_vm13, %v5181_v17, %v2003_v38  ;;  %v3992_v55 = vpop.eup %3991 }
 0x5d6   : > { %v2284_v12 = vsel %vm6020_vm8, %v4375_v34, %v2188_v9  ;;  %v2268_v18 = vmul.f32 %v3990_v52, %v5226_v13  ;;  %vm6021_vm4 = vmmov %vm6020_vm8  ;;  %v2008_v28 = vsel %vm2006_vm11, %v2007_v6, %v2005_v30  ;;  %v6022_v9 = vand.u32 2147483648, %v5009_v0  ;;  %v3994_v54 = vpop.eup %3993 }
 0x5d7   : > { %4005 = vrcp.f32 %v2240_v26  ;;  %v2285_v60 = vsel %vm6021_vm4, %v4377_v35, %v2189_v15  ;;  %vm2116_vm6 = vcmp.eq.f32.partialorder %v5143_v62, inf  ;;  %v2038_v35 = vmul.f32 %v3988_v33, %v5158_v10  ;;  %v3996_v33 = vpop.eup %3995  ;;  %vm6029_vm8 = vmmov %vm6021_vm4 }
 0x5d8   : > { %4007 = vrsqrt.f32 %v5304_v1  ;;  %v5316_v34 = vsel %vm2298_vm5, %v2285_v60, %v2269_v58  ;;  %v2092_v17 = vsel %vm2090_vm9, %v6022_v9, %v2089_v31  ;;  %vm2053_vm12 = vcmp.eq.f32.partialorder %v5186_v23, inf  ;;  %v5335_v31 = vpop.xlane.xlu1 %1765 }
 0x5d9   : > { %4009 = vrsqrt.f32 %v5279_v21  ;;  %v5326_v13 = vsel %vm2298_vm5, %v2284_v12, %v2268_v18  ;;  %v2096_v15 = vsel %vm2095_vm1, %v5086_v7, %v2094_v4  ;;  %v2226_v58 = vmax.f32 %v2008_v28, 1e-08 }
 0x5da   : > { %vm2055_vm7 = vcmp.eq.f32.partialorder %v5186_v23, 0.0  ;;  %v2056_v0 = vand.u32 2147483648, %v5186_v23  ;;  %3662 = vmatprep.mubr.msk.f32.mxu1 %vm2323_vm15, %v5326_v13  ;;  %v2001_v26 = vsel %vm1999_vm2, %v2000_v36, %v1998_v8  ;;  %v6023_v38 = vand.u32 2147483648, %v5122_v22  ;;  %v3998_v52 = vpop.eup %3997 }
 0x5db   : > { %3663 = vmatmul.mubr.msk.f32.gmra.mxu1 %vm2323_vm15, %v5316_v34  ;;  %4011 = vrsqrt.f32 %v5335_v31  ;;  %v2190_v6 = vmul.f32 %v4821_v42, %v2092_v17  ;;  %vm2097_vm9 = vcmp.eq.f32.partialorder %v5086_v7, 0.0  ;;  %v2115_v51 = vmul.f32 %v3992_v55, %v5143_v62  ;;  %v1803_v42 = vpop.xlane.xlu0 %1802 }
 0x5dc   : > { %v5345_v4 = vsel %vm2027_vm3, %v6023_v38, %v2026_v50  ;;  %v2052_v36 = vmul.f32 %v3994_v54, %v5186_v23  ;;  %vm2018_vm1 = vcmp.eq.f32.partialorder %v5249_v57, inf  ;;  %v6024_v22 = vand.u32 2147483648, %v5086_v7  ;;  %v4000_v50 = vpop.eup %3999  ;;  %v5363_v28 = vpop.xlane.xlu1 %1628 }
 0x5dd   : > { %v2040_v12 = vsel %vm2039_vm10, %v5158_v10, %v2038_v35  ;;  %v2017_v30 = vmul.f32 %v3998_v52, %v5249_v57  ;;  %vm2020_vm2 = vcmp.eq.f32.partialorder %v5249_v57, 0.0  ;;  %v2225_v18 = vmax.f32 %v2001_v26, 1e-08  ;;  %vm6027_vm10 = vmmov %vm6021_vm4 }
 0x5de   : > { %v2099_v8 = vsel %vm2097_vm9, %v6024_v22, %v2096_v15  ;;  %v2021_v60 = vand.u32 2147483648, %v5249_v57  ;;  %v2270_v55 = vmul.f32 %v4000_v50, %v1800_v48  ;;  %v6025_v9 = vmax.f32 %v5077_v25, 1e-08  ;;  %v4002_v48 = vpop.eup %4001 }
 0x5df   : > { %v6026_v17 = vand.u32 2147483648, %v5088_v32  ;;  %vm2123_vm3 = vcmp.eq.f32.partialorder %v5216_v49, inf  ;;  %v2019_v35 = vsel %vm2018_vm1, %v5249_v57, %v2017_v30  ;;  %v2286_v15 = vsel %vm6027_vm10, %v4385_v39, %v2190_v6 }
 0x5e0   : > { %v2242_v7 = vmul.f32 %v2226_v58, %v6025_v9  ;;  %v2191_v26 = vmul.f32 %v4851_v44, %v2099_v8  ;;  %4013 = vrsqrt.f32 %v5363_v28  ;;  %vm2109_vm13 = vcmp.eq.f32.partialorder %v5156_v56, inf }
 0x5e1   : > { %v2106_v54 = vsel %vm2104_vm0, %v6026_v17, %v2103_v40  ;;  %v5382_v25 = vsel %vm2041_vm14, %v2042_v16, %v2040_v12  ;;  %v2054_v32 = vsel %vm2053_vm12, %v5186_v23, %v2052_v36  ;;  %v2022_v39 = vsel %vm2020_vm2, %v2021_v60, %v2019_v35  ;;  %v4004_v40 = vpop.eup %4003  ;;  %vm6031_vm14 = vmmov %vm6021_vm4 }
 0x5e2   : > { %v5390_v44 = vsel %vm2298_vm5, %v2286_v15, %v2270_v55  ;;  %v2229_v58 = vmax.f32 %v5345_v4, 1e-08  ;;  %v2228_v38 = vmax.f32 %v2022_v39, 1e-08  ;;  %v2192_v10 = vmul.f32 %v4908_v19, %v2106_v54  ;;  %v5403_v4 = vpop.xlane.xlu1 %1631 }
 0x5e3   : > { %3665 = vmatprep.mubr.msk.f32.mxu1 %vm2323_vm15, %v5390_v44  ;;  %v6028_v16 = vmax.f32 %v5065_v45, 1e-08  ;;  %v2117_v57 = vsel %vm2116_vm6, %v5143_v62, %v2115_v51  ;;  %vm2118_vm0 = vcmp.eq.f32.partialorder %v5143_v62, 0.0  ;;  %v2108_v52 = vmul.f32 %v3996_v33, %v5156_v56  ;;  %v1806_v45 = vpop.xlane.xlu0 %1805 }
 0x5e4   : > { %v2271_v36 = vmul.f32 %v4004_v40, %v1803_v42  ;;  %4015 = vrcp.f32 %v2242_v7  ;;  %v4006_v22 = vpop.eup %4005  ;;  %v2231_v8 = vmax.f32 %v5382_v25, 1e-08  ;;  %v5408_v19 = vsel %vm2055_vm7, %v2056_v0, %v2054_v32 }
 0x5e5   : > { %v2241_v6 = vmul.f32 %v2225_v18, %v6028_v16  ;;  %vm2130_vm11 = vcmp.eq.f32.partialorder %v5279_v21, inf  ;;  %v2287_v51 = vsel %vm6029_vm8, %v4381_v37, %v2191_v26  ;;  %4017 = vrsqrt.f32 %v5403_v4  ;;  %v4008_v33 = vpop.eup %4007 }
 0x5e6   : > { %v2122_v50 = vmul.f32 %v4002_v48, %v5216_v49  ;;  %v2272_v12 = vmul.f32 %v4006_v22, %v1806_v45  ;;  %v5416_v30 = vsel %vm2298_vm5, %v2287_v51, %v2271_v36  ;;  %v6030_v42 = vmax.f32 %v5094_v61, 1e-08  ;;  %v4010_v0 = vpop.eup %4009  ;;  %v5431_v9 = vpop.xlane.xlu1 %1634 }
 0x5e7   : > { %v2031_v18 = vmul.f32 %v4008_v33, %v5304_v1  ;;  %3666 = vmatmul.mubr.msk.f32.gmra.mxu1 %vm2323_vm15, %v5416_v30  ;;  %v2288_v37 = vsel %vm6031_vm14, %v4393_v43, %v2192_v10  ;;  %4019 = vrcp.f32 %v2241_v6  ;;  %v6032_v60 = vmax.f32 %v4982_v46, 1e-08 }
 0x5e8   : > { %v2244_v23 = vmul.f32 %v2228_v38, %v6030_v42  ;;  %vm2032_vm4 = vcmp.eq.f32.partialorder %v5304_v1, inf  ;;  %v2035_v61 = vand.u32 2147483648, %v5304_v1  ;;  %v5434_v7 = vsel %vm2298_vm5, %v2288_v37, %v2272_v12  ;;  %v4012_v46 = vpop.eup %4011 }
 0x5e9   : > { %v2243_v55 = vmul.f32 %v2227_v27, %v6032_v60  ;;  %v2233_v17 = vmax.f32 %v5408_v19, 1e-08  ;;  %vm2125_vm6 = vcmp.eq.f32.partialorder %v5216_v49, 0.0  ;;  %v2033_v43 = vsel %vm2032_vm4, %v5304_v1, %v2031_v18  ;;  %3668 = vmatprep.mubr.msk.f32.mxu1 %vm2323_vm15, %v5434_v7  ;;  %v1812_v19 = vpop.xlane.xlu0 %1811 }
 0x5ea   : > { %4021 = vrcp.f32 %v2244_v23  ;;  %vm2034_vm12 = vcmp.eq.f32.partialorder %v5304_v1, 0.0  ;;  %v2124_v63 = vsel %vm2123_vm3, %v5216_v49, %v2122_v50  ;;  %v2129_v27 = vmul.f32 %v4010_v0, %v5279_v21  ;;  %v5456_v32 = vpop.xlane.xlu1 %1640 }
 0x5eb   : > { %4023 = vrsqrt.f32 %v5431_v9  ;;  %v2036_v54 = vsel %vm2034_vm12, %v2035_v61, %v2033_v43  ;;  %v6033_v35 = vmax.f32 %v5000_v24, 1e-08  ;;  %v2045_v48 = vmul.f32 %v4012_v46, %v5335_v31  ;;  %v6040_v46 = vld [vmem:[#allocation25_spill] sm:$0xff] }
 0x5ec   : > { %v2230_v26 = vmax.f32 %v2036_v54, 1e-08  ;;  %4025 = vrcp.f32 %v2243_v55  ;;  %v2110_v1 = vsel %vm2109_vm13, %v5156_v56, %v2108_v52  ;;  %vm2046_vm7 = vcmp.eq.f32.partialorder %v5335_v31, inf }
 0x5ed   : > { %v2245_v15 = vmul.f32 %v2229_v58, %v6033_v35  ;;  %vm2048_vm9 = vcmp.eq.f32.partialorder %v5335_v31, 0.0  ;;  %v2049_v25 = vand.u32 2147483648, %v5335_v31  ;;  %vm2111_vm1 = vcmp.eq.f32.partialorder %v5156_v56, 0.0  ;;  %v4014_v10 = vpop.eup %4013 }
 0x5ee   : > { %v2047_v24 = vsel %vm2046_vm7, %v5335_v31, %v2045_v48  ;;  %v6034_v39 = vmax.f32 %v5114_v5, 1e-08  ;;  %4027 = vrsqrt.f32 %v5456_v32  ;;  %v6035_v58 = vand.u32 2147483648, %v5143_v62  ;;  %v5479_v45 = vpop.xlane.xlu1 %1637 }
 0x5ef   : > { %v2131_v16 = vsel %vm2130_vm11, %v5279_v21, %v2129_v27  ;;  %v2050_v6 = vsel %vm2048_vm9, %v2049_v25, %v2047_v24  ;;  %v2113_v52 = vsel %vm2111_vm1, %v2112_v2, %v2110_v1  ;;  %4029 = vrcp.f32 %v2245_v15  ;;  %vm6039_vm11 = vmmov %vm6029_vm8  ;;  %v6041_v27 = vld [vmem:[#allocation29_spill] sm:$0xff] }
 0x5f0   : > { %v2246_v40 = vmul.f32 %v2230_v26, %v6034_v39  ;;  %v2120_v38 = vsel %vm2118_vm0, %v6035_v58, %v2117_v57  ;;  %v2232_v31 = vmax.f32 %v2050_v6, 1e-08  ;;  %v2136_v5 = vmul.f32 %v4014_v10, %v5363_v28 }
 0x5f1   : > { %v6036_v36 = vmax.f32 %v5043_v14, 1e-08  ;;  %v2126_v62 = vand.u32 2147483648, %v5216_v49  ;;  %vm2132_vm2 = vcmp.eq.f32.partialorder %v5279_v21, 0.0  ;;  %v2133_v57 = vand.u32 2147483648, %v5279_v21  ;;  %v4016_v56 = vpop.eup %4015 }
 0x5f2   : > { %4031 = vrcp.f32 %v2246_v40  ;;  %vm2137_vm3 = vcmp.eq.f32.partialorder %v5363_v28, inf  ;;  %vm2139_vm10 = vcmp.eq.f32.partialorder %v5363_v28, 0.0  ;;  %v6037_v2 = vmax.f32 %v5134_v29, 1e-08  ;;  %v6042_v40 = vld [vmem:[#allocation2_spill] sm:$0xff] }
 0x5f3   : > { %v2247_v22 = vmul.f32 %v2231_v8, %v6036_v36  ;;  %4033 = vrsqrt.f32 %v5479_v45  ;;  %v2193_v14 = vmul.f32 %v4941_v59, %v2113_v52  ;;  %v4018_v8 = vpop.eup %4017  ;;  %v2140_v33 = vand.u32 2147483648, %v5363_v28  ;;  %v6046_v36 = vld [vmem:[#allocation4_spill] sm:$0xff] }
 0x5f4   : > { %v2248_v51 = vmul.f32 %v2232_v31, %v6037_v2  ;;  %v2194_v21 = vmul.f32 %v4959_v53, %v2120_v38  ;;  %v2127_v50 = vsel %vm2125_vm6, %v2126_v62, %v2124_v63  ;;  %v2134_v12 = vsel %vm2132_vm2, %v2133_v57, %v2131_v16  ;;  %v4020_v18 = vpop.eup %4019  ;;  %v1809_v53 = vpop.xlane.xlu1 %1808  ;;  %vm6043_vm6 = vmmov %vm6029_vm8  ;;  %v6044_v38 = vld [vmem:[#allocation26_spill] sm:$0xff] }
 0x5f5   : > { %v2138_v42 = vsel %vm2137_vm3, %v5363_v28, %v2136_v5  ;;  %v2143_v23 = vmul.f32 %v4018_v8, %v5403_v4  ;;  %4035 = vrcp.f32 %v2247_v22  ;;  %v6038_v29 = vmax.f32 %v5055_v11, 1e-08  ;;  %v1818_v11 = vpop.xlane.xlu0 %1817  ;;  %v6045_v16 = vld [vmem:[#allocation30_spill] sm:$0xff]  ;;  %vm6047_vm12 = vmmov %vm6043_vm6 }
 0x5f6   : > { %v2274_v37 = vmul.f32 %v4016_v56, %v1812_v19  ;;  %vm2144_vm13 = vcmp.eq.f32.partialorder %v5403_v4, inf  ;;  %vm2146_vm0 = vcmp.eq.f32.partialorder %v5403_v4, 0.0  ;;  %4037 = vrcp.f32 %v2248_v51  ;;  %vm6049_vm1 = vmmov %vm6043_vm6 }
 0x5f7   : > { %v2249_v0 = vmul.f32 %v2233_v17, %v6038_v29  ;;  %v4022_v59 = vpop.eup %4021  ;;  %v2145_v49 = vsel %vm2144_vm13, %v5403_v4, %v2143_v23  ;;  %v2147_v60 = vand.u32 2147483648, %v5403_v4  ;;  %v2273_v55 = vmul.f32 %v4020_v18, %v1809_v53  ;;  %vm6051_vm2 = vmmov %vm6049_vm1  ;;  %v6052_v23 = vld [vmem:[#allocation27_spill] sm:$0xff] }
 0x5f8   : > { %v2289_v61 = vsel %vm6039_vm11, %v4391_v41, %v2193_v14  ;;  %v4024_v43 = vpop.eup %4023  ;;  %v2290_v17 = vsel %vm6029_vm8, %v4401_v47, %v2194_v21  ;;  %v2195_v63 = vmul.f32 %v6040_v46, %v2127_v50  ;;  %v2196_v54 = vmul.f32 %v6041_v27, %v2134_v12  ;;  %v1815_v47 = vpop.xlane.xlu1 %1814  ;;  %v6048_v21 = vld [vmem:[#allocation3_spill] sm:$0xff]  ;;  %v6050_v12 = vld [vmem:[#allocation6_spill] sm:$0xff]  ;;  %vm6054_vm13 = vmmov %vm6049_vm1 }
 0x5f9   : > { %v2141_v35 = vsel %vm2139_vm10, %v2140_v33, %v2138_v42  ;;  %v2150_v15 = vmul.f32 %v4024_v43, %v5431_v9  ;;  %v5508_v26 = vsel %vm2298_vm5, %v2289_v61, %v2273_v55  ;;  %v2148_v41 = vsel %vm2146_vm0, %v2147_v60, %v2145_v49  ;;  %v4026_v48 = vpop.eup %4025  ;;  %v1824_v19 = vpop.xlane.xlu0 %1823  ;;  %v6053_v43 = vld [vmem:[#allocation5_spill] sm:$0xff]  ;;  %v6055_v46 = vld [vmem:[#allocation28_spill] sm:$0xff]  ;;  %vm6058_vm0 = vmmov %vm6049_vm1 }
 0x5fa   : > { %4039 = vrcp.f32 %v2249_v0  ;;  %v2276_v1 = vmul.f32 %v4022_v59, %v1818_v11  ;;  %vm2151_vm14 = vcmp.eq.f32.partialorder %v5431_v9, inf  ;;  %3669 = vmatmul.mubr.msk.f32.gmra.mxu1 %vm2323_vm15, %v5508_v26  ;;  %v5516_v28 = vsel %vm2298_vm5, %v2290_v17, %v2274_v37  ;;  %vm6060_vm11 = vmmov %vm6058_vm0 }
 0x5fb   : > { %v2152_v25 = vsel %vm2151_vm14, %v5431_v9, %v2150_v15  ;;  %v2154_v24 = vand.u32 2147483648, %v5431_v9  ;;  %v2275_v39 = vmul.f32 %v4026_v48, %v1815_v47  ;;  %3671 = vmatprep.mubr.msk.f32.mxu1 %vm2323_vm15, %v5516_v28  ;;  %v4028_v4 = vpop.eup %4027  ;;  %vm2153_vm4 = vcmp.eq.f32.partialorder %v5431_v9, 0.0  ;;  %v6057_v47 = vld [vmem:[#allocation8_spill] sm:$0xff] }
 0x5fc   : > { %v2291_v58 = vsel %vm6043_vm6, %v6042_v40, %v2195_v63  ;;  %v2197_v10 = vmul.f32 %v6044_v38, %v2141_v35  ;;  %v2198_v6 = vmul.f32 %v6045_v16, %v2148_v41  ;;  %v4030_v52 = vpop.eup %4029  ;;  %v2164_v31 = vmul.f32 %v4028_v4, %v5456_v32  ;;  %v1821_v9 = vpop.xlane.xlu1 %1820  ;;  %v6056_v35 = vld [vmem:[#allocation31_spill] sm:$0xff]  ;;  %v3322_v38 = vld [vmem:[%s5929_s1 + $0xe0] sm:$0xff] }
 0x5fd   : > { %v5529_v5 = vsel %vm2298_vm5, %v2291_v58, %v2275_v39  ;;  %v2292_v22 = vsel %vm6047_vm12, %v6046_v36, %v2196_v54  ;;  %v2155_v62 = vsel %vm2153_vm4, %v2154_v24, %v2152_v25  ;;  %vm2165_vm7 = vcmp.eq.f32.partialorder %v5456_v32, inf  ;;  %v1830_v27 = vpop.xlane.xlu0 %1829  ;;  %v6059_v39 = vld [vmem:[#allocation7_spill] sm:$0xff] }
 0x5fe   : > { %3672 = vmatmul.mubr.msk.f32.gmra.mxu1 %vm2323_vm15, %v5529_v5  ;;  %v5537_v56 = vsel %vm2298_vm5, %v2292_v22, %v2276_v1  ;;  %v2166_v51 = vsel %vm2165_vm7, %v5456_v32, %v2164_v31  ;;  %v2168_v14 = vand.u32 2147483648, %v5456_v32  ;;  %v2277_v8 = vmul.f32 %v4030_v52, %v1821_v9  ;;  %v3323_v58 = vld [vmem:[%s5929_s1 + $0xe8] sm:$0xff] }
 0x5ff   : > { %v4032_v57 = vpop.eup %4031  ;;  %3674 = vmatprep.mubr.msk.f32.mxu1 %vm2323_vm15, %v5537_v56  ;;  %vm2167_vm9 = vcmp.eq.f32.partialorder %v5456_v32, 0.0  ;;  %v2293_v50 = vsel %vm6049_vm1, %v6048_v21, %v2197_v10  ;;  %v2294_v42 = vsel %vm6051_vm2, %v6050_v12, %v2198_v6  ;;  %v2199_v29 = vmul.f32 %v6052_v23, %v2155_v62  ;;  %3683 = vmatprep.subr.mxu0 %v3323_v58  ;;  %v3304_v10 = vld [vmem:[%s5930_s2 + $0x6] ss:$0 sm:$0xff] }
 0x600   : > { %v2278_v2 = vmul.f32 %v4032_v57, %v1824_v19  ;;  %v4034_v33 = vpop.eup %4033  ;;  %v5551_v18 = vsel %vm2298_vm5, %v2293_v50, %v2277_v8  ;;  %v2169_v53 = vsel %vm2167_vm9, %v2168_v14, %v2166_v51  ;;  %vm2158_vm3 = vcmp.eq.f32.partialorder %v5479_v45, inf  ;;  %v1827_v49 = vpop.xlane.xlu1 %1826  ;;  %3684 = vmatpush3.msra.mxu0 %v3323_v58 }
 0x601   : > { %v2157_v0 = vmul.f32 %v4034_v33, %v5479_v45  ;;  %v2161_v32 = vand.u32 2147483648, %v5479_v45  ;;  %vm2160_vm10 = vcmp.eq.f32.partialorder %v5479_v45, 0.0  ;;  %v2295_v11 = vsel %vm6054_vm13, %v6053_v43, %v2199_v29  ;;  %3685 = vmatprep.subr.mxu0 %v3322_v38 }
 0x602   : > { %v5554_v37 = vsel %vm2298_vm5, %v2294_v42, %v2278_v2  ;;  %v4036_v59 = vpop.eup %4035  ;;  %3675 = vmatmul.mubr.msk.f32.gmra.mxu1 %vm2323_vm15, %v5551_v18  ;;  %v2201_v63 = vmul.f32 %v6055_v46, %v2169_v53  ;;  %3686 = vmatpush3.msra.mxu0 %v3322_v38 }
 0x603   : > { %v4038_v60 = vpop.eup %4037  ;;  %v2159_v55 = vsel %vm2158_vm3, %v5479_v45, %v2157_v0  ;;  %v2279_v61 = vmul.f32 %v4036_v59, %v1827_v49  ;;  %3677 = vmatprep.mubr.msk.f32.mxu1 %vm2323_vm15, %v5554_v37 }
 0x604   : > { %v2162_v17 = vsel %vm2160_vm10, %v2161_v32, %v2159_v55  ;;  %v2280_v48 = vmul.f32 %v4038_v60, %v1830_v27  ;;  %v1833_v1 = vpop.xlane.xlu1 %1832  ;;  %v2297_v4 = vsel %vm6060_vm11, %v6059_v39, %v2201_v63 }
 0x605   : > { %v5568_v54 = vsel %vm2298_vm5, %v2295_v11, %v2279_v61  ;;  %v2200_v15 = vmul.f32 %v6056_v35, %v2162_v17 }
 0x606   : > { %3678 = vmatmul.mubr.msk.f32.gmra.mxu1 %vm2323_vm15, %v5568_v54 }
 0x607   : > { %v4040_v41 = vpop.eup %4039  ;;  %v2296_v25 = vsel %vm6058_vm0, %v6057_v47, %v2200_v15 }
 0x608   : > { %v2281_v45 = vmul.f32 %v4040_v41, %v1833_v1  ;;  %v5576_v24 = vsel %vm2298_vm5, %v2296_v25, %v2280_v48 }
 0x609   : > { %3680 = vmatprep.mubr.msk.f32.mxu1 %vm2323_vm15, %v5576_v24 }
 0x60a   : > { %v5583_v40 = vsel %vm2298_vm5, %v2297_v4, %v2281_v45  ;;  %vm6061_vm5 = vcmask 130048  }
 0x60b   : > { %3681 = vmatmul.mubr.msk.f32.gmra.mxu1 %vm2323_vm15, %v5583_v40  ;;  %vm6062_vm8 = vmmov %vm6061_vm5 }
 0x60c   : > { %vm6063_vm14 = vmmov %vm6061_vm5 }
 0x60d   : > { %vm6064_vm4 = vmmov %vm6061_vm5 }
 0x60e   : > { %vm6065_vm6 = vmmov %vm6064_vm4 }
 0x60f   : > { %vm6066_vm12 = vmmov %vm6064_vm4 }
 0x610   : > { %vm6067_vm7 = vmmov %vm6064_vm4 }
 0x611   : > { %vm6068_vm9 = vmmov %vm6064_vm4 }
 0x612   : > { %vm6069_vm1 = vmmov %vm6064_vm4 }
 0x613   : > { %vm6070_vm2 = vmmov %vm6069_vm1 }
 0x614   : > { %vm6071_vm3 = vmmov %vm6069_vm1 }
 0x615   : > { %vm6072_vm10 = vmmov %vm6069_vm1 }
 0x616   : > { %vm6073_vm13 = vmmov %vm6069_vm1 }
 0x617   : > { %vm6074_vm0 = vmmov %vm6069_vm1 }
 0x618   : > { %vm6075_vm11 = vmmov %vm6074_vm0 }
 0x686   : > { %v3661_v16 = vpop.f32.mrf.mxu1 }
 0x687   : > { %v2448_v6 = vadd.f32 %v3661_v16, %v3304_v10  ;;  %v3324_v16 = vld [vmem:[%s5930_s2 + $0x7] ss:$0 sm:$0xff] }
 0x688   : > { %v2442_v52 = vpop.f32.mrf.mxu1 }
 0x689   : > { %v2443_v31 = vadd.f32 %v3304_v10, %v2442_v52 }
 0x68b   : > { %4041 = vtanh.f32 %v2443_v31 }
 0x68c   : > { %4043 = vtanh.f32 %v2448_v6 }
 0x698   : > { %v4042_v36 = vpop.eup %4041 }
 0x699   : > { %v4044_v22 = vpop.eup %4043  ;;  %3687 = vmatprep.mubr.msk.f32.mxu0 %vm6061_vm5, %v4042_v36  ;;  %vm6076_vm5 = vmmov %vm6074_vm0 }
 0x69a   : > { %3688 = vmatmul.mubr.msk.f32.vlgmr.msra.gmra.mxu0 %vm6062_vm8, %v4044_v22  ;;  %vm6077_vm8 = vcmask 162816  }
 0x69b   : > { %v3664_v62 = vpop.f32.mrf.mxu1 }
 0x69c   : > { %v2458_v57 = vadd.f32 %v3664_v62, %v3304_v10 }
 0x69d   : > { %v2452_v19 = vpop.f32.mrf.mxu1 }
 0x69e   : > { %v2453_v9 = vadd.f32 %v3304_v10, %v2452_v19 }
 0x6a0   : > { %4045 = vtanh.f32 %v2453_v9 }
 0x6a1   : > { %4047 = vtanh.f32 %v2458_v57 }
 0x6a7   : > { %v3667_v2 = vpop.f32.mrf.mxu1 }
 0x6a8   : > { %v2468_v51 = vadd.f32 %v3667_v2, %v3304_v10 }
 0x6a9   : > { %v2462_v14 = vpop.f32.mrf.mxu1 }
 0x6aa   : > { %v2463_v8 = vadd.f32 %v3304_v10, %v2462_v14 }
 0x6ac   : > { %4049 = vtanh.f32 %v2463_v8 }
 0x6ad   : > { %4051 = vtanh.f32 %v2468_v51  ;;  %v4046_v33 = vpop.eup %4045 }
 0x6ae   : > { %v4048_v21 = vpop.eup %4047  ;;  %3690 = vmatprep.mubr.msk.f32.mxu0 %vm6063_vm14, %v4046_v33  ;;  %vm6078_vm14 = vmmov %vm6077_vm8 }
 0x6af   : > { %3691 = vmatmul.mubr.msk.f32.gmra.mxu0 %vm6064_vm4, %v4048_v21  ;;  %vm6079_vm4 = vmmov %vm6077_vm8 }
 0x6b9   : > { %v4050_v12 = vpop.eup %4049 }
 0x6ba   : > { %v3670_v50 = vpop.f32.mrf.mxu1  ;;  %v4052_v42 = vpop.eup %4051  ;;  %3693 = vmatprep.mubr.msk.f32.mxu0 %vm6065_vm6, %v4050_v12  ;;  %vm6080_vm6 = vmmov %vm6079_vm4 }
 0x6bb   : > { %v2478_v23 = vadd.f32 %v3670_v50, %v3304_v10  ;;  %3694 = vmatmul.mubr.msk.f32.gmra.mxu0 %vm6066_vm12, %v4052_v42  ;;  %vm6081_vm12 = vmmov %vm6079_vm4 }
 0x6bc   : > { %v2472_v29 = vpop.f32.mrf.mxu1 }
 0x6bd   : > { %v2473_v0 = vadd.f32 %v3304_v10, %v2472_v29 }
 0x6be   : > { %v3673_v53 = vpop.f32.mrf.mxu1 }
 0x6bf   : > { %4053 = vtanh.f32 %v2473_v0  ;;  %v2488_v59 = vadd.f32 %v3673_v53, %v3304_v10 }
 0x6c0   : > { %4055 = vtanh.f32 %v2478_v23  ;;  %v2482_v32 = vpop.f32.mrf.mxu1 }
 0x6c1   : > { %v2483_v49 = vadd.f32 %v3304_v10, %v2482_v32 }
 0x6c2   : > { %v3676_v60 = vpop.f32.mrf.mxu1 }
 0x6c3   : > { %4057 = vtanh.f32 %v2483_v49  ;;  %v2498_v55 = vadd.f32 %v3676_v60, %v3304_v10 }
 0x6c4   : > { %4059 = vtanh.f32 %v2488_v59  ;;  %v2492_v61 = vpop.f32.mrf.mxu1 }
 0x6c5   : > { %v2493_v43 = vadd.f32 %v3304_v10, %v2492_v61 }
 0x6c6   : > { %v3679_v11 = vpop.f32.mrf.mxu1 }
 0x6c7   : > { %4061 = vtanh.f32 %v2493_v43  ;;  %v2508_v17 = vadd.f32 %v3679_v11, %v3304_v10 }
 0x6c8   : > { %4063 = vtanh.f32 %v2498_v55  ;;  %v2502_v46 = vpop.f32.mrf.mxu1 }
 0x6c9   : > { %v2503_v63 = vadd.f32 %v3304_v10, %v2502_v46 }
 0x6cb   : > { %v3682_v27 = vpop.f32.mrf.mxu1  ;;  %4065 = vtanh.f32 %v2503_v63 }
 0x6cc   : > { %v4054_v35 = vpop.eup %4053  ;;  %4067 = vtanh.f32 %v2508_v17  ;;  %v2518_v15 = vadd.f32 %v3682_v27, %v3304_v10 }
 0x6cd   : > { %v2512_v41 = vpop.f32.mrf.mxu1  ;;  %v4056_v48 = vpop.eup %4055  ;;  %3696 = vmatprep.mubr.msk.f32.mxu0 %vm6067_vm7, %v4054_v35  ;;  %vm6082_vm7 = vmmov %vm6079_vm4 }
 0x6ce   : > { %v2513_v1 = vadd.f32 %v3304_v10, %v2512_v41  ;;  %3697 = vmatmul.mubr.msk.f32.gmra.mxu0 %vm6068_vm9, %v4056_v48  ;;  %vm6083_vm9 = vmmov %vm6079_vm4 }
 0x6d0   : > { %4069 = vtanh.f32 %v2513_v1  ;;  %v4058_v45 = vpop.eup %4057 }
 0x6d1   : > { %4071 = vtanh.f32 %v2518_v15  ;;  %v4060_v47 = vpop.eup %4059  ;;  %3699 = vmatprep.mubr.msk.f32.mxu0 %vm6069_vm1, %v4058_v45  ;;  %vm6084_vm1 = vmmov %vm6079_vm4 }
 0x6d2   : > { %3700 = vmatmul.mubr.msk.f32.gmra.mxu0 %vm6070_vm2, %v4060_v47  ;;  %vm6085_vm2 = vmmov %vm6084_vm1 }
 0x6d4   : > { %v4062_v25 = vpop.eup %4061 }
 0x6d5   : > { %v4064_v39 = vpop.eup %4063  ;;  %3702 = vmatprep.mubr.msk.f32.mxu0 %vm6071_vm3, %v4062_v25  ;;  %vm6086_vm3 = vmmov %vm6084_vm1 }
 0x6d6   : > { %3703 = vmatmul.mubr.msk.f32.gmra.mxu0 %vm6072_vm10, %v4064_v39  ;;  %vm6087_vm10 = vmmov %vm6084_vm1 }
 0x6d8   : > { %v4066_v4 = vpop.eup %4065 }
 0x6d9   : > { %v4068_v58 = vpop.eup %4067  ;;  %3705 = vmatprep.mubr.msk.f32.mxu0 %vm6073_vm13, %v4066_v4  ;;  %vm6088_vm13 = vmmov %vm6084_vm1 }
 0x6da   : > { %3706 = vmatmul.mubr.msk.f32.gmra.mxu0 %vm6074_vm0, %v4068_v58  ;;  %vm6089_vm0 = vmmov %vm6084_vm1 }
 0x6dd   : > { %v4070_v38 = vpop.eup %4069 }
 0x6de   : > { %v4072_v10 = vpop.eup %4071  ;;  %3708 = vmatprep.mubr.msk.f32.mxu0 %vm6075_vm11, %v4070_v38  ;;  %vm6090_vm11 = vmmov %vm6089_vm0 }
 0x6df   : > { %3709 = vmatmul.mubr.msk.f32.gmra.mxu0 %vm6076_vm5, %v4072_v10  ;;  %vm6091_vm5 = vmmov %vm6089_vm0 }
 0x75a   : > { %v3689_v6 = vpop.f32.mrf.mxu0 }
 0x75b   : > { %v5615_v52 = vadd.f32 %v3689_v6, %v3324_v16 }
 0x75c   : > { %v2659_v31 = vpop.f32.mrf.mxu0 }
 0x75d   : > { %v5617_v36 = vadd.f32 %v3324_v16, %v2659_v31  ;;  %v2741_v22 = vsel %vm6077_vm8, %v5615_v52, -inf  ;;  %vm6092_vm8 = vmmov %vm6089_vm0 }
 0x75e   : > { %2742 = vmax.xlane.f32.xlu1 %v2741_v22 }
 0x75f   : > { %v2738_v62 = vsel %vm6078_vm14, %v5617_v36, -inf  ;;  %vm6093_vm14 = vmmov %vm6089_vm0 }
 0x760   : > { %2739 = vmax.xlane.f32.xlu0 %v2738_v62 }
 0x76f   : > { %v3692_v57 = vpop.f32.mrf.mxu0 }
 0x770   : > { %v5623_v19 = vadd.f32 %v3692_v57, %v3324_v16 }
 0x771   : > { %v2669_v9 = vpop.f32.mrf.mxu0 }
 0x772   : > { %v5625_v2 = vadd.f32 %v3324_v16, %v2669_v9  ;;  %v2747_v51 = vsel %vm6079_vm4, %v5623_v19, -inf  ;;  %vm6094_vm4 = vmmov %vm6089_vm0 }
 0x773   : > { %2748 = vmax.xlane.f32.xlu1 %v2747_v51 }
 0x774   : > { %v2744_v14 = vsel %vm6080_vm6, %v5625_v2, -inf  ;;  %vm6095_vm6 = vmmov %vm6089_vm0 }
 0x775   : > { %2745 = vmax.xlane.f32.xlu0 %v2744_v14 }
 0x77b   : > { %v3695_v8 = vpop.f32.mrf.mxu0 }
 0x77c   : > { %v5631_v33 = vadd.f32 %v3695_v8, %v3324_v16 }
 0x77d   : > { %v2679_v21 = vpop.f32.mrf.mxu0 }
 0x77e   : > { %v5633_v50 = vadd.f32 %v3324_v16, %v2679_v21  ;;  %v2753_v12 = vsel %vm6081_vm12, %v5631_v33, -inf  ;;  %vm6096_vm12 = vmmov %vm6089_vm0 }
 0x77f   : > { %2754 = vmax.xlane.f32.xlu1 %v2753_v12 }
 0x780   : > { %v2750_v42 = vsel %vm6082_vm7, %v5633_v50, -inf  ;;  %vm6097_vm7 = vmmov %vm6089_vm0 }
 0x781   : > { %2751 = vmax.xlane.f32.xlu0 %v2750_v42 }
 0x78e   : > { %v3698_v23 = vpop.f32.mrf.mxu0 }
 0x78f   : > { %v5639_v29 = vadd.f32 %v3698_v23, %v3324_v16 }
 0x790   : > { %v2689_v0 = vpop.f32.mrf.mxu0 }
 0x791   : > { %v5641_v53 = vadd.f32 %v3324_v16, %v2689_v0  ;;  %v2759_v59 = vsel %vm6083_vm9, %v5639_v29, -inf  ;;  %vm6098_vm9 = vmmov %vm6089_vm0 }
 0x792   : > { %2760 = vmax.xlane.f32.xlu1 %v2759_v59  ;;  %v3701_v32 = vpop.f32.mrf.mxu0 }
 0x793   : > { %v5645_v49 = vadd.f32 %v3701_v32, %v3324_v16  ;;  %v2756_v60 = vsel %vm6084_vm1, %v5641_v53, -inf  ;;  %vm6099_vm1 = vmmov %vm6089_vm0 }
 0x794   : > { %2757 = vmax.xlane.f32.xlu0 %v2756_v60  ;;  %v2699_v55 = vpop.f32.mrf.mxu0 }
 0x795   : > { %v5649_v61 = vadd.f32 %v3324_v16, %v2699_v55  ;;  %v2765_v43 = vsel %vm6085_vm2, %v5645_v49, -inf  ;;  %vm6100_vm2 = vmmov %vm6089_vm0 }
 0x796   : > { %2766 = vmax.xlane.f32.xlu1 %v2765_v43  ;;  %v3704_v11 = vpop.f32.mrf.mxu0 }
 0x797   : > { %v5653_v17 = vadd.f32 %v3704_v11, %v3324_v16  ;;  %v2762_v46 = vsel %vm6086_vm3, %v5649_v61, -inf  ;;  %vm6101_vm3 = vmmov %vm6089_vm0 }
 0x798   : > { %2763 = vmax.xlane.f32.xlu0 %v2762_v46  ;;  %v2709_v63 = vpop.f32.mrf.mxu0 }
 0x799   : > { %v5657_v27 = vadd.f32 %v3324_v16, %v2709_v63  ;;  %v2771_v35 = vsel %vm6087_vm10, %v5653_v17, -inf  ;;  %vm6102_vm10 = vmmov %vm6089_vm0 }
 0x79a   : > { %2772 = vmax.xlane.f32.xlu1 %v2771_v35  ;;  %v3707_v15 = vpop.f32.mrf.mxu0 }
 0x79b   : > { %v5661_v41 = vadd.f32 %v3707_v15, %v3324_v16  ;;  %v2768_v48 = vsel %vm6088_vm13, %v5657_v27, -inf  ;;  %vm6103_vm13 = vmmov %vm6089_vm0 }
 0x79c   : > { %2769 = vmax.xlane.f32.xlu0 %v2768_v48  ;;  %v2719_v1 = vpop.f32.mrf.mxu0 }
 0x79d   : > { %v5665_v45 = vadd.f32 %v3324_v16, %v2719_v1  ;;  %v2777_v47 = vsel %vm6089_vm0, %v5661_v41, -inf }
 0x79e   : > { %2778 = vmax.xlane.f32.xlu1 %v2777_v47 }
 0x79f   : > { %v3710_v25 = vpop.f32.mrf.mxu0  ;;  %v2774_v4 = vsel %vm6090_vm11, %v5665_v45, -inf  ;;  %vm6104_vm11 = vmmov %vm6089_vm0 }
 0x7a0   : > { %v5669_v39 = vadd.f32 %v3710_v25, %v3324_v16  ;;  %2775 = vmax.xlane.f32.xlu0 %v2774_v4 }
 0x7a1   : > { %v2729_v58 = vpop.f32.mrf.mxu0 }
 0x7a2   : > { %v5673_v38 = vadd.f32 %v3324_v16, %v2729_v58  ;;  %v2783_v10 = vsel %vm6091_vm5, %v5669_v39, -inf  ;;  %vm6105_vm5 = vmmov %vm6089_vm0 }
 0x7a3   : > { %2784 = vmax.xlane.f32.xlu1 %v2783_v10 }
 0x7a4   : > { %v2780_v6 = vsel %vm6092_vm8, %v5673_v38, -inf  ;;  %vm6106_vm8 = vmmov %vm6089_vm0 }
 0x7a5   : > { %2781 = vmax.xlane.f32.xlu0 %v2780_v6 }
 0x7e7   : > { %v2743_v31 = vpop.xlane.xlu1 %2742 }
 0x7e8   : > { %v2787_v22 = vsub.f32 %v5615_v52, %v2743_v31 }
 0x7e9   : > { %v2740_v62 = vpop.xlane.xlu0 %2739 }
 0x7ea   : > { %v2804_v57 = vmul.f32 1.442695, %v2787_v22  ;;  %v2786_v9 = vsub.f32 %v5617_v36, %v2740_v62 }
 0x7ec   : > { %4073 = vpow2.f32 %v2804_v57  ;;  %v2802_v51 = vmul.f32 1.442695, %v2786_v9 }
 0x7ee   : > { %4075 = vpow2.f32 %v2802_v51 }
 0x7f9   : > { %v5681_v16 = vpop.eup %4073 }
 0x7fa   : > { %v2837_v8 = vsel %vm6093_vm14, %v5681_v16, 0.0  ;;  %vm6107_vm14 = vmmov %vm6089_vm0 }
 0x7fb   : > { %v5685_v21 = vpop.eup %4075  ;;  %2838 = vadd.xlane.f32.xlu1 %v2837_v8 }
 0x7fc   : > { %v2749_v14 = vpop.xlane.xlu1 %2748  ;;  %v2834_v52 = vsel %vm6094_vm4, %v5685_v21, 0.0  ;;  %vm3058_vm4 = vcmask 244736  }
 0x7fd   : > { %v2789_v12 = vsub.f32 %v5623_v19, %v2749_v14  ;;  %2835 = vadd.xlane.f32.xlu0 %v2834_v52 }
 0x7fe   : > { %v2746_v42 = vpop.xlane.xlu0 %2745 }
 0x7ff   : > { %v2808_v23 = vmul.f32 1.442695, %v2789_v12  ;;  %v2788_v36 = vsub.f32 %v5625_v2, %v2746_v42 }
 0x801   : > { %4077 = vpow2.f32 %v2808_v23  ;;  %v2806_v0 = vmul.f32 1.442695, %v2788_v36 }
 0x803   : > { %4079 = vpow2.f32 %v2806_v0 }
 0x808   : > { %v2755_v59 = vpop.xlane.xlu1 %2754 }
 0x809   : > { %v2791_v32 = vsub.f32 %v5631_v33, %v2755_v59 }
 0x80a   : > { %v2752_v60 = vpop.xlane.xlu0 %2751 }
 0x80b   : > { %v2812_v55 = vmul.f32 1.442695, %v2791_v32  ;;  %v2790_v43 = vsub.f32 %v5633_v50, %v2752_v60 }
 0x80d   : > { %4081 = vpow2.f32 %v2812_v55  ;;  %v2810_v19 = vmul.f32 1.442695, %v2790_v43 }
 0x80e   : > { %v5693_v11 = vpop.eup %4077 }
 0x80f   : > { %4083 = vpow2.f32 %v2810_v19  ;;  %v2843_v46 = vsel %vm6095_vm6, %v5693_v11, 0.0  ;;  %vm3075_vm6 = vcmask 408576  }
 0x810   : > { %v5697_v2 = vpop.eup %4079  ;;  %2844 = vadd.xlane.f32.xlu1 %v2843_v46 }
 0x811   : > { %v2840_v63 = vsel %vm6096_vm12, %v5697_v2, 0.0  ;;  %vm3092_vm12 = vcmask 523264  }
 0x812   : > { %2841 = vadd.xlane.f32.xlu0 %v2840_v63 }
 0x81a   : > { %v5701_v35 = vpop.eup %4081 }
 0x81b   : > { %v2761_v33 = vpop.xlane.xlu1 %2760  ;;  %v2849_v15 = vsel %vm6097_vm7, %v5701_v35, 0.0 }
 0x81c   : > { %v2793_v50 = vsub.f32 %v5639_v29, %v2761_v33  ;;  %v5706_v1 = vpop.eup %4083  ;;  %2850 = vadd.xlane.f32.xlu1 %v2849_v15 }
 0x81d   : > { %v2758_v48 = vpop.xlane.xlu0 %2757  ;;  %v2846_v4 = vsel %vm6098_vm9, %v5706_v1, 0.0 }
 0x81e   : > { %v2816_v47 = vmul.f32 1.442695, %v2793_v50  ;;  %v2792_v25 = vsub.f32 %v5641_v53, %v2758_v48  ;;  %2847 = vadd.xlane.f32.xlu0 %v2846_v4 }
 0x81f   : > { %v2767_v58 = vpop.xlane.xlu1 %2766 }
 0x820   : > { %4085 = vpow2.f32 %v2816_v47  ;;  %v2814_v10 = vmul.f32 1.442695, %v2792_v25  ;;  %v2795_v6 = vsub.f32 %v5645_v49, %v2767_v58 }
 0x821   : > { %v2764_v29 = vpop.xlane.xlu0 %2763 }
 0x822   : > { %4087 = vpow2.f32 %v2814_v10  ;;  %v2820_v31 = vmul.f32 1.442695, %v2795_v6  ;;  %v2794_v22 = vsub.f32 %v5649_v61, %v2764_v29  ;;  %v6108_v29 = vld [vmem:[#allocation9_spill] sm:$0xff] }
 0x823   : > { %v2773_v62 = vpop.xlane.xlu1 %2772 }
 0x824   : > { %4089 = vpow2.f32 %v2820_v31  ;;  %v2818_v57 = vmul.f32 1.442695, %v2794_v22  ;;  %v2797_v9 = vsub.f32 %v5653_v17, %v2773_v62  ;;  %v6109_v31 = vld [vmem:[#allocation12_spill] sm:$0xff]  ;;  %v6110_v22 = vld [vmem:[#allocation10_spill] sm:$0xff]  ;;  %v6111_v62 = vld [vmem:[#allocation11_spill] sm:$0xff] }
 0x825   : > { %v2770_v53 = vpop.xlane.xlu0 %2769 }
 0x826   : > { %4091 = vpow2.f32 %v2818_v57  ;;  %v2824_v51 = vmul.f32 1.442695, %v2797_v9  ;;  %v2796_v14 = vsub.f32 %v5657_v27, %v2770_v53  ;;  %v6112_v57 = vld [vmem:[#allocation13_spill] sm:$0xff]  ;;  %v6113_v9 = vld [vmem:[#allocation14_spill] sm:$0xff]  ;;  %v6114_v53 = vld [vmem:[#allocation16_spill] sm:$0xff] }
 0x827   : > { %v2779_v8 = vpop.xlane.xlu1 %2778 }
 0x828   : > { %4093 = vpow2.f32 %v2824_v51  ;;  %v2822_v12 = vmul.f32 1.442695, %v2796_v14  ;;  %v2799_v49 = vsub.f32 %v5661_v41, %v2779_v8  ;;  %v6115_v51 = vld [vmem:[#allocation17_spill] sm:$0xff]  ;;  %v6116_v14 = vld [vmem:[#allocation19_spill] sm:$0xff] }
 0x829   : > { %v2776_v42 = vpop.xlane.xlu0 %2775  ;;  %v6117_v8 = vld [vmem:[#allocation15_spill] sm:$0xff] }
 0x82a   : > { %4095 = vpow2.f32 %v2822_v12  ;;  %v2828_v52 = vmul.f32 1.442695, %v2799_v49  ;;  %v2798_v61 = vsub.f32 %v5665_v45, %v2776_v42  ;;  %v6118_v12 = vld [vmem:[#allocation22_spill] sm:$0xff]  ;;  %v6120_v42 = vld [vmem:[#allocation23_spill] sm:$0xff] }
 0x82b   : > { %v6119_v49 = vld [vmem:[#allocation18_spill] sm:$0xff] }
 0x82c   : > { %v2785_v23 = vpop.xlane.xlu1 %2784  ;;  %4097 = vpow2.f32 %v2828_v52  ;;  %v2826_v36 = vmul.f32 1.442695, %v2798_v61  ;;  %v6121_v52 = vld [vmem:[#allocation20_spill] sm:$0xff] }
 0x82d   : > { %v2801_v17 = vsub.f32 %v5669_v39, %v2785_v23  ;;  %v5718_v0 = vpop.eup %4085  ;;  %v6122_v61 = vld [vmem:[#allocation24_spill] sm:$0xff]  ;;  %v6123_v23 = vld [vmem:[#allocation21_spill] sm:$0xff] }
 0x82e   : > { %v2782_v59 = vpop.xlane.xlu0 %2781  ;;  %4099 = vpow2.f32 %v2826_v36  ;;  %v2855_v41 = vsel %vm6099_vm1, %v5718_v0, 0.0 }
 0x82f   : > { %v2832_v27 = vmul.f32 1.442695, %v2801_v17  ;;  %v2800_v32 = vsub.f32 %v5673_v38, %v2782_v59  ;;  %v5723_v60 = vpop.eup %4087  ;;  %2856 = vadd.xlane.f32.xlu1 %v2855_v41 }
 0x830   : > { %v2852_v55 = vsel %vm6100_vm2, %v5723_v60, 0.0 }
 0x831   : > { %4101 = vpow2.f32 %v2832_v27  ;;  %v2830_v45 = vmul.f32 1.442695, %v2800_v32  ;;  %v5727_v43 = vpop.eup %4089  ;;  %2853 = vadd.xlane.f32.xlu0 %v2852_v55 }
 0x832   : > { %v2861_v39 = vsel %vm6101_vm3, %v5727_v43, 0.0 }
 0x833   : > { %4103 = vpow2.f32 %v2830_v45  ;;  %v5731_v19 = vpop.eup %4091  ;;  %2862 = vadd.xlane.f32.xlu1 %v2861_v39 }
 0x834   : > { %v2858_v38 = vsel %vm6102_vm10, %v5731_v19, 0.0 }
 0x835   : > { %v5735_v46 = vpop.eup %4093  ;;  %2859 = vadd.xlane.f32.xlu0 %v2858_v38 }
 0x836   : > { %v2867_v63 = vsel %vm6103_vm13, %v5735_v46, 0.0 }
 0x837   : > { %v5739_v33 = vpop.eup %4095  ;;  %2868 = vadd.xlane.f32.xlu1 %v2867_v63 }
 0x838   : > { %v2864_v50 = vsel %vm6089_vm0, %v5739_v33, 0.0 }
 0x839   : > { %v5743_v15 = vpop.eup %4097  ;;  %2865 = vadd.xlane.f32.xlu0 %v2864_v50 }
 0x83a   : > { %v2873_v48 = vsel %vm6104_vm11, %v5743_v15, 0.0 }
 0x83b   : > { %v5747_v47 = vpop.eup %4099  ;;  %2874 = vadd.xlane.f32.xlu1 %v2873_v48 }
 0x83c   : > { %v2870_v25 = vsel %vm6105_vm5, %v5747_v47, 0.0 }
 0x83d   : > { %2871 = vadd.xlane.f32.xlu0 %v2870_v25 }
 0x83e   : > { %v5751_v4 = vpop.eup %4101 }
 0x83f   : > { %v2879_v58 = vsel %vm6106_vm8, %v5751_v4, 0.0 }
 0x840   : > { %v5755_v10 = vpop.eup %4103  ;;  %2880 = vadd.xlane.f32.xlu1 %v2879_v58 }
 0x841   : > { %v2876_v6 = vsel %vm6107_vm14, %v5755_v10, 0.0 }
 0x842   : > { %2877 = vadd.xlane.f32.xlu0 %v2876_v6 }
 0x851   : > { %2932 = vrot.lane.b32.xlu1 %v6108_v29, %s4161_s17 }
 0x855   : > { %2934 = vrot.lane.b32.xlu1 %v6109_v31, %s4161_s17 }
 0x858   : > { %2930 = vrot.lane.b32.xlu0 %v6110_v22, %s4161_s17 }
 0x859   : > { %2936 = vrot.lane.b32.xlu1 %v6111_v62, %s4161_s17 }
 0x85c   : > { %2938 = vrot.lane.b32.xlu0 %v6112_v57, %s4161_s17 }
 0x85d   : > { %2940 = vrot.lane.b32.xlu1 %v6113_v9, %s4161_s17 }
 0x860   : > { %2942 = vrot.lane.b32.xlu0 %v6114_v53, %s4161_s17 }
 0x861   : > { %2944 = vrot.lane.b32.xlu1 %v6115_v51, %s4161_s17 }
 0x864   : > { %2946 = vrot.lane.b32.xlu0 %v6116_v14, %s4161_s17 }
 0x865   : > { %2948 = vrot.lane.b32.xlu1 %v6117_v8, %s4161_s17 }
 0x868   : > { %2950 = vrot.lane.b32.xlu0 %v6118_v12, %s4161_s17 }
 0x869   : > { %2952 = vrot.lane.b32.xlu1 %v6119_v49, %s4161_s17 }
 0x86c   : > { %2954 = vrot.lane.b32.xlu0 %v6120_v42, %s4161_s17 }
 0x86d   : > { %2956 = vrot.lane.b32.xlu1 %v6121_v52, %s4161_s17 }
 0x870   : > { %2958 = vrot.lane.b32.xlu0 %v6122_v61, %s4161_s17 }
 0x871   : > { %2960 = vrot.lane.b32.xlu1 %v6123_v23, %s4161_s17 }
 0x884   : > { %v2839_v36 = vpop.xlane.xlu1 %2838 }
 0x885   : > { %4105 = vrcp.f32 %v2839_v36 }
 0x886   : > { %v2836_v17 = vpop.xlane.xlu0 %2835 }
 0x887   : > { %4107 = vrcp.f32 %v2836_v17 }
 0x892   : > { %v4106_v59 = vpop.eup %4105 }
 0x893   : > { %v2899_v27 = vmul.f32 %v4106_v59, %v5681_v16 }
 0x894   : > { %v4108_v32 = vpop.eup %4107 }
 0x895   : > { %2996 = vrot.lane.b32.xlu1 %v2899_v27, %s4162_s19  ;;  %v2898_v41 = vmul.f32 %v4108_v32, %v5685_v21 }
 0x897   : > { %2994 = vrot.lane.b32.xlu0 %v2898_v41, %s4162_s19 }
 0x899   : > { %v2845_v45 = vpop.xlane.xlu1 %2844 }
 0x89a   : > { %4109 = vrcp.f32 %v2845_v45 }
 0x89b   : > { %v2842_v55 = vpop.xlane.xlu0 %2841 }
 0x89c   : > { %4111 = vrcp.f32 %v2842_v55 }
 0x8a5   : > { %v2851_v39 = vpop.xlane.xlu1 %2850 }
 0x8a6   : > { %4113 = vrcp.f32 %v2851_v39 }
 0x8a7   : > { %v2848_v38 = vpop.xlane.xlu0 %2847  ;;  %v4110_v63 = vpop.eup %4109 }
 0x8a8   : > { %4115 = vrcp.f32 %v2848_v38  ;;  %v2901_v50 = vmul.f32 %v4110_v63, %v5693_v11 }
 0x8a9   : > { %v4112_v16 = vpop.eup %4111 }
 0x8aa   : > { %3000 = vrot.lane.b32.xlu1 %v2901_v50, %s4162_s19  ;;  %v2900_v48 = vmul.f32 %v4112_v16, %v5697_v2 }
 0x8ac   : > { %2998 = vrot.lane.b32.xlu0 %v2900_v48, %s4162_s19 }
 0x8b3   : > { %v4114_v21 = vpop.eup %4113 }
 0x8b4   : > { %v2903_v25 = vmul.f32 %v4114_v21, %v5701_v35 }
 0x8b5   : > { %v4116_v58 = vpop.eup %4115 }
 0x8b6   : > { %3004 = vrot.lane.b32.xlu1 %v2903_v25, %s4162_s19  ;;  %v2902_v6 = vmul.f32 %v4116_v58, %v5706_v1 }
 0x8b8   : > { %v2857_v29 = vpop.xlane.xlu1 %2856  ;;  %3002 = vrot.lane.b32.xlu0 %v2902_v6, %s4162_s19 }
 0x8b9   : > { %4117 = vrcp.f32 %v2857_v29 }
 0x8ba   : > { %v2854_v11 = vpop.xlane.xlu0 %2853 }
 0x8bb   : > { %4119 = vrcp.f32 %v2854_v11 }
 0x8bc   : > { %v2863_v31 = vpop.xlane.xlu1 %2862 }
 0x8bd   : > { %4121 = vrcp.f32 %v2863_v31 }
 0x8be   : > { %v2860_v22 = vpop.xlane.xlu0 %2859 }
 0x8bf   : > { %4123 = vrcp.f32 %v2860_v22 }
 0x8c0   : > { %v2869_v2 = vpop.xlane.xlu1 %2868 }
 0x8c1   : > { %4125 = vrcp.f32 %v2869_v2 }
 0x8c2   : > { %v2866_v62 = vpop.xlane.xlu0 %2865 }
 0x8c3   : > { %4127 = vrcp.f32 %v2866_v62 }
 0x8c4   : > { %v2875_v35 = vpop.xlane.xlu1 %2874 }
 0x8c5   : > { %4129 = vrcp.f32 %v2875_v35 }
 0x8c6   : > { %v4118_v57 = vpop.eup %4117  ;;  %v2872_v9 = vpop.xlane.xlu0 %2871 }
 0x8c7   : > { %4131 = vrcp.f32 %v2872_v9  ;;  %v2905_v1 = vmul.f32 %v4118_v57, %v5718_v0 }
 0x8c8   : > { %v4120_v53 = vpop.eup %4119 }
 0x8c9   : > { %v2881_v51 = vpop.xlane.xlu1 %2880  ;;  %3008 = vrot.lane.b32.xlu1 %v2905_v1, %s4162_s19  ;;  %v2904_v14 = vmul.f32 %v4120_v53, %v5723_v60 }
 0x8ca   : > { %4133 = vrcp.f32 %v2881_v51  ;;  %v4122_v8 = vpop.eup %4121 }
 0x8cb   : > { %v2878_v12 = vpop.xlane.xlu0 %2877  ;;  %3006 = vrot.lane.b32.xlu0 %v2904_v14, %s4162_s19  ;;  %v2907_v49 = vmul.f32 %v4122_v8, %v5727_v43 }
 0x8cc   : > { %4135 = vrcp.f32 %v2878_v12  ;;  %v4124_v42 = vpop.eup %4123 }
 0x8cd   : > { %3012 = vrot.lane.b32.xlu1 %v2907_v49, %s4162_s19  ;;  %v2906_v52 = vmul.f32 %v4124_v42, %v5731_v19  ;;  %v2933_v32 = vpop.permute.xlu1 %2932 }
 0x8ce   : > { %v4126_v0 = vpop.eup %4125  ;;  %v3043_v58 = vsel %vm2323_vm15, %v5200_v3, %v2933_v32 }
 0x8cf   : > { %3010 = vrot.lane.b32.xlu0 %v2906_v52, %s4162_s19  ;;  %v2909_v61 = vmul.f32 %v4126_v0, %v5735_v46  ;;  %v2931_v45 = vpop.permute.xlu0 %2930 }
 0x8d0   : > { %v4128_v23 = vpop.eup %4127  ;;  %v3042_v11 = vsel %vm2323_vm15, %v5184_v20, %v2931_v45 }
 0x8d1   : > { %3016 = vrot.lane.b32.xlu1 %v2909_v61, %s4162_s19  ;;  %v2908_v60 = vmul.f32 %v4128_v23, %v5739_v33  ;;  %v2935_v41 = vpop.permute.xlu1 %2934 }
 0x8d2   : > { %v4130_v36 = vpop.eup %4129  ;;  %v3044_v20 = vsel %vm2323_vm15, %v5326_v13, %v2935_v41 }
 0x8d3   : > { %3014 = vrot.lane.b32.xlu0 %v2908_v60, %s4162_s19  ;;  %v2911_v43 = vmul.f32 %v4130_v36, %v5743_v15  ;;  %v2939_v39 = vpop.permute.xlu0 %2938 }
 0x8d4   : > { %v4132_v17 = vpop.eup %4131  ;;  %v3046_v13 = vsel %vm2323_vm15, %v5390_v44, %v2939_v39 }
 0x8d5   : > { %3020 = vrot.lane.b32.xlu1 %v2911_v43, %s4162_s19  ;;  %v2910_v19 = vmul.f32 %v4132_v17, %v5747_v47  ;;  %v2937_v15 = vpop.permute.xlu1 %2936 }
 0x8d6   : > { %v3045_v62 = vsel %vm2323_vm15, %v5316_v34, %v2937_v15 }
 0x8d7   : > { %v4134_v59 = vpop.eup %4133  ;;  %3018 = vrot.lane.b32.xlu0 %v2910_v19, %s4162_s19  ;;  %v2943_v38 = vpop.permute.xlu0 %2942 }
 0x8d8   : > { %v2913_v46 = vmul.f32 %v4134_v59, %v5751_v4  ;;  %v3048_v44 = vsel %vm2323_vm15, %v5434_v7, %v2943_v38 }
 0x8d9   : > { %v4136_v27 = vpop.eup %4135  ;;  %v2941_v55 = vpop.permute.xlu1 %2940 }
 0x8da   : > { %3024 = vrot.lane.b32.xlu1 %v2913_v46, %s4162_s19  ;;  %v2912_v33 = vmul.f32 %v4136_v27, %v5755_v10  ;;  %v3047_v34 = vsel %vm2323_vm15, %v5416_v30, %v2941_v55 }
 0x8db   : > { %v2947_v50 = vpop.permute.xlu0 %2946 }
 0x8dc   : > { %3022 = vrot.lane.b32.xlu0 %v2912_v33, %s4162_s19  ;;  %v3050_v7 = vsel %vm2323_vm15, %v5516_v28, %v2947_v50 }
 0x8dd   : > { %v2945_v47 = vpop.permute.xlu1 %2944 }
 0x8de   : > { %v3049_v30 = vsel %vm2323_vm15, %v5508_v26, %v2945_v47 }
 0x8df   : > { %v5807_v4 = vpop.permute.xlu0 %2950 }
 0x8e0   : > { %v3052_v28 = vsel %vm2323_vm15, %v5537_v56, %v5807_v4 }
 0x8e1   : > { %v2949_v63 = vpop.permute.xlu1 %2948 }
 0x8e2   : > { %v3051_v43 = vsel %vm2323_vm15, %v5529_v5, %v2949_v63 }
 0x8e3   : > { %v5811_v21 = vpop.permute.xlu0 %2954 }
 0x8e4   : > { %v3054_v38 = vsel %vm2323_vm15, %v5554_v37, %v5811_v21 }
 0x8e5   : > { %v2953_v16 = vpop.permute.xlu1 %2952 }
 0x8e6   : > { %v3053_v5 = vsel %vm2323_vm15, %v5551_v18, %v2953_v16 }
 0x8e7   : > { %v5815_v25 = vpop.permute.xlu0 %2958 }
 0x8e8   : > { %v3056_v37 = vsel %vm2323_vm15, %v5576_v24, %v5815_v25 }
 0x8e9   : > { %v5809_v48 = vpop.permute.xlu1 %2956 }
 0x8ea   : > { %v3055_v55 = vsel %vm2323_vm15, %v5568_v54, %v5809_v48 }
 0x8ed   : > { %v5813_v10 = vpop.permute.xlu1 %2960 }
 0x8ee   : > { %v3057_v16 = vsel %vm2323_vm15, %v5583_v40, %v5813_v10 }
 0x907   : > { %v2997_v6 = vpop.permute.xlu1 %2996 }
 0x908   : > { %v3060_v29 = vsel %vm3058_vm4, %v3043_v58, %v2997_v6 }
 0x909   : > { %v3077_v31 = vsel %vm3075_vm6, %v3060_v29, 0.0  ;;  %v2995_v3 = vpop.permute.xlu0 %2994 }
 0x90a   : > { %3094 = vst.msk [vmem:[%s5824_s23 + $0x8] sm:$0xff] %vm3092_vm12, %v3077_v31  ;;  %v3059_v22 = vsel %vm3058_vm4, %v3042_v11, %v2995_v3 }
 0x90b   : > { %v3076_v2 = vsel %vm3075_vm6, %v3059_v22, 0.0 }
 0x90c   : > { %3093 = vst.msk [vmem:[%s5824_s23] sm:$0xff] %vm3092_vm12, %v3076_v2 }
 0x91c   : > { %v3001_v35 = vpop.permute.xlu1 %3000 }
 0x91d   : > { %v3062_v57 = vsel %vm3058_vm4, %v3045_v62, %v3001_v35 }
 0x91e   : > { %v3079_v9 = vsel %vm3075_vm6, %v3062_v57, 0.0  ;;  %v2999_v1 = vpop.permute.xlu0 %2998 }
 0x91f   : > { %3096 = vst.msk [vmem:[%s5824_s23 + $0x18] sm:$0xff] %vm3092_vm12, %v3079_v9  ;;  %v3061_v53 = vsel %vm3058_vm4, %v3044_v20, %v2999_v1 }
 0x920   : > { %v3078_v51 = vsel %vm3075_vm6, %v3061_v53, 0.0 }
 0x921   : > { %3095 = vst.msk [vmem:[%s5824_s23 + $0x10] sm:$0xff] %vm3092_vm12, %v3078_v51 }
 0x928   : > { %v3005_v14 = vpop.permute.xlu1 %3004 }
 0x929   : > { %v3064_v8 = vsel %vm3058_vm4, %v3047_v34, %v3005_v14 }
 0x92a   : > { %v3081_v12 = vsel %vm3075_vm6, %v3064_v8, 0.0  ;;  %v3003_v49 = vpop.permute.xlu0 %3002 }
 0x92b   : > { %3098 = vst.msk [vmem:[%s5824_s23 + $0x28] sm:$0xff] %vm3092_vm12, %v3081_v12  ;;  %v3063_v42 = vsel %vm3058_vm4, %v3046_v13, %v3003_v49 }
 0x92c   : > { %v3080_v52 = vsel %vm3075_vm6, %v3063_v42, 0.0 }
 0x92d   : > { %3097 = vst.msk [vmem:[%s5824_s23 + $0x20] sm:$0xff] %vm3092_vm12, %v3080_v52 }
 0x93b   : > { %v3009_v0 = vpop.permute.xlu1 %3008 }
 0x93c   : > { %v3066_v61 = vsel %vm3058_vm4, %v3049_v30, %v3009_v0 }
 0x93d   : > { %v3083_v23 = vsel %vm3075_vm6, %v3066_v61, 0.0  ;;  %v3007_v60 = vpop.permute.xlu0 %3006 }
 0x93e   : > { %3100 = vst.msk [vmem:[%s5824_s23 + $0x38] sm:$0xff] %vm3092_vm12, %v3083_v23  ;;  %v3065_v36 = vsel %vm3058_vm4, %v3048_v44, %v3007_v60 }
 0x93f   : > { %v3082_v26 = vsel %vm3075_vm6, %v3065_v36, 0.0  ;;  %v3013_v17 = vpop.permute.xlu1 %3012 }
 0x940   : > { %3099 = vst.msk [vmem:[%s5824_s23 + $0x30] sm:$0xff] %vm3092_vm12, %v3082_v26  ;;  %v3068_v19 = vsel %vm3058_vm4, %v3051_v43, %v3013_v17 }
 0x941   : > { %v3085_v59 = vsel %vm3075_vm6, %v3068_v19, 0.0  ;;  %v3011_v46 = vpop.permute.xlu0 %3010 }
 0x942   : > { %3102 = vst.msk [vmem:[%s5824_s23 + $0x48] sm:$0xff] %vm3092_vm12, %v3085_v59  ;;  %v3067_v27 = vsel %vm3058_vm4, %v3050_v7, %v3011_v46 }
 0x943   : > { %v3084_v32 = vsel %vm3075_vm6, %v3067_v27, 0.0  ;;  %v3017_v33 = vpop.permute.xlu1 %3016 }
 0x944   : > { %3101 = vst.msk [vmem:[%s5824_s23 + $0x40] sm:$0xff] %vm3092_vm12, %v3084_v32  ;;  %v3070_v41 = vsel %vm3058_vm4, %v3053_v5, %v3017_v33 }
 0x945   : > { %v3087_v15 = vsel %vm3075_vm6, %v3070_v41, 0.0  ;;  %v3015_v45 = vpop.permute.xlu0 %3014 }
 0x946   : > { %3104 = vst.msk [vmem:[%s5824_s23 + $0x58] sm:$0xff] %vm3092_vm12, %v3087_v15  ;;  %v3069_v18 = vsel %vm3058_vm4, %v3052_v28, %v3015_v45 }
 0x947   : > { %v3086_v39 = vsel %vm3075_vm6, %v3069_v18, 0.0  ;;  %v3021_v47 = vpop.permute.xlu1 %3020 }
 0x948   : > { %3103 = vst.msk [vmem:[%s5824_s23 + $0x50] sm:$0xff] %vm3092_vm12, %v3086_v39  ;;  %v3072_v56 = vsel %vm3058_vm4, %v3055_v55, %v3021_v47 }
 0x949   : > { %v3089_v63 = vsel %vm3075_vm6, %v3072_v56, 0.0  ;;  %v3019_v50 = vpop.permute.xlu0 %3018 }
 0x94a   : > { %3106 = vst.msk [vmem:[%s5824_s23 + $0x68] sm:$0xff] %vm3092_vm12, %v3089_v63  ;;  %v3071_v54 = vsel %vm3058_vm4, %v3054_v38, %v3019_v50 }
 0x94b   : > { %v3088_v4 = vsel %vm3075_vm6, %v3071_v54, 0.0 }
 0x94c   : > { %v3025_v48 = vpop.permute.xlu1 %3024  ;;  %3105 = vst.msk [vmem:[%s5824_s23 + $0x60] sm:$0xff] %vm3092_vm12, %v3088_v4 }
 0x94d   : > { %v3074_v58 = vsel %vm3058_vm4, %v3057_v16, %v3025_v48 }
 0x94e   : > { %v3091_v21 = vsel %vm3075_vm6, %v3074_v58, 0.0  ;;  %v3023_v6 = vpop.permute.xlu0 %3022 }
 0x94f   : > { %3108 = vst.msk [vmem:[%s5824_s23 + $0x78] sm:$0xff] %vm3092_vm12, %v3091_v21  ;;  %v3073_v29 = vsel %vm3058_vm4, %v3056_v37, %v3023_v6 }
 0x950   : > { %v3090_v40 = vsel %vm3075_vm6, %v3073_v29, 0.0 }
 0x951   : > { %3107 = vst.msk [vmem:[%s5824_s23 + $0x70] sm:$0xff] %vm3092_vm12, %v3090_v40 }
 0x952 PF: > { %s13_s12 = sadd.s32 1, %s4159_s12  }
 0x953   : > { %p10_p4 = scmp.ge.s32.totalorder %s13_s12, 4  }
 0x955   :  { %12 = sbr.rel (!%p10_p4) target bundleno = 1 (0x1), region = 69 }

</bundles_post_ra>
